<compile_context>
chip_gen: v7x
topology: tpu7x:2x2x1
jax: 0.10.0
libtpu: 0.0.40
codegen_flags: <defaults>
</compile_context>

<pallas_src>
import math

import jax
import jax.numpy as jnp
from jax import lax
from jax.experimental import pallas as pl
from jax.experimental.pallas import tpu as pltpu


def _default_vmem_limit():
    """Chip-aware scoped-VMEM limit (3/4 capacity, capped at 100 MiB)."""
    try:
        cap = pltpu.get_tpu_info().vmem_capacity_bytes
        return min(int(cap * 3 // 4), 100 * 1024 * 1024)
    except Exception:
        return None


def _mha_heads(q, k_ref, v_ref, mask_bias, ctx_scr, w_out_ref,
               n_heads, dph, cdt, approx_recip):
    """Multi-head attention core.

    q:        (TQ, D) cdt query projection (1/sqrt(dph) already folded in).
    k_ref:    (Sk, D) cdt VMEM scratch holding the K projection.
    v_ref:    (Sk, D) cdt VMEM scratch holding the V projection.
    mask_bias:(1, Sk) f32 additive bias (-inf where masked, else 0).
    ctx_scr:  (TQ, D) f32 VMEM scratch; each head writes its context at lane
              offset h*dph (no concatenation of narrow head tiles).
    """
    # Heads stay a short static unroll (n_heads is small & fixed); dynamic
    # lane-offset slicing of width dph lowers poorly on TPU.
    # TODO(synk): pack two heads per MXU call (128-deep contraction) with a
    # block-diagonal score mask if a bundle dump shows the MXU is the binding
    # slot (dph=64 feeds only 1/4 of v6e/v7x's 256-deep MXU).
    # TODO(synk): verify via bundle dump whether dot_general contracting the
    # last dims emits per-head vxpose of the (Sk, dph) tile; if so, transpose
    # K once per batch into a (D, Sk) scratch instead.
    for h in range(n_heads):
        lo = h * dph
        hi = lo + dph
        qh = q[:, lo:hi]                      # (TQ, dph) cdt
        kh = k_ref[:, lo:hi]                  # (Sk, dph) cdt
        vh = v_ref[:, lo:hi]                  # (Sk, dph) cdt
        # Contract the last dims directly -> no materialized kh.T.
        scores = lax.dot_general(
            qh, kh, dimension_numbers=(((1,), (1,)), ((), ())),
            preferred_element_type=jnp.float32)               # (TQ, Sk) f32
        scores = scores + mask_bias
        s_max = jnp.max(scores, axis=-1, keepdims=True)
        e = jnp.exp(scores - s_max)                           # f32 (EUP)
        denom = jnp.sum(e, axis=-1, keepdims=True)
        w_h = e * pl.reciprocal(denom, approx=approx_recip)
        if w_out_ref is not None:
            w_out_ref[0, h] = w_h.astype(w_out_ref.dtype)
        ctx_scr[:, lo:hi] = jnp.dot(w_h.astype(cdt), vh,
                                    preferred_element_type=jnp.float32)


def _make_selfattn_kernel(n_heads, dph, d_model, cdt, out_weights, approx_recip):
    """Self-attention path: K|V projected with one (S,D)@(D,2D) matmul, once
    per batch, into VMEM scratch; q projected per q-tile."""
    def kernel(xq_in, xkv_in, m_in, w_q, b_q, w_kv, b_kv, w_o, b_o, *rest):
        if out_weights:
            ctx_out, w_out, k_scr, v_scr, ctx_scr = rest
        else:
            (ctx_out, k_scr, v_scr, ctx_scr), w_out = rest, None

        # K/V for the whole sequence, only at the first q-tile of each batch.
        @pl.when(pl.program_id(1) == 0)
        def _():
            kv = jnp.dot(xkv_in[0], w_kv[...],
                         preferred_element_type=jnp.float32) + b_kv[...]
            k_scr[...] = kv[:, :d_model].astype(k_scr.dtype)
            v_scr[...] = kv[:, d_model:].astype(v_scr.dtype)

        q = (jnp.dot(xq_in[0], w_q[...],
                     preferred_element_type=jnp.float32) + b_q[...]).astype(cdt)
        mask_bias = jnp.where(m_in[0] == 0.0,
                              jnp.float32(-jnp.inf), jnp.float32(0.0))  # (1,Sk)
        _mha_heads(q, k_scr, v_scr, mask_bias, ctx_scr, w_out,
                   n_heads, dph, cdt, approx_recip)
        out = jnp.dot(ctx_scr[...].astype(cdt), w_o[...],
                      preferred_element_type=jnp.float32) + b_o[...]
        ctx_out[0] = out.astype(ctx_out.dtype)
    return kernel


def _make_crossattn_kernel(n_heads, dph, cdt, out_weights, approx_recip):
    """General path: distinct query/key/value inputs; K/V projected once per
    batch into VMEM scratch, reused across q-tiles (no recompute per tile)."""
    def kernel(q_in, k_in, v_in, m_in, w_q, b_q, w_k, b_k, w_v, b_v,
               w_o, b_o, *rest):
        if out_weights:
            ctx_out, w_out, k_scr, v_scr, ctx_scr = rest
        else:
            (ctx_out, k_scr, v_scr, ctx_scr), w_out = rest, None

        @pl.when(pl.program_id(1) == 0)
        def _():
            k = jnp.dot(k_in[0], w_k[...],
                        preferred_element_type=jnp.float32) + b_k[...]
            v = jnp.dot(v_in[0], w_v[...],
                        preferred_element_type=jnp.float32) + b_v[...]
            k_scr[...] = k.astype(k_scr.dtype)
            v_scr[...] = v.astype(v_scr.dtype)

        q = (jnp.dot(q_in[0], w_q[...],
                     preferred_element_type=jnp.float32) + b_q[...]).astype(cdt)
        mask_bias = jnp.where(m_in[0] == 0.0,
                              jnp.float32(-jnp.inf), jnp.float32(0.0))
        _mha_heads(q, k_scr, v_scr, mask_bias, ctx_scr, w_out,
                   n_heads, dph, cdt, approx_recip)
        out = jnp.dot(ctx_scr[...].astype(cdt), w_o[...],
                      preferred_element_type=jnp.float32) + b_o[...]
        ctx_out[0] = out.astype(ctx_out.dtype)
    return kernel


def randomized_distilbert_self_attention(query, key, value, mask, params,
                                         n_heads,
                                         output_attentions=True,
                                         weights_dtype=jnp.bfloat16,
                                         compute_dtype=jnp.bfloat16,
                                         block_q=None,
                                         approx_softmax_recip=False,
                                         vmem_limit_bytes=None):
    """Returns (context,) or (context, attention_weights), like the torch module.

    query: (bs, Sq, D); key/value: (bs, Sk, D); mask: (bs, Sk), nonzero=attend.
    params: torch.nn.Linear-convention weights W:(out,in) and biases (out,).
    """
    bs, Sq, D = query.shape
    Sk = key.shape[1]
    dph = D // n_heads
    cdt = compute_dtype
    inv = jnp.float32(1.0 / math.sqrt(dph))

    if block_q is None:
        # v7x-friendly default: tile query rows so per-step score / weights
        # tiles stay small; (8,128)-legal and divides Sq.
        block_q = Sq
        for cand in (256, 128):
            if Sq > cand and Sq % cand == 0:
                block_q = cand
                break
    block_q = min(block_q, Sq)
    assert Sq % block_q == 0, "block_q must divide the query length"
    nq = Sq // block_q

    mask3 = mask.reshape(bs, 1, Sk).astype(jnp.float32)

    # Pre-transpose to (in, out); fold 1/sqrt(dph) into Wq/bq; cast W to cdt.
    wq_t = (params["wq"].astype(jnp.float32).T * inv).astype(cdt)
    wk_t = params["wk"].T.astype(cdt)
    wv_t = params["wv"].T.astype(cdt)
    wo_t = params["wo"].T.astype(cdt)
    bq = (params["bq"].astype(jnp.float32) * inv).reshape(1, D)
    bk = params["bk"].reshape(1, D).astype(jnp.float32)
    bv = params["bv"].reshape(1, D).astype(jnp.float32)
    bo = params["bo"].reshape(1, D).astype(jnp.float32)

    # Fused K|V projection only valid when key/value (and query) are the same
    # tensor. NOTE: object identity check -> equal-but-distinct arrays fall
    # back to the (correct but slightly slower) cross-attention path.
    fuse_kv = (query is key) and (key is value)

    out_shape = [jax.ShapeDtypeStruct((bs, Sq, D), query.dtype)]
    if output_attentions:
        out_shape.append(
            jax.ShapeDtypeStruct((bs, n_heads, Sq, Sk), weights_dtype))
    out_shape = tuple(out_shape)

    if vmem_limit_bytes is None:
        vmem_limit_bytes = _default_vmem_limit()

    scratch_shapes = [
        pltpu.VMEM((Sk, D), cdt),          # K projection (cached per batch)
        pltpu.VMEM((Sk, D), cdt),          # V projection (cached per batch)
        pltpu.VMEM((block_q, D), jnp.float32),   # per-head contexts
    ]

    out_specs = [pl.BlockSpec((1, block_q, D), lambda b, i: (b, i, 0))]
    if output_attentions:
        out_specs.append(
            pl.BlockSpec((1, n_heads, block_q, Sk), lambda b, i: (b, 0, i, 0)))
    out_specs = tuple(out_specs)

    _wmap = lambda b, i: (0, 0)  # constant index map for weights / biases

    if fuse_kv:
        w_kv = jnp.concatenate([wk_t, wv_t], axis=1)        # (D, 2D)
        b_kv = jnp.concatenate([bk, bv], axis=1)             # (1, 2D)
        kernel = _make_selfattn_kernel(n_heads, dph, D, cdt,
                                       output_attentions, approx_softmax_recip)
        x = query.astype(cdt)
        args = (x, x, mask3, wq_t, bq, w_kv, b_kv, wo_t, bo)
        weight_shapes = [(D, D), (1, D), (D, 2 * D), (1, 2 * D), (D, D), (1, D)]
        act_specs = [
            pl.BlockSpec((1, block_q, D), lambda b, i: (b, i, 0)),  # x q-tile
            pl.BlockSpec((1, Sk, D), lambda b, i: (b, 0, 0)),       # x (K/V)
            pl.BlockSpec((1, 1, Sk), lambda b, i: (b, 0, 0)),       # mask
        ]
    else:
        kernel = _make_crossattn_kernel(n_heads, dph, cdt,
                                        output_attentions, approx_softmax_recip)
        args = (query.astype(cdt), key.astype(cdt), value.astype(cdt), mask3,
                wq_t, bq, wk_t, bk, wv_t, bv, wo_t, bo)
        weight_shapes = [(D, D), (1, D), (D, D), (1, D),
                         (D, D), (1, D), (D, D), (1, D)]
        act_specs = [
            pl.BlockSpec((1, block_q, D), lambda b, i: (b, i, 0)),  # query
            pl.BlockSpec((1, Sk, D), lambda b, i: (b, 0, 0)),       # key
            pl.BlockSpec((1, Sk, D), lambda b, i: (b, 0, 0)),       # value
            pl.BlockSpec((1, 1, Sk), lambda b, i: (b, 0, 0)),       # mask
        ]

    def _launch(single_buffer_weights):
        if single_buffer_weights:
            # Constant-index weights: a second pipeline buffer is pure VMEM
            # waste -> request a single buffer.
            wspecs = [pl.BlockSpec(s, _wmap, pipeline_mode=pl.Buffered(1))
                      for s in weight_shapes]
        else:
            wspecs = [pl.BlockSpec(s, _wmap) for s in weight_shapes]
        in_specs = act_specs + wspecs
        return pl.pallas_call(
            kernel,
            out_shape=out_shape,
            grid_spec=pltpu.PrefetchScalarGridSpec(
                num_scalar_prefetch=0,
                grid=(bs, nq),
                in_specs=in_specs,
                out_specs=out_specs,
                scratch_shapes=scratch_shapes),
            compiler_params=pltpu.CompilerParams(
                # batch "parallel" (megacore / 2-TC sharding); q-tile axis is
                # "arbitrary" because the K/V scratch carries across it.
                dimension_semantics=("parallel", "arbitrary"),
                vmem_limit_bytes=vmem_limit_bytes),
        )(*args)

    try:
        outs = _launch(True)
    except Exception:
        # pipeline_mode=pl.Buffered(1) unsupported -> default double-buffered
        # weight specs (same result, slightly more VMEM).
        outs = _launch(False)

    if output_attentions:
        return outs[0], outs[1]
    return (outs[0],)


def _reference(query, key, value, mask, params, n_heads):
    """Pure-JAX reference mirroring the torch forward (exact attention path)."""
    bs, Sq, D = query.shape
    Sk = key.shape[1]
    dph = D // n_heads

    def lin(x, w, b):
        return x @ w.T + b

    def split(x, L):
        return x.reshape(bs, L, n_heads, dph).transpose(0, 2, 1, 3)

    q = split(lin(query, params["wq"], params["bq"]), Sq) / math.sqrt(dph)
    k = split(lin(key, params["wk"], params["bk"]), Sk)
    v = split(lin(value, params["wv"], params["bv"]), Sk)

    scores = jnp.einsum("bhqd,bhkd->bhqk", q, k)
    m = (mask == 0).reshape(bs, 1, 1, Sk)
    scores = jnp.where(m, -jnp.inf, scores)
    weights = jax.nn.softmax(scores, axis=-1)
    ctx = jnp.einsum("bhqk,bhkd->bhqd", weights, v)
    ctx = ctx.transpose(0, 2, 1, 3).reshape(bs, Sq, D)
    out = lin(ctx, params["wo"], params["bo"])
    return out, weights


if __name__ == "__main__":
    bs, S, D, n_heads = 2, 16, 32, 4

    key0 = jax.random.PRNGKey(0)
    keys = jax.random.split(key0, 16)
    scale = 0.05
    params = {
        "wq": scale * jax.random.normal(keys[0], (D, D), jnp.float32),
        "bq": scale * jax.random.normal(keys[1], (D,), jnp.float32),
        "wk": scale * jax.random.normal(keys[2], (D, D), jnp.float32),
        "bk": scale * jax.random.normal(keys[3], (D,), jnp.float32),
        "wv": scale * jax.random.normal(keys[4], (D, D), jnp.float32),
        "bv": scale * jax.random.normal(keys[5], (D,), jnp.float32),
        "wo": scale * jax.random.normal(keys[6], (D, D), jnp.float32),
        "bo": scale * jax.random.normal(keys[7], (D,), jnp.float32),
    }

    query = jax.random.normal(keys[8], (bs, S, D), jnp.float32)
    key_t = jax.random.normal(keys[9], (bs, S, D), jnp.float32)
    value = jax.random.normal(keys[10], (bs, S, D), jnp.float32)

    # attention mask: 1 = attend, 0 = masked (pad last two tokens of batch 1)
    mask = jnp.ones((bs, S), jnp.float32)
    mask = mask.at[1, -2:].set(0.0)

    tol_f32 = dict(atol=5e-3, rtol=5e-3)
    tol_bf16 = dict(atol=3e-2, rtol=3e-2)

    ctx_ref, w_ref = _reference(query, key_t, value, mask, params, n_heads)
    ctx_ref_sa, w_ref_sa = _reference(query, query, query, mask, params, n_heads)

    # 1) cross-attention path, bf16 defaults, q-row tiling (nq=2, K/V cached)
    ctx, weights = randomized_distilbert_self_attention(
        query, key_t, value, mask, params, n_heads,
        output_attentions=True, block_q=8)
    jax.block_until_ready((ctx, weights))
    assert jnp.allclose(ctx, ctx_ref, **tol_bf16)
    assert jnp.allclose(weights.astype(jnp.float32), w_ref, **tol_bf16)

    # 2) self-attention (fused K|V projection), f32 compute, q tiled
    ctx_sa, w_sa = randomized_distilbert_self_attention(
        query, query, query, mask, params, n_heads,
        output_attentions=True, weights_dtype=jnp.float32,
        compute_dtype=jnp.float32, block_q=8)
    jax.block_until_ready((ctx_sa, w_sa))
    assert jnp.allclose(ctx_sa, ctx_ref_sa, **tol_f32)
    assert jnp.allclose(w_sa, w_ref_sa, **tol_f32)

    # 3) self-attention, bf16 defaults, single q tile (nq == 1)
    ctx_sa2, w_sa2 = randomized_distilbert_self_attention(
        query, query, query, mask, params, n_heads, output_attentions=True)
    jax.block_until_ready((ctx_sa2, w_sa2))
    assert jnp.allclose(ctx_sa2, ctx_ref_sa, **tol_bf16)
    assert jnp.allclose(w_sa2.astype(jnp.float32), w_ref_sa, **tol_bf16)

    # 4) output_attentions=False, f32, cross path with k_length != q_length
    Sk = 24
    key_l = jax.random.normal(keys[11], (bs, Sk, D), jnp.float32)
    val_l = jax.random.normal(keys[12], (bs, Sk, D), jnp.float32)
    mask_l = jnp.ones((bs, Sk), jnp.float32)
    mask_l = mask_l.at[0, -3:].set(0.0)
    (ctx_only,) = randomized_distilbert_self_attention(
        query, key_l, val_l, mask_l, params, n_heads,
        output_attentions=False, compute_dtype=jnp.float32, block_q=8)
    jax.block_until_ready(ctx_only)
    ctx_ref_l, _ = _reference(query, key_l, val_l, mask_l, params, n_heads)
    assert jnp.allclose(ctx_only, ctx_ref_l, **tol_f32)

    print("KERNEL_OK")
</pallas_src>

<mosaic_0001>
module attributes {stable_mosaic.version = 11 : i64} {
  func.func @kernel(%arg0: i32, %arg1: i32, %arg2: memref<1x8x32xbf16, #tpu.memory_space<vmem>>, %arg3: memref<1x16x32xbf16, #tpu.memory_space<vmem>>, %arg4: memref<1x16x32xbf16, #tpu.memory_space<vmem>>, %arg5: memref<1x1x16xf32, #tpu.memory_space<vmem>>, %arg6: memref<32x32xbf16, #tpu.memory_space<vmem>>, %arg7: memref<1x32xf32, #tpu.memory_space<vmem>>, %arg8: memref<32x32xbf16, #tpu.memory_space<vmem>>, %arg9: memref<1x32xf32, #tpu.memory_space<vmem>>, %arg10: memref<32x32xbf16, #tpu.memory_space<vmem>>, %arg11: memref<1x32xf32, #tpu.memory_space<vmem>>, %arg12: memref<32x32xbf16, #tpu.memory_space<vmem>>, %arg13: memref<1x32xf32, #tpu.memory_space<vmem>>, %arg14: memref<1x8x32xf32, #tpu.memory_space<vmem>>, %arg15: memref<1x4x8x16xbf16, #tpu.memory_space<vmem>>, %arg16: memref<16x32xbf16, #tpu.memory_space<vmem>>, %arg17: memref<16x32xbf16, #tpu.memory_space<vmem>>, %arg18: memref<8x32xf32, #tpu.memory_space<vmem>>) attributes {dimension_semantics = [#tpu.dimension_semantics<parallel>, #tpu.dimension_semantics<arbitrary>], iteration_bounds = array<i64: 2, 2>, scalar_prefetch = 0 : i64, scratch_operands = 3 : i64, tpu.core_type = #tpu.core_type<tc>, window_params = [{transform_indices = @transform_0, window_bounds = array<i64: 1, 8, 32>}, {transform_indices = @transform_1, window_bounds = array<i64: 1, 16, 32>}, {transform_indices = @transform_2, window_bounds = array<i64: 1, 16, 32>}, {transform_indices = @transform_3, window_bounds = array<i64: 1, 1, 16>}, {pipeline_mode = #tpu.pipeline_mode<synchronous>, transform_indices = @transform_4, window_bounds = array<i64: 32, 32>}, {pipeline_mode = #tpu.pipeline_mode<synchronous>, transform_indices = @transform_5, window_bounds = array<i64: 1, 32>}, {pipeline_mode = #tpu.pipeline_mode<synchronous>, transform_indices = @transform_6, window_bounds = array<i64: 32, 32>}, {pipeline_mode = #tpu.pipeline_mode<synchronous>, transform_indices = @transform_7, window_bounds = array<i64: 1, 32>}, {pipeline_mode = #tpu.pipeline_mode<synchronous>, transform_indices = @transform_8, window_bounds = array<i64: 32, 32>}, {pipeline_mode = #tpu.pipeline_mode<synchronous>, transform_indices = @transform_9, window_bounds = array<i64: 1, 32>}, {pipeline_mode = #tpu.pipeline_mode<synchronous>, transform_indices = @transform_10, window_bounds = array<i64: 32, 32>}, {pipeline_mode = #tpu.pipeline_mode<synchronous>, transform_indices = @transform_11, window_bounds = array<i64: 1, 32>}, {transform_indices = @transform_12, window_bounds = array<i64: 1, 8, 32>}, {transform_indices = @transform_13, window_bounds = array<i64: 1, 4, 8, 16>}]} {
    %c0_i32 = arith.constant 0 : i32
    %0 = arith.cmpi eq, %arg1, %c0_i32 : i32
    %1 = arith.extui %0 : i1 to i32
    %c0_i32_0 = arith.constant 0 : i32
    %2 = arith.cmpi ne, %1, %c0_i32_0 : i32
    scf.if %2 {
      %c0_73 = arith.constant 0 : index
      %c0_74 = arith.constant 0 : index
      %c0_75 = arith.constant 0 : index
      %120 = vector.load %arg3[%c0_73, %c0_74, %c0_75] : memref<1x16x32xbf16, #tpu.memory_space<vmem>>, vector<1x16x32xbf16>
      %121 = vector.shape_cast %120 : vector<1x16x32xbf16> to vector<16x32xbf16>
      %c0_76 = arith.constant 0 : index
      %c0_77 = arith.constant 0 : index
      %122 = vector.load %arg8[%c0_76, %c0_77] : memref<32x32xbf16, #tpu.memory_space<vmem>>, vector<32x32xbf16>
      %cst_78 = arith.constant dense<0.000000e+00> : vector<16x32xf32>
      %123 = tpu.matmul %121, %122, %cst_78 {dimension_numbers = #tpu.dot_dimension_numbers<[1], [0], [0], [1], [0, 0, 1, 1], [], []>} : vector<16x32xbf16>, vector<32x32xbf16>, vector<16x32xf32> -> vector<16x32xf32>
      %c0_79 = arith.constant 0 : index
      %c0_80 = arith.constant 0 : index
      %124 = vector.load %arg9[%c0_79, %c0_80] : memref<1x32xf32, #tpu.memory_space<vmem>>, vector<1x32xf32>
      %125 = vector.broadcast %124 : vector<1x32xf32> to vector<16x32xf32>
      %126 = arith.addf %123, %125 : vector<16x32xf32>
      %c0_81 = arith.constant 0 : index
      %c0_82 = arith.constant 0 : index
      %c0_83 = arith.constant 0 : index
      %127 = vector.load %arg4[%c0_81, %c0_82, %c0_83] : memref<1x16x32xbf16, #tpu.memory_space<vmem>>, vector<1x16x32xbf16>
      %128 = vector.shape_cast %127 : vector<1x16x32xbf16> to vector<16x32xbf16>
      %c0_84 = arith.constant 0 : index
      %c0_85 = arith.constant 0 : index
      %129 = vector.load %arg10[%c0_84, %c0_85] : memref<32x32xbf16, #tpu.memory_space<vmem>>, vector<32x32xbf16>
      %cst_86 = arith.constant dense<0.000000e+00> : vector<16x32xf32>
      %130 = tpu.matmul %128, %129, %cst_86 {dimension_numbers = #tpu.dot_dimension_numbers<[1], [0], [0], [1], [0, 0, 1, 1], [], []>} : vector<16x32xbf16>, vector<32x32xbf16>, vector<16x32xf32> -> vector<16x32xf32>
      %c0_87 = arith.constant 0 : index
      %c0_88 = arith.constant 0 : index
      %131 = vector.load %arg11[%c0_87, %c0_88] : memref<1x32xf32, #tpu.memory_space<vmem>>, vector<1x32xf32>
      %132 = vector.broadcast %131 : vector<1x32xf32> to vector<16x32xf32>
      %133 = arith.addf %130, %132 : vector<16x32xf32>
      %134 = arith.truncf %126 : vector<16x32xf32> to vector<16x32xbf16>
      %c0_89 = arith.constant 0 : index
      %c0_90 = arith.constant 0 : index
      %135 = vector.load %arg16[%c0_89, %c0_90] : memref<16x32xbf16, #tpu.memory_space<vmem>>, vector<16x32xbf16>
      tpu.vector_store %arg16[%c0_89, %c0_90], %134 {strides = array<i32>} : memref<16x32xbf16, #tpu.memory_space<vmem>>, vector<16x32xbf16>,
      %136 = arith.truncf %133 : vector<16x32xf32> to vector<16x32xbf16>
      %c0_91 = arith.constant 0 : index
      %c0_92 = arith.constant 0 : index
      %137 = vector.load %arg17[%c0_91, %c0_92] : memref<16x32xbf16, #tpu.memory_space<vmem>>, vector<16x32xbf16>
      tpu.vector_store %arg17[%c0_91, %c0_92], %136 {strides = array<i32>} : memref<16x32xbf16, #tpu.memory_space<vmem>>, vector<16x32xbf16>,
    } else {
    }
    %c0 = arith.constant 0 : index
    %c0_1 = arith.constant 0 : index
    %c0_2 = arith.constant 0 : index
    %3 = vector.load %arg2[%c0, %c0_1, %c0_2] : memref<1x8x32xbf16, #tpu.memory_space<vmem>>, vector<1x8x32xbf16>
    %4 = vector.shape_cast %3 : vector<1x8x32xbf16> to vector<8x32xbf16>
    %c0_3 = arith.constant 0 : index
    %c0_4 = arith.constant 0 : index
    %5 = vector.load %arg6[%c0_3, %c0_4] : memref<32x32xbf16, #tpu.memory_space<vmem>>, vector<32x32xbf16>
    %cst = arith.constant dense<0.000000e+00> : vector<8x32xf32>
    %6 = tpu.matmul %4, %5, %cst {dimension_numbers = #tpu.dot_dimension_numbers<[1], [0], [0], [1], [0, 0, 1, 1], [], []>} : vector<8x32xbf16>, vector<32x32xbf16>, vector<8x32xf32> -> vector<8x32xf32>
    %c0_5 = arith.constant 0 : index
    %c0_6 = arith.constant 0 : index
    %7 = vector.load %arg7[%c0_5, %c0_6] : memref<1x32xf32, #tpu.memory_space<vmem>>, vector<1x32xf32>
    %8 = vector.broadcast %7 : vector<1x32xf32> to vector<8x32xf32>
    %9 = arith.addf %6, %8 : vector<8x32xf32>
    %10 = arith.truncf %9 : vector<8x32xf32> to vector<8x32xbf16>
    %c0_7 = arith.constant 0 : index
    %c0_8 = arith.constant 0 : index
    %c0_9 = arith.constant 0 : index
    %11 = vector.load %arg5[%c0_7, %c0_8, %c0_9] : memref<1x1x16xf32, #tpu.memory_space<vmem>>, vector<1x1x16xf32>
    %12 = vector.shape_cast %11 : vector<1x1x16xf32> to vector<1x16xf32>
    %cst_10 = arith.constant 0.000000e+00 : f32
    %13 = vector.broadcast %cst_10 : f32 to vector<1x16xf32>
    %14 = arith.cmpf oeq, %12, %13 : vector<1x16xf32>
    %cst_11 = arith.constant 0xFF800000 : f32
    %cst_12 = arith.constant 0.000000e+00 : f32
    %15 = vector.broadcast %cst_11 : f32 to vector<1x16xf32>
    %16 = vector.broadcast %cst_12 : f32 to vector<1x16xf32>
    %17 = arith.select %14, %15, %16 : vector<1x16xi1>, vector<1x16xf32>
    %18 = vector.extract_strided_slice %10 {offsets = [0, 0], sizes = [8, 8], strides = [1, 1]} : vector<8x32xbf16> to vector<8x8xbf16>
    %c0_13 = arith.constant 0 : index
    %c0_14 = arith.constant 0 : index
    %19 = vector.load %arg16[%c0_13, %c0_14] : memref<16x32xbf16, #tpu.memory_space<vmem>>, vector<16x8xbf16>
    %c0_15 = arith.constant 0 : index
    %c0_16 = arith.constant 0 : index
    %20 = vector.load %arg17[%c0_15, %c0_16] : memref<16x32xbf16, #tpu.memory_space<vmem>>, vector<16x8xbf16>
    %cst_17 = arith.constant dense<0.000000e+00> : vector<8x16xf32>
    %21 = tpu.matmul %18, %19, %cst_17 {dimension_numbers = #tpu.dot_dimension_numbers<[1], [1], [0], [0], [0, 0, 1, 0], [], []>} : vector<8x8xbf16>, vector<16x8xbf16>, vector<8x16xf32> -> vector<8x16xf32>
    %22 = vector.broadcast %17 : vector<1x16xf32> to vector<8x16xf32>
    %23 = arith.addf %21, %22 : vector<8x16xf32>
    %cst_18 = arith.constant dense<0xFF800000> : vector<8xf32>
    %24 = vector.multi_reduction <maximumf>, %23, %cst_18 [1] : vector<8x16xf32> to vector<8xf32>
    %25 = vector.shape_cast %24 : vector<8xf32> to vector<8x1xf32>
    %26 = vector.broadcast %25 : vector<8x1xf32> to vector<8x16xf32>
    %27 = arith.subf %23, %26 : vector<8x16xf32>
    %28 = math.exp %27 : vector<8x16xf32>
    %cst_19 = arith.constant dense<0.000000e+00> : vector<8xf32>
    %29 = vector.multi_reduction <add>, %28, %cst_19 [1] : vector<8x16xf32> to vector<8xf32>
    %30 = vector.shape_cast %29 : vector<8xf32> to vector<8x1xf32>
    %31 = tpu.reciprocal %30 : vector<8x1xf32> -> vector<8x1xf32>
    %32 = vector.broadcast %31 : vector<8x1xf32> to vector<8x16xf32>
    %33 = arith.mulf %28, %32 : vector<8x16xf32>
    %34 = arith.truncf %33 : vector<8x16xf32> to vector<8x16xbf16>
    %c0_20 = arith.constant 0 : index
    %c0_21 = arith.constant 0 : index
    %c0_22 = arith.constant 0 : index
    %c0_23 = arith.constant 0 : index
    %35 = vector.load %arg15[%c0_20, %c0_21, %c0_22, %c0_23] : memref<1x4x8x16xbf16, #tpu.memory_space<vmem>>, vector<1x1x8x16xbf16>
    %36 = vector.shape_cast %35 : vector<1x1x8x16xbf16> to vector<8x16xbf16>
    %37 = vector.shape_cast %34 : vector<8x16xbf16> to vector<1x1x8x16xbf16>
    tpu.vector_store %arg15[%c0_20, %c0_21, %c0_22, %c0_23], %37 {strides = array<i32>} : memref<1x4x8x16xbf16, #tpu.memory_space<vmem>>, vector<1x1x8x16xbf16>,
    %38 = arith.truncf %33 : vector<8x16xf32> to vector<8x16xbf16>
    %cst_24 = arith.constant dense<0.000000e+00> : vector<8x8xf32>
    %39 = tpu.matmul %38, %20, %cst_24 {dimension_numbers = #tpu.dot_dimension_numbers<[1], [0], [0], [1], [0, 0, 1, 1], [], []>} : vector<8x16xbf16>, vector<16x8xbf16>, vector<8x8xf32> -> vector<8x8xf32>
    %c0_25 = arith.constant 0 : index
    %c0_26 = arith.constant 0 : index
    %40 = vector.load %arg18[%c0_25, %c0_26] : memref<8x32xf32, #tpu.memory_space<vmem>>, vector<8x8xf32>
    tpu.vector_store %arg18[%c0_25, %c0_26], %39 {strides = array<i32>} : memref<8x32xf32, #tpu.memory_space<vmem>>, vector<8x8xf32>,
    %41 = vector.extract_strided_slice %10 {offsets = [0, 8], sizes = [8, 8], strides = [1, 1]} : vector<8x32xbf16> to vector<8x8xbf16>
    %c0_27 = arith.constant 0 : index
    %c8 = arith.constant 8 : index
    %42 = vector.load %arg16[%c0_27, %c8] : memref<16x32xbf16, #tpu.memory_space<vmem>>, vector<16x8xbf16>
    %c0_28 = arith.constant 0 : index
    %c8_29 = arith.constant 8 : index
    %43 = vector.load %arg17[%c0_28, %c8_29] : memref<16x32xbf16, #tpu.memory_space<vmem>>, vector<16x8xbf16>
    %cst_30 = arith.constant dense<0.000000e+00> : vector<8x16xf32>
    %44 = tpu.matmul %41, %42, %cst_30 {dimension_numbers = #tpu.dot_dimension_numbers<[1], [1], [0], [0], [0, 0, 1, 0], [], []>} : vector<8x8xbf16>, vector<16x8xbf16>, vector<8x16xf32> -> vector<8x16xf32>
    %45 = vector.broadcast %17 : vector<1x16xf32> to vector<8x16xf32>
    %46 = arith.addf %44, %45 : vector<8x16xf32>
    %cst_31 = arith.constant dense<0xFF800000> : vector<8xf32>
    %47 = vector.multi_reduction <maximumf>, %46, %cst_31 [1] : vector<8x16xf32> to vector<8xf32>
    %48 = vector.shape_cast %47 : vector<8xf32> to vector<8x1xf32>
    %49 = vector.broadcast %48 : vector<8x1xf32> to vector<8x16xf32>
    %50 = arith.subf %46, %49 : vector<8x16xf32>
    %51 = math.exp %50 : vector<8x16xf32>
    %cst_32 = arith.constant dense<0.000000e+00> : vector<8xf32>
    %52 = vector.multi_reduction <add>, %51, %cst_32 [1] : vector<8x16xf32> to vector<8xf32>
    %53 = vector.shape_cast %52 : vector<8xf32> to vector<8x1xf32>
    %54 = tpu.reciprocal %53 : vector<8x1xf32> -> vector<8x1xf32>
    %55 = vector.broadcast %54 : vector<8x1xf32> to vector<8x16xf32>
    %56 = arith.mulf %51, %55 : vector<8x16xf32>
    %57 = arith.truncf %56 : vector<8x16xf32> to vector<8x16xbf16>
    %c0_33 = arith.constant 0 : index
    %c1 = arith.constant 1 : index
    %c0_34 = arith.constant 0 : index
    %c0_35 = arith.constant 0 : index
    %58 = vector.load %arg15[%c0_33, %c1, %c0_34, %c0_35] : memref<1x4x8x16xbf16, #tpu.memory_space<vmem>>, vector<1x1x8x16xbf16>
    %59 = vector.shape_cast %58 : vector<1x1x8x16xbf16> to vector<8x16xbf16>
    %60 = vector.shape_cast %57 : vector<8x16xbf16> to vector<1x1x8x16xbf16>
    tpu.vector_store %arg15[%c0_33, %c1, %c0_34, %c0_35], %60 {strides = array<i32>} : memref<1x4x8x16xbf16, #tpu.memory_space<vmem>>, vector<1x1x8x16xbf16>,
    %61 = arith.truncf %56 : vector<8x16xf32> to vector<8x16xbf16>
    %cst_36 = arith.constant dense<0.000000e+00> : vector<8x8xf32>
    %62 = tpu.matmul %61, %43, %cst_36 {dimension_numbers = #tpu.dot_dimension_numbers<[1], [0], [0], [1], [0, 0, 1, 1], [], []>} : vector<8x16xbf16>, vector<16x8xbf16>, vector<8x8xf32> -> vector<8x8xf32>
    %c0_37 = arith.constant 0 : index
    %c8_38 = arith.constant 8 : index
    %63 = vector.load %arg18[%c0_37, %c8_38] : memref<8x32xf32, #tpu.memory_space<vmem>>, vector<8x8xf32>
    tpu.vector_store %arg18[%c0_37, %c8_38], %62 {strides = array<i32>} : memref<8x32xf32, #tpu.memory_space<vmem>>, vector<8x8xf32>,
    %64 = vector.extract_strided_slice %10 {offsets = [0, 16], sizes = [8, 8], strides = [1, 1]} : vector<8x32xbf16> to vector<8x8xbf16>
    %c0_39 = arith.constant 0 : index
    %c16 = arith.constant 16 : index
    %65 = vector.load %arg16[%c0_39, %c16] : memref<16x32xbf16, #tpu.memory_space<vmem>>, vector<16x8xbf16>
    %c0_40 = arith.constant 0 : index
    %c16_41 = arith.constant 16 : index
    %66 = vector.load %arg17[%c0_40, %c16_41] : memref<16x32xbf16, #tpu.memory_space<vmem>>, vector<16x8xbf16>
    %cst_42 = arith.constant dense<0.000000e+00> : vector<8x16xf32>
    %67 = tpu.matmul %64, %65, %cst_42 {dimension_numbers = #tpu.dot_dimension_numbers<[1], [1], [0], [0], [0, 0, 1, 0], [], []>} : vector<8x8xbf16>, vector<16x8xbf16>, vector<8x16xf32> -> vector<8x16xf32>
    %68 = vector.broadcast %17 : vector<1x16xf32> to vector<8x16xf32>
    %69 = arith.addf %67, %68 : vector<8x16xf32>
    %cst_43 = arith.constant dense<0xFF800000> : vector<8xf32>
    %70 = vector.multi_reduction <maximumf>, %69, %cst_43 [1] : vector<8x16xf32> to vector<8xf32>
    %71 = vector.shape_cast %70 : vector<8xf32> to vector<8x1xf32>
    %72 = vector.broadcast %71 : vector<8x1xf32> to vector<8x16xf32>
    %73 = arith.subf %69, %72 : vector<8x16xf32>
    %74 = math.exp %73 : vector<8x16xf32>
    %cst_44 = arith.constant dense<0.000000e+00> : vector<8xf32>
    %75 = vector.multi_reduction <add>, %74, %cst_44 [1] : vector<8x16xf32> to vector<8xf32>
    %76 = vector.shape_cast %75 : vector<8xf32> to vector<8x1xf32>
    %77 = tpu.reciprocal %76 : vector<8x1xf32> -> vector<8x1xf32>
    %78 = vector.broadcast %77 : vector<8x1xf32> to vector<8x16xf32>
    %79 = arith.mulf %74, %78 : vector<8x16xf32>
    %80 = arith.truncf %79 : vector<8x16xf32> to vector<8x16xbf16>
    %c0_45 = arith.constant 0 : index
    %c2 = arith.constant 2 : index
    %c0_46 = arith.constant 0 : index
    %c0_47 = arith.constant 0 : index
    %81 = vector.load %arg15[%c0_45, %c2, %c0_46, %c0_47] : memref<1x4x8x16xbf16, #tpu.memory_space<vmem>>, vector<1x1x8x16xbf16>
    %82 = vector.shape_cast %81 : vector<1x1x8x16xbf16> to vector<8x16xbf16>
    %83 = vector.shape_cast %80 : vector<8x16xbf16> to vector<1x1x8x16xbf16>
    tpu.vector_store %arg15[%c0_45, %c2, %c0_46, %c0_47], %83 {strides = array<i32>} : memref<1x4x8x16xbf16, #tpu.memory_space<vmem>>, vector<1x1x8x16xbf16>,
    %84 = arith.truncf %79 : vector<8x16xf32> to vector<8x16xbf16>
    %cst_48 = arith.constant dense<0.000000e+00> : vector<8x8xf32>
    %85 = tpu.matmul %84, %66, %cst_48 {dimension_numbers = #tpu.dot_dimension_numbers<[1], [0], [0], [1], [0, 0, 1, 1], [], []>} : vector<8x16xbf16>, vector<16x8xbf16>, vector<8x8xf32> -> vector<8x8xf32>
    %c0_49 = arith.constant 0 : index
    %c16_50 = arith.constant 16 : index
    %86 = vector.load %arg18[%c0_49, %c16_50] : memref<8x32xf32, #tpu.memory_space<vmem>>, vector<8x8xf32>
    tpu.vector_store %arg18[%c0_49, %c16_50], %85 {strides = array<i32>} : memref<8x32xf32, #tpu.memory_space<vmem>>, vector<8x8xf32>,
    %87 = vector.extract_strided_slice %10 {offsets = [0, 24], sizes = [8, 8], strides = [1, 1]} : vector<8x32xbf16> to vector<8x8xbf16>
    %c0_51 = arith.constant 0 : index
    %c24 = arith.constant 24 : index
    %88 = vector.load %arg16[%c0_51, %c24] : memref<16x32xbf16, #tpu.memory_space<vmem>>, vector<16x8xbf16>
    %c0_52 = arith.constant 0 : index
    %c24_53 = arith.constant 24 : index
    %89 = vector.load %arg17[%c0_52, %c24_53] : memref<16x32xbf16, #tpu.memory_space<vmem>>, vector<16x8xbf16>
    %cst_54 = arith.constant dense<0.000000e+00> : vector<8x16xf32>
    %90 = tpu.matmul %87, %88, %cst_54 {dimension_numbers = #tpu.dot_dimension_numbers<[1], [1], [0], [0], [0, 0, 1, 0], [], []>} : vector<8x8xbf16>, vector<16x8xbf16>, vector<8x16xf32> -> vector<8x16xf32>
    %91 = vector.broadcast %17 : vector<1x16xf32> to vector<8x16xf32>
    %92 = arith.addf %90, %91 : vector<8x16xf32>
    %cst_55 = arith.constant dense<0xFF800000> : vector<8xf32>
    %93 = vector.multi_reduction <maximumf>, %92, %cst_55 [1] : vector<8x16xf32> to vector<8xf32>
    %94 = vector.shape_cast %93 : vector<8xf32> to vector<8x1xf32>
    %95 = vector.broadcast %94 : vector<8x1xf32> to vector<8x16xf32>
    %96 = arith.subf %92, %95 : vector<8x16xf32>
    %97 = math.exp %96 : vector<8x16xf32>
    %cst_56 = arith.constant dense<0.000000e+00> : vector<8xf32>
    %98 = vector.multi_reduction <add>, %97, %cst_56 [1] : vector<8x16xf32> to vector<8xf32>
    %99 = vector.shape_cast %98 : vector<8xf32> to vector<8x1xf32>
    %100 = tpu.reciprocal %99 : vector<8x1xf32> -> vector<8x1xf32>
    %101 = vector.broadcast %100 : vector<8x1xf32> to vector<8x16xf32>
    %102 = arith.mulf %97, %101 : vector<8x16xf32>
    %103 = arith.truncf %102 : vector<8x16xf32> to vector<8x16xbf16>
    %c0_57 = arith.constant 0 : index
    %c3 = arith.constant 3 : index
    %c0_58 = arith.constant 0 : index
    %c0_59 = arith.constant 0 : index
    %104 = vector.load %arg15[%c0_57, %c3, %c0_58, %c0_59] : memref<1x4x8x16xbf16, #tpu.memory_space<vmem>>, vector<1x1x8x16xbf16>
    %105 = vector.shape_cast %104 : vector<1x1x8x16xbf16> to vector<8x16xbf16>
    %106 = vector.shape_cast %103 : vector<8x16xbf16> to vector<1x1x8x16xbf16>
    tpu.vector_store %arg15[%c0_57, %c3, %c0_58, %c0_59], %106 {strides = array<i32>} : memref<1x4x8x16xbf16, #tpu.memory_space<vmem>>, vector<1x1x8x16xbf16>,
    %107 = arith.truncf %102 : vector<8x16xf32> to vector<8x16xbf16>
    %cst_60 = arith.constant dense<0.000000e+00> : vector<8x8xf32>
    %108 = tpu.matmul %107, %89, %cst_60 {dimension_numbers = #tpu.dot_dimension_numbers<[1], [0], [0], [1], [0, 0, 1, 1], [], []>} : vector<8x16xbf16>, vector<16x8xbf16>, vector<8x8xf32> -> vector<8x8xf32>
    %c0_61 = arith.constant 0 : index
    %c24_62 = arith.constant 24 : index
    %109 = vector.load %arg18[%c0_61, %c24_62] : memref<8x32xf32, #tpu.memory_space<vmem>>, vector<8x8xf32>
    tpu.vector_store %arg18[%c0_61, %c24_62], %108 {strides = array<i32>} : memref<8x32xf32, #tpu.memory_space<vmem>>, vector<8x8xf32>,
    %c0_63 = arith.constant 0 : index
    %c0_64 = arith.constant 0 : index
    %110 = vector.load %arg18[%c0_63, %c0_64] : memref<8x32xf32, #tpu.memory_space<vmem>>, vector<8x32xf32>
    %111 = arith.truncf %110 : vector<8x32xf32> to vector<8x32xbf16>
    %c0_65 = arith.constant 0 : index
    %c0_66 = arith.constant 0 : index
    %112 = vector.load %arg12[%c0_65, %c0_66] : memref<32x32xbf16, #tpu.memory_space<vmem>>, vector<32x32xbf16>
    %cst_67 = arith.constant dense<0.000000e+00> : vector<8x32xf32>
    %113 = tpu.matmul %111, %112, %cst_67 {dimension_numbers = #tpu.dot_dimension_numbers<[1], [0], [0], [1], [0, 0, 1, 1], [], []>} : vector<8x32xbf16>, vector<32x32xbf16>, vector<8x32xf32> -> vector<8x32xf32>
    %c0_68 = arith.constant 0 : index
    %c0_69 = arith.constant 0 : index
    %114 = vector.load %arg13[%c0_68, %c0_69] : memref<1x32xf32, #tpu.memory_space<vmem>>, vector<1x32xf32>
    %115 = vector.broadcast %114 : vector<1x32xf32> to vector<8x32xf32>
    %116 = arith.addf %113, %115 : vector<8x32xf32>
    %c0_70 = arith.constant 0 : index
    %c0_71 = arith.constant 0 : index
    %c0_72 = arith.constant 0 : index
    %117 = vector.load %arg14[%c0_70, %c0_71, %c0_72] : memref<1x8x32xf32, #tpu.memory_space<vmem>>, vector<1x8x32xf32>
    %118 = vector.shape_cast %117 : vector<1x8x32xf32> to vector<8x32xf32>
    %119 = vector.shape_cast %116 : vector<8x32xf32> to vector<1x8x32xf32>
    tpu.vector_store %arg14[%c0_70, %c0_71, %c0_72], %119 {strides = array<i32>} : memref<1x8x32xf32, #tpu.memory_space<vmem>>, vector<1x8x32xf32>,
    return
  }
  func.func @transform_0(%arg0: i32, %arg1: i32) -> (i32, i32, i32) {
    %c0_i32 = arith.constant 0 : i32
    %c0_i32_0 = arith.constant 0 : i32
    return %arg0, %arg1, %c0_i32 : i32, i32, i32
  }
  func.func @transform_1(%arg0: i32, %arg1: i32) -> (i32, i32, i32) {
    %c0_i32 = arith.constant 0 : i32
    %c0_i32_0 = arith.constant 0 : i32
    %c0_i32_1 = arith.constant 0 : i32
    return %arg0, %c0_i32, %c0_i32_0 : i32, i32, i32
  }
  func.func @transform_2(%arg0: i32, %arg1: i32) -> (i32, i32, i32) {
    %c0_i32 = arith.constant 0 : i32
    %c0_i32_0 = arith.constant 0 : i32
    %c0_i32_1 = arith.constant 0 : i32
    return %arg0, %c0_i32, %c0_i32_0 : i32, i32, i32
  }
  func.func @transform_3(%arg0: i32, %arg1: i32) -> (i32, i32, i32) {
    %c0_i32 = arith.constant 0 : i32
    %c0_i32_0 = arith.constant 0 : i32
    %c0_i32_1 = arith.constant 0 : i32
    return %arg0, %c0_i32, %c0_i32_0 : i32, i32, i32
  }
  func.func @transform_4(%arg0: i32, %arg1: i32) -> (i32, i32) {
    %c0_i32 = arith.constant 0 : i32
    %c0_i32_0 = arith.constant 0 : i32
    %c0_i32_1 = arith.constant 0 : i32
    return %c0_i32, %c0_i32_0 : i32, i32
  }
  func.func @transform_5(%arg0: i32, %arg1: i32) -> (i32, i32) {
    %c0_i32 = arith.constant 0 : i32
    %c0_i32_0 = arith.constant 0 : i32
    %c0_i32_1 = arith.constant 0 : i32
    return %c0_i32, %c0_i32_0 : i32, i32
  }
  func.func @transform_6(%arg0: i32, %arg1: i32) -> (i32, i32) {
    %c0_i32 = arith.constant 0 : i32
    %c0_i32_0 = arith.constant 0 : i32
    %c0_i32_1 = arith.constant 0 : i32
    return %c0_i32, %c0_i32_0 : i32, i32
  }
  func.func @transform_7(%arg0: i32, %arg1: i32) -> (i32, i32) {
    %c0_i32 = arith.constant 0 : i32
    %c0_i32_0 = arith.constant 0 : i32
    %c0_i32_1 = arith.constant 0 : i32
    return %c0_i32, %c0_i32_0 : i32, i32
  }
  func.func @transform_8(%arg0: i32, %arg1: i32) -> (i32, i32) {
    %c0_i32 = arith.constant 0 : i32
    %c0_i32_0 = arith.constant 0 : i32
    %c0_i32_1 = arith.constant 0 : i32
    return %c0_i32, %c0_i32_0 : i32, i32
  }
  func.func @transform_9(%arg0: i32, %arg1: i32) -> (i32, i32) {
    %c0_i32 = arith.constant 0 : i32
    %c0_i32_0 = arith.constant 0 : i32
    %c0_i32_1 = arith.constant 0 : i32
    return %c0_i32, %c0_i32_0 : i32, i32
  }
  func.func @transform_10(%arg0: i32, %arg1: i32) -> (i32, i32) {
    %c0_i32 = arith.constant 0 : i32
    %c0_i32_0 = arith.constant 0 : i32
    %c0_i32_1 = arith.constant 0 : i32
    return %c0_i32, %c0_i32_0 : i32, i32
  }
  func.func @transform_11(%arg0: i32, %arg1: i32) -> (i32, i32) {
    %c0_i32 = arith.constant 0 : i32
    %c0_i32_0 = arith.constant 0 : i32
    %c0_i32_1 = arith.constant 0 : i32
    return %c0_i32, %c0_i32_0 : i32, i32
  }
  func.func @transform_12(%arg0: i32, %arg1: i32) -> (i32, i32, i32) {
    %c0_i32 = arith.constant 0 : i32
    %c0_i32_0 = arith.constant 0 : i32
    return %arg0, %arg1, %c0_i32 : i32, i32, i32
  }
  func.func @transform_13(%arg0: i32, %arg1: i32) -> (i32, i32, i32, i32) {
    %c0_i32 = arith.constant 0 : i32
    %c0_i32_0 = arith.constant 0 : i32
    %c0_i32_1 = arith.constant 0 : i32
    return %arg0, %c0_i32, %arg1, %c0_i32_0 : i32, i32, i32, i32
  }
}

module attributes {stable_mosaic.version = 11 : i64} {
  func.func @kernel(%arg0: i32, %arg1: i32, %arg2: memref<1x8x32xbf16, #tpu.memory_space<vmem>>, %arg3: memref<1x16x32xbf16, #tpu.memory_space<vmem>>, %arg4: memref<1x16x32xbf16, #tpu.memory_space<vmem>>, %arg5: memref<1x1x16xf32, #tpu.memory_space<vmem>>, %arg6: memref<32x32xbf16, #tpu.memory_space<vmem>>, %arg7: memref<1x32xf32, #tpu.memory_space<vmem>>, %arg8: memref<32x32xbf16, #tpu.memory_space<vmem>>, %arg9: memref<1x32xf32, #tpu.memory_space<vmem>>, %arg10: memref<32x32xbf16, #tpu.memory_space<vmem>>, %arg11: memref<1x32xf32, #tpu.memory_space<vmem>>, %arg12: memref<32x32xbf16, #tpu.memory_space<vmem>>, %arg13: memref<1x32xf32, #tpu.memory_space<vmem>>, %arg14: memref<1x8x32xf32, #tpu.memory_space<vmem>>, %arg15: memref<1x4x8x16xbf16, #tpu.memory_space<vmem>>, %arg16: memref<16x32xbf16, #tpu.memory_space<vmem>>, %arg17: memref<16x32xbf16, #tpu.memory_space<vmem>>, %arg18: memref<8x32xf32, #tpu.memory_space<vmem>>) attributes {dimension_semantics = [#tpu.dimension_semantics<parallel>, #tpu.dimension_semantics<arbitrary>], iteration_bounds = array<i64: 2, 2>, scalar_prefetch = 0 : i64, scratch_operands = 3 : i64, tpu.core_type = #tpu.core_type<tc>, window_params = [{transform_indices = @transform_0, window_bounds = array<i64: 1, 8, 32>}, {transform_indices = @transform_1, window_bounds = array<i64: 1, 16, 32>}, {transform_indices = @transform_2, window_bounds = array<i64: 1, 16, 32>}, {transform_indices = @transform_3, window_bounds = array<i64: 1, 1, 16>}, {pipeline_mode = #tpu.pipeline_mode<synchronous>, transform_indices = @transform_4, window_bounds = array<i64: 32, 32>}, {pipeline_mode = #tpu.pipeline_mode<synchronous>, transform_indices = @transform_5, window_bounds = array<i64: 1, 32>}, {pipeline_mode = #tpu.pipeline_mode<synchronous>, transform_indices = @transform_6, window_bounds = array<i64: 32, 32>}, {pipeline_mode = #tpu.pipeline_mode<synchronous>, transform_indices = @transform_7, window_bounds = array<i64: 1, 32>}, {pipeline_mode = #tpu.pipeline_mode<synchronous>, transform_indices = @transform_8, window_bounds = array<i64: 32, 32>}, {pipeline_mode = #tpu.pipeline_mode<synchronous>, transform_indices = @transform_9, window_bounds = array<i64: 1, 32>}, {pipeline_mode = #tpu.pipeline_mode<synchronous>, transform_indices = @transform_10, window_bounds = array<i64: 32, 32>}, {pipeline_mode = #tpu.pipeline_mode<synchronous>, transform_indices = @transform_11, window_bounds = array<i64: 1, 32>}, {transform_indices = @transform_12, window_bounds = array<i64: 1, 8, 32>}, {transform_indices = @transform_13, window_bounds = array<i64: 1, 4, 8, 16>}]} {
    %c0_i32 = arith.constant 0 : i32
    %0 = arith.cmpi eq, %arg1, %c0_i32 : i32
    %1 = arith.extui %0 : i1 to i32
    %c0_i32_0 = arith.constant 0 : i32
    %2 = arith.cmpi ne, %1, %c0_i32_0 : i32
    scf.if %2 {
      %c0_73 = arith.constant 0 : index
      %c0_74 = arith.constant 0 : index
      %c0_75 = arith.constant 0 : index
      %120 = vector.load %arg3[%c0_73, %c0_74, %c0_75] : memref<1x16x32xbf16, #tpu.memory_space<vmem>>, vector<1x16x32xbf16>
      %121 = vector.shape_cast %120 : vector<1x16x32xbf16> to vector<16x32xbf16>
      %c0_76 = arith.constant 0 : index
      %c0_77 = arith.constant 0 : index
      %122 = vector.load %arg8[%c0_76, %c0_77] : memref<32x32xbf16, #tpu.memory_space<vmem>>, vector<32x32xbf16>
      %cst_78 = arith.constant dense<0.000000e+00> : vector<16x32xf32>
      %123 = tpu.matmul %121, %122, %cst_78 {dimension_numbers = #tpu.dot_dimension_numbers<[1], [0], [0], [1], [0, 0, 1, 1], [], []>} : vector<16x32xbf16>, vector<32x32xbf16>, vector<16x32xf32> -> vector<16x32xf32>
      %c0_79 = arith.constant 0 : index
      %c0_80 = arith.constant 0 : index
      %124 = vector.load %arg9[%c0_79, %c0_80] : memref<1x32xf32, #tpu.memory_space<vmem>>, vector<1x32xf32>
      %125 = vector.broadcast %124 : vector<1x32xf32> to vector<16x32xf32>
      %126 = arith.addf %123, %125 : vector<16x32xf32>
      %c0_81 = arith.constant 0 : index
      %c0_82 = arith.constant 0 : index
      %c0_83 = arith.constant 0 : index
      %127 = vector.load %arg4[%c0_81, %c0_82, %c0_83] : memref<1x16x32xbf16, #tpu.memory_space<vmem>>, vector<1x16x32xbf16>
      %128 = vector.shape_cast %127 : vector<1x16x32xbf16> to vector<16x32xbf16>
      %c0_84 = arith.constant 0 : index
      %c0_85 = arith.constant 0 : index
      %129 = vector.load %arg10[%c0_84, %c0_85] : memref<32x32xbf16, #tpu.memory_space<vmem>>, vector<32x32xbf16>
      %cst_86 = arith.constant dense<0.000000e+00> : vector<16x32xf32>
      %130 = tpu.matmul %128, %129, %cst_86 {dimension_numbers = #tpu.dot_dimension_numbers<[1], [0], [0], [1], [0, 0, 1, 1], [], []>} : vector<16x32xbf16>, vector<32x32xbf16>, vector<16x32xf32> -> vector<16x32xf32>
      %c0_87 = arith.constant 0 : index
      %c0_88 = arith.constant 0 : index
      %131 = vector.load %arg11[%c0_87, %c0_88] : memref<1x32xf32, #tpu.memory_space<vmem>>, vector<1x32xf32>
      %132 = vector.broadcast %131 : vector<1x32xf32> to vector<16x32xf32>
      %133 = arith.addf %130, %132 : vector<16x32xf32>
      %134 = arith.truncf %126 : vector<16x32xf32> to vector<16x32xbf16>
      %c0_89 = arith.constant 0 : index
      %c0_90 = arith.constant 0 : index
      %135 = vector.load %arg16[%c0_89, %c0_90] : memref<16x32xbf16, #tpu.memory_space<vmem>>, vector<16x32xbf16>
      tpu.vector_store %arg16[%c0_89, %c0_90], %134 {strides = array<i32>} : memref<16x32xbf16, #tpu.memory_space<vmem>>, vector<16x32xbf16>,
      %136 = arith.truncf %133 : vector<16x32xf32> to vector<16x32xbf16>
      %c0_91 = arith.constant 0 : index
      %c0_92 = arith.constant 0 : index
      %137 = vector.load %arg17[%c0_91, %c0_92] : memref<16x32xbf16, #tpu.memory_space<vmem>>, vector<16x32xbf16>
      tpu.vector_store %arg17[%c0_91, %c0_92], %136 {strides = array<i32>} : memref<16x32xbf16, #tpu.memory_space<vmem>>, vector<16x32xbf16>,
    } else {
    }
    %c0 = arith.constant 0 : index
    %c0_1 = arith.constant 0 : index
    %c0_2 = arith.constant 0 : index
    %3 = vector.load %arg2[%c0, %c0_1, %c0_2] : memref<1x8x32xbf16, #tpu.memory_space<vmem>>, vector<1x8x32xbf16>
    %4 = vector.shape_cast %3 : vector<1x8x32xbf16> to vector<8x32xbf16>
    %c0_3 = arith.constant 0 : index
    %c0_4 = arith.constant 0 : index
    %5 = vector.load %arg6[%c0_3, %c0_4] : memref<32x32xbf16, #tpu.memory_space<vmem>>, vector<32x32xbf16>
    %cst = arith.constant dense<0.000000e+00> : vector<8x32xf32>
    %6 = tpu.matmul %4, %5, %cst {dimension_numbers = #tpu.dot_dimension_numbers<[1], [0], [0], [1], [0, 0, 1, 1], [], []>} : vector<8x32xbf16>, vector<32x32xbf16>, vector<8x32xf32> -> vector<8x32xf32>
    %c0_5 = arith.constant 0 : index
    %c0_6 = arith.constant 0 : index
    %7 = vector.load %arg7[%c0_5, %c0_6] : memref<1x32xf32, #tpu.memory_space<vmem>>, vector<1x32xf32>
    %8 = vector.broadcast %7 : vector<1x32xf32> to vector<8x32xf32>
    %9 = arith.addf %6, %8 : vector<8x32xf32>
    %10 = arith.truncf %9 : vector<8x32xf32> to vector<8x32xbf16>
    %c0_7 = arith.constant 0 : index
    %c0_8 = arith.constant 0 : index
    %c0_9 = arith.constant 0 : index
    %11 = vector.load %arg5[%c0_7, %c0_8, %c0_9] : memref<1x1x16xf32, #tpu.memory_space<vmem>>, vector<1x1x16xf32>
    %12 = vector.shape_cast %11 : vector<1x1x16xf32> to vector<1x16xf32>
    %cst_10 = arith.constant 0.000000e+00 : f32
    %13 = vector.broadcast %cst_10 : f32 to vector<1x16xf32>
    %14 = arith.cmpf oeq, %12, %13 : vector<1x16xf32>
    %cst_11 = arith.constant 0xFF800000 : f32
    %cst_12 = arith.constant 0.000000e+00 : f32
    %15 = vector.broadcast %cst_11 : f32 to vector<1x16xf32>
    %16 = vector.broadcast %cst_12 : f32 to vector<1x16xf32>
    %17 = arith.select %14, %15, %16 : vector<1x16xi1>, vector<1x16xf32>
    %18 = vector.extract_strided_slice %10 {offsets = [0, 0], sizes = [8, 8], strides = [1, 1]} : vector<8x32xbf16> to vector<8x8xbf16>
    %c0_13 = arith.constant 0 : index
    %c0_14 = arith.constant 0 : index
    %19 = vector.load %arg16[%c0_13, %c0_14] : memref<16x32xbf16, #tpu.memory_space<vmem>>, vector<16x8xbf16>
    %c0_15 = arith.constant 0 : index
    %c0_16 = arith.constant 0 : index
    %20 = vector.load %arg17[%c0_15, %c0_16] : memref<16x32xbf16, #tpu.memory_space<vmem>>, vector<16x8xbf16>
    %cst_17 = arith.constant dense<0.000000e+00> : vector<8x16xf32>
    %21 = tpu.matmul %18, %19, %cst_17 {dimension_numbers = #tpu.dot_dimension_numbers<[1], [1], [0], [0], [0, 0, 1, 0], [], []>} : vector<8x8xbf16>, vector<16x8xbf16>, vector<8x16xf32> -> vector<8x16xf32>
    %22 = vector.broadcast %17 : vector<1x16xf32> to vector<8x16xf32>
    %23 = arith.addf %21, %22 : vector<8x16xf32>
    %cst_18 = arith.constant dense<0xFF800000> : vector<8xf32>
    %24 = vector.multi_reduction <maximumf>, %23, %cst_18 [1] : vector<8x16xf32> to vector<8xf32>
    %25 = vector.shape_cast %24 : vector<8xf32> to vector<8x1xf32>
    %26 = vector.broadcast %25 : vector<8x1xf32> to vector<8x16xf32>
    %27 = arith.subf %23, %26 : vector<8x16xf32>
    %28 = math.exp %27 : vector<8x16xf32>
    %cst_19 = arith.constant dense<0.000000e+00> : vector<8xf32>
    %29 = vector.multi_reduction <add>, %28, %cst_19 [1] : vector<8x16xf32> to vector<8xf32>
    %30 = vector.shape_cast %29 : vector<8xf32> to vector<8x1xf32>
    %31 = tpu.reciprocal %30 : vector<8x1xf32> -> vector<8x1xf32>
    %32 = vector.broadcast %31 : vector<8x1xf32> to vector<8x16xf32>
    %33 = arith.mulf %28, %32 : vector<8x16xf32>
    %34 = arith.truncf %33 : vector<8x16xf32> to vector<8x16xbf16>
    %c0_20 = arith.constant 0 : index
    %c0_21 = arith.constant 0 : index
    %c0_22 = arith.constant 0 : index
    %c0_23 = arith.constant 0 : index
    %35 = vector.load %arg15[%c0_20, %c0_21, %c0_22, %c0_23] : memref<1x4x8x16xbf16, #tpu.memory_space<vmem>>, vector<1x1x8x16xbf16>
    %36 = vector.shape_cast %35 : vector<1x1x8x16xbf16> to vector<8x16xbf16>
    %37 = vector.shape_cast %34 : vector<8x16xbf16> to vector<1x1x8x16xbf16>
    tpu.vector_store %arg15[%c0_20, %c0_21, %c0_22, %c0_23], %37 {strides = array<i32>} : memref<1x4x8x16xbf16, #tpu.memory_space<vmem>>, vector<1x1x8x16xbf16>,
    %38 = arith.truncf %33 : vector<8x16xf32> to vector<8x16xbf16>
    %cst_24 = arith.constant dense<0.000000e+00> : vector<8x8xf32>
    %39 = tpu.matmul %38, %20, %cst_24 {dimension_numbers = #tpu.dot_dimension_numbers<[1], [0], [0], [1], [0, 0, 1, 1], [], []>} : vector<8x16xbf16>, vector<16x8xbf16>, vector<8x8xf32> -> vector<8x8xf32>
    %c0_25 = arith.constant 0 : index
    %c0_26 = arith.constant 0 : index
    %40 = vector.load %arg18[%c0_25, %c0_26] : memref<8x32xf32, #tpu.memory_space<vmem>>, vector<8x8xf32>
    tpu.vector_store %arg18[%c0_25, %c0_26], %39 {strides = array<i32>} : memref<8x32xf32, #tpu.memory_space<vmem>>, vector<8x8xf32>,
    %41 = vector.extract_strided_slice %10 {offsets = [0, 8], sizes = [8, 8], strides = [1, 1]} : vector<8x32xbf16> to vector<8x8xbf16>
    %c0_27 = arith.constant 0 : index
    %c8 = arith.constant 8 : index
    %42 = vector.load %arg16[%c0_27, %c8] : memref<16x32xbf16, #tpu.memory_space<vmem>>, vector<16x8xbf16>
    %c0_28 = arith.constant 0 : index
    %c8_29 = arith.constant 8 : index
    %43 = vector.load %arg17[%c0_28, %c8_29] : memref<16x32xbf16, #tpu.memory_space<vmem>>, vector<16x8xbf16>
    %cst_30 = arith.constant dense<0.000000e+00> : vector<8x16xf32>
    %44 = tpu.matmul %41, %42, %cst_30 {dimension_numbers = #tpu.dot_dimension_numbers<[1], [1], [0], [0], [0, 0, 1, 0], [], []>} : vector<8x8xbf16>, vector<16x8xbf16>, vector<8x16xf32> -> vector<8x16xf32>
    %45 = vector.broadcast %17 : vector<1x16xf32> to vector<8x16xf32>
    %46 = arith.addf %44, %45 : vector<8x16xf32>
    %cst_31 = arith.constant dense<0xFF800000> : vector<8xf32>
    %47 = vector.multi_reduction <maximumf>, %46, %cst_31 [1] : vector<8x16xf32> to vector<8xf32>
    %48 = vector.shape_cast %47 : vector<8xf32> to vector<8x1xf32>
    %49 = vector.broadcast %48 : vector<8x1xf32> to vector<8x16xf32>
    %50 = arith.subf %46, %49 : vector<8x16xf32>
    %51 = math.exp %50 : vector<8x16xf32>
    %cst_32 = arith.constant dense<0.000000e+00> : vector<8xf32>
    %52 = vector.multi_reduction <add>, %51, %cst_32 [1] : vector<8x16xf32> to vector<8xf32>
    %53 = vector.shape_cast %52 : vector<8xf32> to vector<8x1xf32>
    %54 = tpu.reciprocal %53 : vector<8x1xf32> -> vector<8x1xf32>
    %55 = vector.broadcast %54 : vector<8x1xf32> to vector<8x16xf32>
    %56 = arith.mulf %51, %55 : vector<8x16xf32>
    %57 = arith.truncf %56 : vector<8x16xf32> to vector<8x16xbf16>
    %c0_33 = arith.constant 0 : index
    %c1 = arith.constant 1 : index
    %c0_34 = arith.constant 0 : index
    %c0_35 = arith.constant 0 : index
    %58 = vector.load %arg15[%c0_33, %c1, %c0_34, %c0_35] : memref<1x4x8x16xbf16, #tpu.memory_space<vmem>>, vector<1x1x8x16xbf16>
    %59 = vector.shape_cast %58 : vector<1x1x8x16xbf16> to vector<8x16xbf16>
    %60 = vector.shape_cast %57 : vector<8x16xbf16> to vector<1x1x8x16xbf16>
    tpu.vector_store %arg15[%c0_33, %c1, %c0_34, %c0_35], %60 {strides = array<i32>} : memref<1x4x8x16xbf16, #tpu.memory_space<vmem>>, vector<1x1x8x16xbf16>,
    %61 = arith.truncf %56 : vector<8x16xf32> to vector<8x16xbf16>
    %cst_36 = arith.constant dense<0.000000e+00> : vector<8x8xf32>
    %62 = tpu.matmul %61, %43, %cst_36 {dimension_numbers = #tpu.dot_dimension_numbers<[1], [0], [0], [1], [0, 0, 1, 1], [], []>} : vector<8x16xbf16>, vector<16x8xbf16>, vector<8x8xf32> -> vector<8x8xf32>
    %c0_37 = arith.constant 0 : index
    %c8_38 = arith.constant 8 : index
    %63 = vector.load %arg18[%c0_37, %c8_38] : memref<8x32xf32, #tpu.memory_space<vmem>>, vector<8x8xf32>
    tpu.vector_store %arg18[%c0_37, %c8_38], %62 {strides = array<i32>} : memref<8x32xf32, #tpu.memory_space<vmem>>, vector<8x8xf32>,
    %64 = vector.extract_strided_slice %10 {offsets = [0, 16], sizes = [8, 8], strides = [1, 1]} : vector<8x32xbf16> to vector<8x8xbf16>
    %c0_39 = arith.constant 0 : index
    %c16 = arith.constant 16 : index
    %65 = vector.load %arg16[%c0_39, %c16] : memref<16x32xbf16, #tpu.memory_space<vmem>>, vector<16x8xbf16>
    %c0_40 = arith.constant 0 : index
    %c16_41 = arith.constant 16 : index
    %66 = vector.load %arg17[%c0_40, %c16_41] : memref<16x32xbf16, #tpu.memory_space<vmem>>, vector<16x8xbf16>
    %cst_42 = arith.constant dense<0.000000e+00> : vector<8x16xf32>
    %67 = tpu.matmul %64, %65, %cst_42 {dimension_numbers = #tpu.dot_dimension_numbers<[1], [1], [0], [0], [0, 0, 1, 0], [], []>} : vector<8x8xbf16>, vector<16x8xbf16>, vector<8x16xf32> -> vector<8x16xf32>
    %68 = vector.broadcast %17 : vector<1x16xf32> to vector<8x16xf32>
    %69 = arith.addf %67, %68 : vector<8x16xf32>
    %cst_43 = arith.constant dense<0xFF800000> : vector<8xf32>
    %70 = vector.multi_reduction <maximumf>, %69, %cst_43 [1] : vector<8x16xf32> to vector<8xf32>
    %71 = vector.shape_cast %70 : vector<8xf32> to vector<8x1xf32>
    %72 = vector.broadcast %71 : vector<8x1xf32> to vector<8x16xf32>
    %73 = arith.subf %69, %72 : vector<8x16xf32>
    %74 = math.exp %73 : vector<8x16xf32>
    %cst_44 = arith.constant dense<0.000000e+00> : vector<8xf32>
    %75 = vector.multi_reduction <add>, %74, %cst_44 [1] : vector<8x16xf32> to vector<8xf32>
    %76 = vector.shape_cast %75 : vector<8xf32> to vector<8x1xf32>
    %77 = tpu.reciprocal %76 : vector<8x1xf32> -> vector<8x1xf32>
    %78 = vector.broadcast %77 : vector<8x1xf32> to vector<8x16xf32>
    %79 = arith.mulf %74, %78 : vector<8x16xf32>
    %80 = arith.truncf %79 : vector<8x16xf32> to vector<8x16xbf16>
    %c0_45 = arith.constant 0 : index
    %c2 = arith.constant 2 : index
    %c0_46 = arith.constant 0 : index
    %c0_47 = arith.constant 0 : index
    %81 = vector.load %arg15[%c0_45, %c2, %c0_46, %c0_47] : memref<1x4x8x16xbf16, #tpu.memory_space<vmem>>, vector<1x1x8x16xbf16>
    %82 = vector.shape_cast %81 : vector<1x1x8x16xbf16> to vector<8x16xbf16>
    %83 = vector.shape_cast %80 : vector<8x16xbf16> to vector<1x1x8x16xbf16>
    tpu.vector_store %arg15[%c0_45, %c2, %c0_46, %c0_47], %83 {strides = array<i32>} : memref<1x4x8x16xbf16, #tpu.memory_space<vmem>>, vector<1x1x8x16xbf16>,
    %84 = arith.truncf %79 : vector<8x16xf32> to vector<8x16xbf16>
    %cst_48 = arith.constant dense<0.000000e+00> : vector<8x8xf32>
    %85 = tpu.matmul %84, %66, %cst_48 {dimension_numbers = #tpu.dot_dimension_numbers<[1], [0], [0], [1], [0, 0, 1, 1], [], []>} : vector<8x16xbf16>, vector<16x8xbf16>, vector<8x8xf32> -> vector<8x8xf32>
    %c0_49 = arith.constant 0 : index
    %c16_50 = arith.constant 16 : index
    %86 = vector.load %arg18[%c0_49, %c16_50] : memref<8x32xf32, #tpu.memory_space<vmem>>, vector<8x8xf32>
    tpu.vector_store %arg18[%c0_49, %c16_50], %85 {strides = array<i32>} : memref<8x32xf32, #tpu.memory_space<vmem>>, vector<8x8xf32>,
    %87 = vector.extract_strided_slice %10 {offsets = [0, 24], sizes = [8, 8], strides = [1, 1]} : vector<8x32xbf16> to vector<8x8xbf16>
    %c0_51 = arith.constant 0 : index
    %c24 = arith.constant 24 : index
    %88 = vector.load %arg16[%c0_51, %c24] : memref<16x32xbf16, #tpu.memory_space<vmem>>, vector<16x8xbf16>
    %c0_52 = arith.constant 0 : index
    %c24_53 = arith.constant 24 : index
    %89 = vector.load %arg17[%c0_52, %c24_53] : memref<16x32xbf16, #tpu.memory_space<vmem>>, vector<16x8xbf16>
    %cst_54 = arith.constant dense<0.000000e+00> : vector<8x16xf32>
    %90 = tpu.matmul %87, %88, %cst_54 {dimension_numbers = #tpu.dot_dimension_numbers<[1], [1], [0], [0], [0, 0, 1, 0], [], []>} : vector<8x8xbf16>, vector<16x8xbf16>, vector<8x16xf32> -> vector<8x16xf32>
    %91 = vector.broadcast %17 : vector<1x16xf32> to vector<8x16xf32>
    %92 = arith.addf %90, %91 : vector<8x16xf32>
    %cst_55 = arith.constant dense<0xFF800000> : vector<8xf32>
    %93 = vector.multi_reduction <maximumf>, %92, %cst_55 [1] : vector<8x16xf32> to vector<8xf32>
    %94 = vector.shape_cast %93 : vector<8xf32> to vector<8x1xf32>
    %95 = vector.broadcast %94 : vector<8x1xf32> to vector<8x16xf32>
    %96 = arith.subf %92, %95 : vector<8x16xf32>
    %97 = math.exp %96 : vector<8x16xf32>
    %cst_56 = arith.constant dense<0.000000e+00> : vector<8xf32>
    %98 = vector.multi_reduction <add>, %97, %cst_56 [1] : vector<8x16xf32> to vector<8xf32>
    %99 = vector.shape_cast %98 : vector<8xf32> to vector<8x1xf32>
    %100 = tpu.reciprocal %99 : vector<8x1xf32> -> vector<8x1xf32>
    %101 = vector.broadcast %100 : vector<8x1xf32> to vector<8x16xf32>
    %102 = arith.mulf %97, %101 : vector<8x16xf32>
    %103 = arith.truncf %102 : vector<8x16xf32> to vector<8x16xbf16>
    %c0_57 = arith.constant 0 : index
    %c3 = arith.constant 3 : index
    %c0_58 = arith.constant 0 : index
    %c0_59 = arith.constant 0 : index
    %104 = vector.load %arg15[%c0_57, %c3, %c0_58, %c0_59] : memref<1x4x8x16xbf16, #tpu.memory_space<vmem>>, vector<1x1x8x16xbf16>
    %105 = vector.shape_cast %104 : vector<1x1x8x16xbf16> to vector<8x16xbf16>
    %106 = vector.shape_cast %103 : vector<8x16xbf16> to vector<1x1x8x16xbf16>
    tpu.vector_store %arg15[%c0_57, %c3, %c0_58, %c0_59], %106 {strides = array<i32>} : memref<1x4x8x16xbf16, #tpu.memory_space<vmem>>, vector<1x1x8x16xbf16>,
    %107 = arith.truncf %102 : vector<8x16xf32> to vector<8x16xbf16>
    %cst_60 = arith.constant dense<0.000000e+00> : vector<8x8xf32>
    %108 = tpu.matmul %107, %89, %cst_60 {dimension_numbers = #tpu.dot_dimension_numbers<[1], [0], [0], [1], [0, 0, 1, 1], [], []>} : vector<8x16xbf16>, vector<16x8xbf16>, vector<8x8xf32> -> vector<8x8xf32>
    %c0_61 = arith.constant 0 : index
    %c24_62 = arith.constant 24 : index
    %109 = vector.load %arg18[%c0_61, %c24_62] : memref<8x32xf32, #tpu.memory_space<vmem>>, vector<8x8xf32>
    tpu.vector_store %arg18[%c0_61, %c24_62], %108 {strides = array<i32>} : memref<8x32xf32, #tpu.memory_space<vmem>>, vector<8x8xf32>,
    %c0_63 = arith.constant 0 : index
    %c0_64 = arith.constant 0 : index
    %110 = vector.load %arg18[%c0_63, %c0_64] : memref<8x32xf32, #tpu.memory_space<vmem>>, vector<8x32xf32>
    %111 = arith.truncf %110 : vector<8x32xf32> to vector<8x32xbf16>
    %c0_65 = arith.constant 0 : index
    %c0_66 = arith.constant 0 : index
    %112 = vector.load %arg12[%c0_65, %c0_66] : memref<32x32xbf16, #tpu.memory_space<vmem>>, vector<32x32xbf16>
    %cst_67 = arith.constant dense<0.000000e+00> : vector<8x32xf32>
    %113 = tpu.matmul %111, %112, %cst_67 {dimension_numbers = #tpu.dot_dimension_numbers<[1], [0], [0], [1], [0, 0, 1, 1], [], []>} : vector<8x32xbf16>, vector<32x32xbf16>, vector<8x32xf32> -> vector<8x32xf32>
    %c0_68 = arith.constant 0 : index
    %c0_69 = arith.constant 0 : index
    %114 = vector.load %arg13[%c0_68, %c0_69] : memref<1x32xf32, #tpu.memory_space<vmem>>, vector<1x32xf32>
    %115 = vector.broadcast %114 : vector<1x32xf32> to vector<8x32xf32>
    %116 = arith.addf %113, %115 : vector<8x32xf32>
    %c0_70 = arith.constant 0 : index
    %c0_71 = arith.constant 0 : index
    %c0_72 = arith.constant 0 : index
    %117 = vector.load %arg14[%c0_70, %c0_71, %c0_72] : memref<1x8x32xf32, #tpu.memory_space<vmem>>, vector<1x8x32xf32>
    %118 = vector.shape_cast %117 : vector<1x8x32xf32> to vector<8x32xf32>
    %119 = vector.shape_cast %116 : vector<8x32xf32> to vector<1x8x32xf32>
    tpu.vector_store %arg14[%c0_70, %c0_71, %c0_72], %119 {strides = array<i32>} : memref<1x8x32xf32, #tpu.memory_space<vmem>>, vector<1x8x32xf32>,
    return
  }
  func.func @transform_0(%arg0: i32, %arg1: i32) -> (i32, i32, i32) {
    %c0_i32 = arith.constant 0 : i32
    %c0_i32_0 = arith.constant 0 : i32
    return %arg0, %arg1, %c0_i32 : i32, i32, i32
  }
  func.func @transform_1(%arg0: i32, %arg1: i32) -> (i32, i32, i32) {
    %c0_i32 = arith.constant 0 : i32
    %c0_i32_0 = arith.constant 0 : i32
    %c0_i32_1 = arith.constant 0 : i32
    return %arg0, %c0_i32, %c0_i32_0 : i32, i32, i32
  }
  func.func @transform_2(%arg0: i32, %arg1: i32) -> (i32, i32, i32) {
    %c0_i32 = arith.constant 0 : i32
    %c0_i32_0 = arith.constant 0 : i32
    %c0_i32_1 = arith.constant 0 : i32
    return %arg0, %c0_i32, %c0_i32_0 : i32, i32, i32
  }
  func.func @transform_3(%arg0: i32, %arg1: i32) -> (i32, i32, i32) {
    %c0_i32 = arith.constant 0 : i32
    %c0_i32_0 = arith.constant 0 : i32
    %c0_i32_1 = arith.constant 0 : i32
    return %arg0, %c0_i32, %c0_i32_0 : i32, i32, i32
  }
  func.func @transform_4(%arg0: i32, %arg1: i32) -> (i32, i32) {
    %c0_i32 = arith.constant 0 : i32
    %c0_i32_0 = arith.constant 0 : i32
    %c0_i32_1 = arith.constant 0 : i32
    return %c0_i32, %c0_i32_0 : i32, i32
  }
  func.func @transform_5(%arg0: i32, %arg1: i32) -> (i32, i32) {
    %c0_i32 = arith.constant 0 : i32
    %c0_i32_0 = arith.constant 0 : i32
    %c0_i32_1 = arith.constant 0 : i32
    return %c0_i32, %c0_i32_0 : i32, i32
  }
  func.func @transform_6(%arg0: i32, %arg1: i32) -> (i32, i32) {
    %c0_i32 = arith.constant 0 : i32
    %c0_i32_0 = arith.constant 0 : i32
    %c0_i32_1 = arith.constant 0 : i32
    return %c0_i32, %c0_i32_0 : i32, i32
  }
  func.func @transform_7(%arg0: i32, %arg1: i32) -> (i32, i32) {
    %c0_i32 = arith.constant 0 : i32
    %c0_i32_0 = arith.constant 0 : i32
    %c0_i32_1 = arith.constant 0 : i32
    return %c0_i32, %c0_i32_0 : i32, i32
  }
  func.func @transform_8(%arg0: i32, %arg1: i32) -> (i32, i32) {
    %c0_i32 = arith.constant 0 : i32
    %c0_i32_0 = arith.constant 0 : i32
    %c0_i32_1 = arith.constant 0 : i32
    return %c0_i32, %c0_i32_0 : i32, i32
  }
  func.func @transform_9(%arg0: i32, %arg1: i32) -> (i32, i32) {
    %c0_i32 = arith.constant 0 : i32
    %c0_i32_0 = arith.constant 0 : i32
    %c0_i32_1 = arith.constant 0 : i32
    return %c0_i32, %c0_i32_0 : i32, i32
  }
  func.func @transform_10(%arg0: i32, %arg1: i32) -> (i32, i32) {
    %c0_i32 = arith.constant 0 : i32
    %c0_i32_0 = arith.constant 0 : i32
    %c0_i32_1 = arith.constant 0 : i32
    return %c0_i32, %c0_i32_0 : i32, i32
  }
  func.func @transform_11(%arg0: i32, %arg1: i32) -> (i32, i32) {
    %c0_i32 = arith.constant 0 : i32
    %c0_i32_0 = arith.constant 0 : i32
    %c0_i32_1 = arith.constant 0 : i32
    return %c0_i32, %c0_i32_0 : i32, i32
  }
  func.func @transform_12(%arg0: i32, %arg1: i32) -> (i32, i32, i32) {
    %c0_i32 = arith.constant 0 : i32
    %c0_i32_0 = arith.constant 0 : i32
    return %arg0, %arg1, %c0_i32 : i32, i32, i32
  }
  func.func @transform_13(%arg0: i32, %arg1: i32) -> (i32, i32, i32, i32) {
    %c0_i32 = arith.constant 0 : i32
    %c0_i32_0 = arith.constant 0 : i32
    %c0_i32_1 = arith.constant 0 : i32
    return %arg0, %c0_i32, %arg1, %c0_i32_0 : i32, i32, i32, i32
  }
}

</mosaic_0001>

<bundles_post_ra>
// kernel: tpu_custom_call.1
= control target key start
LH: loop header
LB: loop body
LE: loop exit
PB: predicated region body
PF: predicated region fallthrough
CT: control target
= control target key end

     0   :  { %s3197_s0 = inlined_call_operand.hbm [shape: bf16[2,16,32], index: 0, kind: input, shape index: {}]   ;;  %s3198_s1 = inlined_call_operand.hbm [shape: bf16[2,16,32], index: 1, kind: input, shape index: {}]   ;;  %s3199_s2 = inlined_call_operand.hbm [shape: bf16[2,16,32], index: 2, kind: input, shape index: {}]   ;;  %s3200_s3 = inlined_call_operand.vmem [shape: f32[2,1,16], index: 3, kind: input, shape index: {}]   ;;  %s3201_s4 = inlined_call_operand.hbm [shape: bf16[32,32], index: 4, kind: input, shape index: {}]   ;;  %s3202_s5 = inlined_call_operand.hbm [shape: f32[1,32], index: 5, kind: input, shape index: {}]   ;;  %s3203_s6 = inlined_call_operand.vmem [shape: bf16[32,32], index: 6, kind: input, shape index: {}]   ;;  %s3204_s7 = inlined_call_operand.hbm [shape: f32[1,32], index: 7, kind: input, shape index: {}]   ;;  %s3205_s8 = inlined_call_operand.hbm [shape: bf16[32,32], index: 8, kind: input, shape index: {}]   ;;  %s3206_s9 = inlined_call_operand.hbm [shape: f32[1,32], index: 9, kind: input, shape index: {}]   ;;  %s3207_s10 = inlined_call_operand.vmem [shape: bf16[32,32], index: 10, kind: input, shape index: {}]   ;;  %s3208_s11 = inlined_call_operand.vmem [shape: f32[1,32], index: 11, kind: input, shape index: {}]   ;;  %s3209_s12 = inlined_call_operand.hbm [shape: f32[2,16,32], index: 12, kind: output, shape index: {0}]   ;;  %s3210_s13 = inlined_call_operand.hbm [shape: bf16[2,4,16,16], index: 13, kind: output, shape index: {1}]  }
   0x1   :  { %3252 = sst [smem:[#allocation39_spill]] %s3197_s0 }
   0x2   :  { %3253 = sst [smem:[#allocation40_spill]] %s3198_s1 }
   0x3   :  { %3254 = sst [smem:[#allocation41_spill]] %s3199_s2 }
   0x4   :  { %3255 = sst [smem:[#allocation42_spill]] %s3200_s3 }
   0x5   :  { %3256 = sst [smem:[#allocation43_spill]] %s3201_s4 }
   0x6   :  { %3257 = sst [smem:[#allocation44_spill]] %s3202_s5 }
   0x7   :  { %3258 = sst [smem:[#allocation45_spill]] %s3203_s6 }
   0x8   :  { %3259 = sst [smem:[#allocation46_spill]] %s3204_s7 }
   0x9   :  { %3260 = sst [smem:[#allocation47_spill]] %s3205_s8 }
   0xa   :  { %3261 = sst [smem:[#allocation48_spill]] %s3206_s9 }
   0xb   :  { %3262 = sst [smem:[#allocation49_spill]] %s3207_s10 }
   0xc   :  { %3263 = sst [smem:[#allocation50_spill]] %s3208_s11 }
   0xd   :  { %3264 = sst [smem:[#allocation51_spill]] %s3209_s12 }
   0xe   :  { %3265 = sst [smem:[#allocation52_spill]] %s3210_s13 }
   0xf   :  { %19 = vsyncpa [#allocation6], 0 }
  0x10   :  { %21 = vsyncpa [#allocation6 + $0x1], 0 }
  0x11   :  { %22 = vsyncpa [#allocation9], 0 }
  0x12   :  { %24 = vsyncpa [#allocation9 + $0x1], 0 }
  0x13   :  { %25 = vsyncpa [#allocation12], 0 }
  0x14   :  { %26 = vsyncpa [#allocation15], 0 }
  0x15   :  { %27 = vsyncpa [#allocation18], 0 }
  0x16   :  { %28 = vsyncpa [#allocation7], 0 }
  0x17   :  { %30 = vsyncpa [#allocation7 + $0x1], 0 }
  0x18   :  { %31 = vsyncpa [#allocation21], 0 }
  0x19   :  { %33 = vsyncpa [#allocation21 + $0x1], 0  ;;  %s2559_s25 = smov 0   ;;  %s2561_s26 = smov 0  }
  0x1a   :  { %s2563_s27 = smov 0   ;;  %s2565_s28 = smov 0  }
  0x1b   :  { %s2567_s29 = smov 0   ;;  %s2569_s30 = smov 0  }
  0x1c   :  { %s2571_s14 = smov 0   ;;  %s2573_s15 = smov 0  }
  0x1d   :  { %s2575_s16 = smov 0   ;;  %s2577_s17 = smov 0  }
  0x1e   :  { %s2579_s18 = smov 0  }
  0x1f LB: > { %3266 = sst [smem:[#allocation29_spill]] %s2426_s26  ;;  %s2615_s19 = sadd.s32 4294967295, %s2462_s18   ;;  %s2462_s18 = sphi %s2579_s18, %s39_s18   ;;  %s2458_s17 = sphi %s2577_s17, %s3345_s17   ;;  %s2454_s16 = sphi %s2575_s16, %s3344_s16   ;;  %s2450_s15 = sphi %s2573_s15, %s3343_s15   ;;  %s2446_s14 = sphi %s2571_s14, %s3342_s14   ;;  %s2442_s30 = sphi %s2569_s30, %s3341_s30   ;;  %s2438_s29 = sphi %s2567_s29, %s3340_s29   ;;  %s2434_s28 = sphi %s2565_s28, %s3339_s28   ;;  %s2430_s27 = sphi %s2563_s27, %s3338_s27   ;;  %s2426_s26 = sphi %s2561_s26, %s3336_s26   ;;  %s2422_s25 = sphi %s2559_s25, %s3335_s25  }
  0x20   : > { %3267 = sst [smem:[#allocation30_spill]] %s2430_s27  ;;  %p1678_p0 = scmp.ge.s32.totalorder %s2462_s18, 1 }
  0x21   : > { %3268 = sst [smem:[#allocation31_spill]] %s2434_s28  ;;  %p3216_p1 = scmp.eq.s32.totalorder %s2615_s19, 0 }
  0x22   : > { %3269 = sst [smem:[#allocation32_spill]] %s2446_s14  ;;  %p386_p2 = scmp.lt.s32.totalorder %s2462_s18, 5 }
  0x23   : > { %3270 = sst [smem:[#allocation33_spill]] %s2450_s15  ;;  %s2464_s21 = smov [#allocation11]  }
  0x24   : > { %3271 = sst [smem:[#allocation34_spill]] %s2615_s19  ;;  %p2620_p3 = pnand %p1678_p0, %p386_p2 }
  0x25   : > { %s398_s22 = sshll.u32 %s2464_s21, 4  ;;  %s2465_s24 = smov [#allocation14]   ;;  %s399_s22 = int_to_ptr.vmem [resolvable:$true] %s398_s22 }
  0x26   : > { %s3272_s20 = scalar_select %p2620_p3, 1, 0 }
  0x27   : > { %p1883_p4 = pneg %p2620_p3  ;;  %s426_s12 = sshll.u32 %s2465_s24, 4  ;;  %s2632_s12 = int_to_ptr.vmem [resolvable:$true] %s426_s12 }
  0x28   : > { %3273 = sst [smem:[#allocation35_spill]] %s3272_s20  ;;  %s3275_s4 = sld [smem:[#allocation43_spill]] }
  0x29   : > { %p2628_p5 = pnand %p1883_p4, %p3216_p1 }
  0x2b   : > { %s3274_s23 = scalar_select %p2628_p5, 1, 0 }
  0x2c   : > { %p2642_p7 = pneg %p2628_p5 }
  0x2e   : > { %s2062_s10 = scalar_lea.hbm %s3275_s4, 256 }
  0x2f   : > { %p2063_p6 = scmp.ne.s32.totalorder %s3275_s4, %s2062_s10  ;;  %p2069_p10 = scmp.lt.u32.totalorder %s2062_s10, %s3275_s4 }
  0x31   : > { %p2065_p8 = pnand %p2642_p7, %p2063_p6 }
  0x33   : > { %p2066_p9 = pneg %p2065_p8 }
  0x35   : > { %p2071_p11 = pnand %p2069_p10, %p2066_p9 }
  0x37   : > { %2074 = shalt.err (!%p2071_p11)
}
  0x38   : > { %s2075_s11 = scalar_lea.vmem %s399_s22, 256  ;;  %p2083_p2 = scmp.lt.s32.totalorder %s399_s22, %s399_s22 }
  0x39   : > { %p2076_p12 = scmp.ne.s32.totalorder %s399_s22, %s2075_s11  ;;  %p2084_p4 = scmp.lt.s32.totalorder %s2075_s11, %s2075_s11 }
  0x3b   : > { %p2078_p13 = pnand %p2076_p12, %p2642_p7  ;;  %p2085_p1 = por %p2084_p4, %p2083_p2 }
  0x3d   : > { %p2079_p0 = pneg %p2078_p13 }
  0x3f   : > { %p2086_p3 = pnand %p2085_p1, %p2079_p0 }
  0x41   : > { %2089 = shalt.err (!%p2086_p3)
}
  0x42   : > { %s3223_s6 = smov 64   ;;  %s3225_s13 = smov 4  }
  0x43   : > { %1886 = dma.hbm_to_vmem [thread:$0]  (!%p2628_p5), %s3275_s4, 256, %s399_s22, [#allocation12], %s3223_s6, %s3223_s6, %s3225_s13  }
  0x44   : > { %s3277_s7 = sld [smem:[#allocation46_spill]] }
  0x4a   : > { %s2090_s15 = scalar_lea.hbm %s3277_s7, 16 }
  0x4b   : > { %p2091_p1 = scmp.ne.s32.totalorder %s3277_s7, %s2090_s15  ;;  %p2097_p8 = scmp.lt.u32.totalorder %s2090_s15, %s3277_s7 }
  0x4d   : > { %p2093_p3 = pnand %p2091_p1, %p2642_p7 }
  0x4f   : > { %p2094_p6 = pneg %p2093_p3 }
  0x51   : > { %p2099_p9 = pnand %p2097_p8, %p2094_p6 }
  0x53   : > { %2102 = shalt.err (!%p2099_p9)
}
  0x54   : > { %s2103_s22 = scalar_lea.vmem %s2632_s12, 16  ;;  %s2110_s20 = scalar_lea.vmem %s2632_s12, 32 }
  0x55   : > { %p2104_p10 = scmp.ne.s32.totalorder %s2632_s12, %s2103_s22  ;;  %p2111_p13 = scmp.lt.s32.totalorder %s2632_s12, %s2632_s12 }
  0x56   : > { %p2112_p0 = scmp.lt.s32.totalorder %s2110_s20, %s2103_s22 }
  0x57   : > { %p2106_p11 = pnand %p2104_p10, %p2642_p7 }
  0x58   : > { %p2113_p2 = por %p2112_p0, %p2111_p13 }
  0x59   : > { %p2107_p12 = pneg %p2106_p11 }
  0x5b   : > { %p2114_p4 = pnand %p2113_p2, %p2107_p12 }
  0x5d   : > { %2117 = shalt.err (!%p2114_p4)
}
  0x5e   : > { %1892 = dma.hbm_to_vmem [thread:$0]  (!%p2628_p5), %s3277_s7, 16, %s2632_s12, [#allocation15]  }
  0x5f   : > { %p3228_p1 = scmp.eq.s32.totalorder %s2462_s18, 0  ;;  %p93_p3 = scmp.ne.s32.totalorder %s2430_s27, %s2426_s26 }
  0x60   : > { %p99_p6 = scmp.ne.s32.totalorder %s2426_s26, %s2422_s25  ;;  %p3227_p8 = scmp.lt.s32.totalorder %s2462_s18, 4 }
  0x61   : > { %p95_p9 = por %p93_p3, %p3228_p1  ;;  %s487_s15 = sand.u32 1, %s2462_s18  }
  0x62   : > { %p3278_p10 = scmp.eq.s32.totalorder %s2615_s19, 0  ;;  %s489_s10 = sand.u32 1, %s2430_s27  }
  0x63   : > { %s3222_s14 = sshll.u32 %s2458_s17, 7  ;;  %s2702_s24 = sshll.u32 %s489_s10, 3 }
  0x64   : > { %p2696_p11 = por %p99_p6, %p3278_p10  ;;  %s3281_s1 = sld [smem:[#allocation40_spill]] }
  0x65   : > { %p2713_p12 = pnand %p3227_p8, %p95_p9  ;;  %s491_s20 = scalar_lea.vmem [#allocation8], %s2702_s24 }
  0x66   : > { %s3279_s3 = scalar_select %p2696_p11, 1, 0 }
  0x67   : > { %s3282_s25 = scalar_select %p2713_p12, 1, 0 }
  0x68   : > { %3280 = sst [smem:[#allocation36_spill]] %s3279_s3  ;;  %s498_s0 = sshll.u32 %s491_s20, 4  ;;  %s2718_s0 = int_to_ptr.vmem [resolvable:$true] %s498_s0 }
  0x69   : > { %3283 = sst [smem:[#allocation37_spill]] %s3282_s25  ;;  %s2720_s28 = scalar_lea.sflag [#allocation9], %s487_s15 }
  0x6a   : > { %s2709_s12 = scalar_lea.hbm %s3281_s1, %s3222_s14  ;;  %p3242_p0 = pneg %p2713_p12 }
  0x6b   : > { %s2118_s10 = scalar_lea.hbm %s2709_s12, 128  ;;  %s2123_s14 = scalar_lea.hbm %s3281_s1, 256 }
  0x6c   : > { %p2119_p13 = scmp.ne.s32.totalorder %s2709_s12, %s2118_s10  ;;  %p2124_p3 = scmp.lt.u32.totalorder %s2709_s12, %s3281_s1 }
  0x6d   : > { %p2125_p6 = scmp.lt.u32.totalorder %s2123_s14, %s2118_s10  ;;  %p2127_p10 = scmp.lt.u32.totalorder %s2118_s10, %s2709_s12 }
  0x6e   : > { %p2121_p2 = pnand %p3242_p0, %p2119_p13 }
  0x6f   : > { %p2126_p9 = por %p2125_p6, %p2124_p3 }
  0x70   : > { %p2122_p4 = pneg %p2121_p2 }
  0x71   : > { %p2128_p8 = por %p2127_p10, %p2126_p9 }
  0x73   : > { %p2129_p1 = pnand %p2128_p8, %p2122_p4 }
  0x75   : > { %2132 = shalt.err (!%p2129_p1)
}
  0x76   : > { %s2133_s15 = scalar_lea.vmem %s2718_s0, 128  ;;  %s2468_s20 = smov [#allocation8]  }
  0x77   : > { %p2134_p13 = scmp.ne.s32.totalorder %s2718_s0, %s2133_s15  ;;  %s2138_s11 = sshll.u32 %s2468_s20, 4  ;;  %s2139_s11 = int_to_ptr.vmem [resolvable:$false] %s2138_s11 }
  0x78   : > { %s2140_s6 = scalar_lea.vmem %s2139_s11, 256  ;;  %p2141_p5 = scmp.lt.s32.totalorder %s2718_s0, %s2139_s11 }
  0x79   : > { %p2136_p2 = pnand %p2134_p13, %p3242_p0  ;;  %p2142_p3 = scmp.lt.s32.totalorder %s2140_s6, %s2133_s15 }
  0x7b   : > { %p2137_p11 = pneg %p2136_p2  ;;  %p2143_p6 = por %p2142_p3, %p2141_p5 }
  0x7d   : > { %p2144_p9 = pnand %p2143_p6, %p2137_p11 }
  0x7f   : > { %2147 = shalt.err (!%p2144_p9)
}
  0x80   : > { %s3284_s13 = smov 4   ;;  %s3285_s14 = smov 64  }
  0x81   : > { %1905 = dma.hbm_to_vmem [thread:$0]  (!%p2713_p12), %s2709_s12, 128, %s2718_s0, %s2720_s28, %s3285_s14, %s3285_s14, %s3284_s13  }
  0x82   : > { %s3286_s10 = sshll.u32 %s2458_s17, 7  ;;  %s3287_s2 = sld [smem:[#allocation41_spill]] }
  0x83   : > { %s512_s11 = scalar_lea.vmem [#allocation10], %s2702_s24  ;;  %s2469_s1 = smov [#allocation13]  }
  0x84   : > { %s2759_s6 = sshll.u32 %s512_s11, 4  ;;  %s412_s4 = sshll.u32 %s2469_s1, 4  ;;  %s413_s4 = int_to_ptr.vmem [resolvable:$true] %s412_s4  ;;  %s2819_s6 = int_to_ptr.vmem [resolvable:$true] %s2759_s6 }
  0x85   : > { %s2470_s7 = smov [#allocation16]   ;;  %s3288_s5 = sld [smem:[#allocation44_spill]] }
  0x86   : > { %s436_s3 = sshll.u32 %s2470_s7, 4  ;;  %s437_s3 = int_to_ptr.vmem [resolvable:$true] %s436_s3 }
  0x88   : > { %s2756_s15 = scalar_lea.hbm %s3287_s2, %s3286_s10 }
  0x8b   : > { %s2148_s19 = scalar_lea.hbm %s3288_s5, 16 }
  0x8c   : > { %p2149_p5 = scmp.ne.s32.totalorder %s3288_s5, %s2148_s19  ;;  %p2155_p11 = scmp.lt.u32.totalorder %s2148_s19, %s3288_s5 }
  0x8e   : > { %p2151_p1 = pnand %p2149_p5, %p2642_p7 }
  0x90   : > { %p2152_p8 = pneg %p2151_p1 }
  0x92   : > { %p2157_p4 = pnand %p2155_p11, %p2152_p8 }
  0x94   : > { %2160 = shalt.err (!%p2157_p4)
}
  0x95   : > { %s2161_s1 = scalar_lea.vmem %s413_s4, 16  ;;  %s2168_s7 = scalar_lea.vmem %s413_s4, 32 }
  0x96   : > { %p2162_p10 = scmp.ne.s32.totalorder %s413_s4, %s2161_s1  ;;  %p2169_p3 = scmp.lt.s32.totalorder %s413_s4, %s413_s4 }
  0x97   : > { %p2170_p6 = scmp.lt.s32.totalorder %s2168_s7, %s2161_s1 }
  0x98   : > { %p2164_p13 = pnand %p2162_p10, %p2642_p7 }
  0x99   : > { %p2171_p9 = por %p2170_p6, %p2169_p3 }
  0x9a   : > { %p2165_p2 = pneg %p2164_p13 }
  0x9c   : > { %p2172_p0 = pnand %p2171_p9, %p2165_p2 }
  0x9e   : > { %2175 = shalt.err (!%p2172_p0)
}
  0x9f   : > { %p3289_p5 = scmp.ne.s32.totalorder %s3274_s23, 0  ;;  %s3290_s8 = sld [smem:[#allocation47_spill]] }
  0xa1   : > { %1889 = dma.hbm_to_vmem [thread:$0]  (!%p3289_p5), %s3288_s5, 16, %s413_s4, [#allocation12]  }
  0xa5   : > { %s2176_s10 = scalar_lea.hbm %s3290_s8, 256 }
  0xa6   : > { %p2177_p1 = scmp.ne.s32.totalorder %s3290_s8, %s2176_s10  ;;  %p2183_p0 = scmp.lt.u32.totalorder %s2176_s10, %s3290_s8 }
  0xa8   : > { %p2179_p8 = pnand %p2177_p1, %p2642_p7 }
  0xaa   : > { %p2180_p11 = pneg %p2179_p8 }
  0xac   : > { %p2185_p4 = pnand %p2183_p0, %p2180_p11 }
  0xae   : > { %2188 = shalt.err (!%p2185_p4)
}
  0xaf   : > { %s2189_s0 = scalar_lea.vmem %s437_s3, 256  ;;  %p2197_p3 = scmp.lt.s32.totalorder %s437_s3, %s437_s3 }
  0xb0   : > { %p2190_p10 = scmp.ne.s32.totalorder %s437_s3, %s2189_s0  ;;  %p2198_p6 = scmp.lt.s32.totalorder %s2189_s0, %s2189_s0 }
  0xb2   : > { %p2192_p13 = pnand %p2190_p10, %p2642_p7  ;;  %p2199_p9 = por %p2198_p6, %p2197_p3 }
  0xb4   : > { %p2193_p2 = pneg %p2192_p13 }
  0xb6   : > { %p2200_p12 = pnand %p2199_p9, %p2193_p2 }
  0xb8   : > { %2203 = shalt.err (!%p2200_p12)
}
  0xb9   : > { %1895 = dma.hbm_to_vmem [thread:$0]  (!%p3289_p5), %s3290_s8, 256, %s437_s3, [#allocation15], %s3285_s14, %s3285_s14, %s3284_s13  }
  0xba   : > { %s2471_s1 = smov [#allocation17]   ;;  %s3291_s9 = sld [smem:[#allocation48_spill]] }
  0xbb   : > { %s450_s7 = sshll.u32 %s2471_s1, 4  ;;  %s451_s7 = int_to_ptr.vmem [resolvable:$true] %s450_s7 }
  0xc0   : > { %s2204_s19 = scalar_lea.hbm %s3291_s9, 16 }
  0xc1   : > { %p2205_p12 = scmp.ne.s32.totalorder %s3291_s9, %s2204_s19  ;;  %p2211_p11 = scmp.lt.u32.totalorder %s2204_s19, %s3291_s9 }
  0xc3   : > { %p2207_p1 = pnand %p2205_p12, %p2642_p7 }
  0xc5   : > { %p2208_p8 = pneg %p2207_p1 }
  0xc7   : > { %p2213_p0 = pnand %p2211_p11, %p2208_p8 }
  0xc9   : > { %2216 = shalt.err (!%p2213_p0)
}
  0xca   : > { %s2217_s3 = scalar_lea.vmem %s451_s7, 16  ;;  %s2224_s11 = scalar_lea.vmem %s451_s7, 32 }
  0xcb   : > { %p2218_p4 = scmp.ne.s32.totalorder %s451_s7, %s2217_s3  ;;  %p2225_p2 = scmp.lt.s32.totalorder %s451_s7, %s451_s7 }
  0xcc   : > { %p2226_p3 = scmp.lt.s32.totalorder %s2224_s11, %s2217_s3 }
  0xcd   : > { %p2220_p10 = pnand %p2218_p4, %p2642_p7 }
  0xce   : > { %p2227_p6 = por %p2226_p3, %p2225_p2 }
  0xcf   : > { %p2221_p13 = pneg %p2220_p10 }
  0xd1   : > { %p2228_p9 = pnand %p2227_p6, %p2221_p13 }
  0xd3   : > { %2231 = shalt.err (!%p2228_p9)
}
  0xd4   : > { %s3292_s21 = sld [smem:[#allocation31_spill]]  ;;  %s3293_s4 = sld [smem:[#allocation30_spill]] }
  0xd5   : > { %s3294_s24 = sld [smem:[#allocation34_spill]]  ;;  %s48_s23 = sadd.s32 1, %s2454_s16 }
  0xd6   : > { %1898 = dma.hbm_to_vmem [thread:$0]  (!%p3289_p5), %s3291_s9, 16, %s451_s7, [#allocation18]  }
  0xd7   : > { %p49_p7 = scmp.ge.s32.totalorder %s48_s23, 2  ;;  %s51_s1 = sadd.s32 1, %s2458_s17 }
  0xd8   : > { %s1677_s26 = sadd.s32 4294967294, %s2462_s18   ;;  %s60_s27 = sadd.s32 1, %s2442_s30 }
  0xd9   : > { %s3347_s23 = smov (%p49_p7, %s48_s23), 0  ;;  %s3349_s1 = smov (!%p49_p7, %s51_s1), %s2458_s17 }
  0xda   : > { %s56_s19 = ssub.s32 %s2454_s16, %s3347_s23  ;;  %p67_p12 = scmp.ne.s32.totalorder %s2442_s30, %s2438_s29 }
  0xdb   : > { %p53_p5 = scmp.ge.s32.totalorder %s3349_s1, 2  ;;  %p73_p1 = scmp.ne.s32.totalorder %s2438_s29, %s3292_s21 }
  0xdc   : > { %s86_s7 = sadd.s32 1, %s3293_s4  ;;  %p345_p8 = scmp.eq.s32.totalorder %s3294_s24, 3 }
  0xdd   : > { %s3351_s1 = smov (%p53_p5, %s3349_s1), 0  ;;  %p3296_p11 = scmp.eq.s32.totalorder %s3294_s24, 0 }
  0xde   : > { %3295 = sst [smem:[#allocation38_spill]] %s3351_s1  ;;  %p2847_p4 = por %p345_p8, %p67_p12 }
  0xdf   : > { %p2840_p0 = por %p3296_p11, %p73_p1  ;;  %s55_s22 = ssub.s32 %s2458_s17, %s3351_s1 }
  0xe0   : > { %s3298_s10 = scalar_select %p2847_p4, 1, 0 }
  0xe1   : > { %s3297_s25 = scalar_select %p2840_p0, 1, 0 }
  0xe2   : > { %p351_p10 = scmp.eq.s32.totalorder %s1677_s26, 3  ;;  %s57_s20 = sor.u32 %s56_s19, %s55_s22 }
  0xe3   : > { %p84_p13 = scmp.eq.s32.totalorder %s55_s22, 0  ;;  %p58_p2 = scmp.eq.s32.totalorder %s57_s20, 0 }
  0xe4   : > { %p2853_p3 = por %p351_p10, %p73_p1  ;;  %s3300_s11 = sld [smem:[#allocation37_spill]] }
  0xe5   : > { %s3353_s4 = smov (!%p84_p13, %s3293_s4), %s86_s7  ;;  %s467_s0 = sand.u32 1, %s2442_s30  }
  0xe6   : > { %s3299_s3 = scalar_select %p2853_p3, 1, 0 }
  0xe7   : > { %s2861_s12 = scalar_select %p58_p2, %s2442_s30, %s60_s27  }
  0xe8   : > { %s1686_s21 = sshll.u32 %s2458_s17, 1  ;;  %p3301_p6 = scmp.eq.s32.totalorder %s2462_s18, 0 }
  0xe9   : > { %s1685_s24 = sshll.u32 %s467_s0, 2  ;;  %s476_s26 = sadd.s32 %s2454_s16, %s1686_s21 }
  0xea   : > { %p69_p9 = por %p3301_p6, %p67_p12  ;;  %s1687_s19 = sshll.u32 %s476_s26, 6 }
  0xeb   : > { %s471_s22 = scalar_lea.vmem [#allocation5], %s1685_s24  ;;  %s3302_s9 = sld [smem:[#allocation39_spill]] }
  0xec   : > { %s480_s20 = sshll.u32 %s471_s22, 4  ;;  %p3303_p7 = scmp.lt.s32.totalorder %s2462_s18, 4  ;;  %s2878_s20 = int_to_ptr.vmem [resolvable:$true] %s480_s20 }
  0xed   : > { %s2232_s1 = scalar_lea.hbm %s2756_s15, 128  ;;  %p3305_p1 = scmp.ne.s32.totalorder %s3300_s11, 0 }
  0xee   : > { %p2882_p5 = pnand %p3303_p7, %p69_p9  ;;  %p2233_p12 = scmp.ne.s32.totalorder %s2756_s15, %s2232_s1 }
  0xef   : > { %p3306_p8 = pneg %p3305_p1  ;;  %s2237_s26 = scalar_lea.hbm %s3287_s2, 256 }
  0xf0   : > { %p2238_p13 = scmp.lt.u32.totalorder %s2756_s15, %s3287_s2  ;;  %p2239_p2 = scmp.lt.u32.totalorder %s2237_s26, %s2232_s1 }
  0xf1   : > { %s2876_s7 = scalar_lea.hbm %s3302_s9, %s1687_s19  ;;  %p2235_p11 = pnand %p2233_p12, %p3306_p8 }
  0xf2   : > { %p2240_p6 = por %p2239_p2, %p2238_p13  ;;  %p2241_p9 = scmp.lt.u32.totalorder %s2232_s1, %s2756_s15 }
  0xf3   : > { %p2236_p10 = pneg %p2235_p11 }
  0xf4   : > { %p2242_p7 = por %p2241_p9, %p2240_p6 }
  0xf6   : > { %p2243_p3 = pnand %p2242_p7, %p2236_p10 }
  0xf8   : > { %2246 = shalt.err (!%p2243_p3)
}
  0xf9   : > { %s2247_s19 = scalar_lea.vmem %s2819_s6, 128  ;;  %s2472_s22 = smov [#allocation10]  }
  0xfa   : > { %p2248_p12 = scmp.ne.s32.totalorder %s2819_s6, %s2247_s19  ;;  %s2252_s21 = sshll.u32 %s2472_s22, 4  ;;  %s2253_s21 = int_to_ptr.vmem [resolvable:$false] %s2252_s21 }
  0xfb   : > { %s2254_s24 = scalar_lea.vmem %s2253_s21, 256  ;;  %p2255_p0 = scmp.lt.s32.totalorder %s2819_s6, %s2253_s21 }
  0xfc   : > { %p2250_p11 = pnand %p2248_p12, %p3306_p8  ;;  %p2256_p13 = scmp.lt.s32.totalorder %s2254_s24, %s2247_s19 }
  0xfe   : > { %p2251_p4 = pneg %p2250_p11  ;;  %p2257_p2 = por %p2256_p13, %p2255_p0 }
 0x100   : > { %p2258_p6 = pnand %p2257_p2, %p2251_p4 }
 0x102   : > { %2261 = shalt.err (!%p2258_p6)
}
 0x103   : > { %1908 = dma.hbm_to_vmem [thread:$0]  (!%p3305_p1), %s2756_s15, 128, %s2819_s6, %s2720_s28, %s3285_s14, %s3285_s14, %s3284_s13  }
 0x104   : > { %s468_s1 = scalar_lea.sflag [#allocation6], %s467_s0  ;;  %s2262_s26 = scalar_lea.hbm %s2876_s7, 64 }
 0x105   : > { %p2263_p0 = scmp.ne.s32.totalorder %s2876_s7, %s2262_s26  ;;  %p2264_p4 = pneg %p2882_p5 }
 0x106   : > { %s2267_s8 = scalar_lea.hbm %s3302_s9, 256  ;;  %p2268_p9 = scmp.lt.u32.totalorder %s2876_s7, %s3302_s9 }
 0x107   : > { %p2265_p3 = pnand %p2264_p4, %p2263_p0  ;;  %p2269_p7 = scmp.lt.u32.totalorder %s2267_s8, %s2262_s26 }
 0x108   : > { %p2271_p12 = scmp.lt.u32.totalorder %s2262_s26, %s2876_s7 }
 0x109   : > { %p2266_p10 = pneg %p2265_p3  ;;  %p2270_p1 = por %p2269_p7, %p2268_p9 }
 0x10b   : > { %p2272_p8 = por %p2271_p12, %p2270_p1 }
 0x10d   : > { %p2273_p11 = pnand %p2272_p8, %p2266_p10 }
 0x10f   : > { %2276 = shalt.err (!%p2273_p11)
}
 0x110   : > { %s2277_s28 = scalar_lea.vmem %s2878_s20, 64  ;;  %s2473_s13 = smov [#allocation5]  }
 0x111   : > { %p2278_p13 = scmp.ne.s32.totalorder %s2878_s20, %s2277_s28  ;;  %s2282_s14 = sshll.u32 %s2473_s13, 4  ;;  %s2283_s14 = int_to_ptr.vmem [resolvable:$false] %s2282_s14 }
 0x112   : > { %s2284_s15 = scalar_lea.vmem %s2283_s14, 128  ;;  %p2285_p0 = scmp.lt.s32.totalorder %s2878_s20, %s2283_s14 }
 0x113   : > { %p2280_p2 = pnand %p2278_p13, %p2264_p4  ;;  %p2286_p3 = scmp.lt.s32.totalorder %s2284_s15, %s2277_s28 }
 0x115   : > { %p2281_p6 = pneg %p2280_p2  ;;  %p2287_p9 = por %p2286_p3, %p2285_p0 }
 0x117   : > { %p2288_p7 = pnand %p2287_p9, %p2281_p6 }
 0x119   : > { %2291 = shalt.err (!%p2288_p7)
}
 0x11a   : > { %1902 = dma.hbm_to_vmem [thread:$0]  (!%p2882_p5), %s2876_s7, 64, %s2878_s20, %s468_s1  }
 0x11b   : > { %s3307_s6 = sld [smem:[#allocation35_spill]] }
 0x121   : > { %p3308_p10 = scmp.ne.s32.totalorder %s3307_s6, 0 }
 0x122   : > { %s2943_s0 = sand.u32 (!%p3308_p10), 1, %s2438_s29   ;;  %p3309_p4 = scmp.ne.s32.totalorder (!%p3308_p10), %s3297_s25, 0 }
 0x123   : > { %537 = sbr.rel (%p3308_p10) target bundleno = 2013 (0x7dd), region = 68  ;;  %s1695_s21 = sshll.u32 (!%p3308_p10), %s2943_s0, 2 }
 0x124   : > { %s540_s24 = scalar_lea.sflag (!%p3308_p10), [#allocation6], %s2943_s0  ;;  %s2947_s26 = scalar_lea.vmem (!%p3308_p10), [#allocation5], %s1695_s21 }
 0x12a   : > { %2393 = dma.done.wait (%p3309_p4), %s540_s24, 64  }
 0x12b   : > { %2395 = vsyncadd (%p3309_p4), %s540_s24, 4294967232  ;;  %s3310_s27 = sld [smem:[#allocation34_spill]]  ;;  %s3311_s20 = sld [smem:[#allocation29_spill]] }
 0x12c   : > { %s3312_s7 = sld [smem:[#allocation36_spill]] }
 0x131   : > { %s548_s1 = sand.u32 1, %s3310_s27   ;;  %s550_s11 = sand.u32 1, %s3311_s20  }
 0x132   : > { %s2955_s5 = sshll.u32 %s550_s11, 3  ;;  %s549_s8 = scalar_lea.sflag [#allocation9], %s548_s1 }
 0x133   : > { %s552_s19 = scalar_lea.vmem [#allocation8], %s2955_s5  ;;  %p3313_p5 = scmp.ne.s32.totalorder %s3312_s7, 0 }
 0x135   : > { %2397 = dma.done.wait (%p3313_p5), %s549_s8, 256  }
 0x136   : > { %2399 = vsyncadd (%p3313_p5), %s549_s8, 4294967040  ;;  %s561_s22 = scalar_lea.vmem [#allocation10], %s2955_s5  ;;  %p3314_p1 = scmp.eq.s32.totalorder %s3310_s27, 0 }
 0x138   : > { %2401 = dma.done.wait (%p3314_p1), [#allocation12], 272   ;;  %p3315_p12 = pmov %p3314_p1 }
 0x139   : > { %p3316_p8 = pmov %p3314_p1 }
 0x13a   : > { %2403 = vsyncadd (%p3315_p12), [#allocation12], 4294967024 }
 0x13b   : > { %2405 = dma.done.wait (%p3316_p8), [#allocation15], 272   ;;  %p3317_p11 = pmov %p3314_p1 }
 0x13c   : > { %p3318_p13 = pmov %p3314_p1 }
 0x13d   : > { %2407 = vsyncadd (%p3317_p11), [#allocation15], 4294967024 }
 0x13e   : > { %2409 = dma.done.wait (%p3318_p13), [#allocation18], 16   ;;  %p3319_p2 = pmov %p3314_p1 }
 0x13f   : > { %s3320_s25 = sld [smem:[#allocation33_spill]]  ;;  %s1703_s28 = sshll.u32 %s2943_s0, 3 }
 0x140   : > { %2411 = vsyncadd (%p3319_p2), [#allocation18], 4294967280  ;;  %s1704_s13 = sshll.u32 %s2943_s0, 4  ;;  %s3321_s6 = sld [smem:[#allocation42_spill]] }
 0x141   : > { %s2985_s24 = scalar_lea.vmem [#allocation19], %s1703_s28  ;;  %s2987_s20 = scalar_lea.vmem [#allocation20], %s1704_s13 }
 0x142   : > { %s3322_s27 = sld [smem:[#allocation32_spill]] }
 0x145   : > { %p642_p6 = scmp.lt.s32.totalorder %s3320_s25, 1 }
 0x147   : > { %s3355_s25 = smov (!%p642_p6, %s3320_s25), 1 }
 0x148   : > { %s644_s21 = scalar_lea.vmem %s3321_s6, %s3355_s25  ;;  %p1705_p0 = scmp.ne.s32.totalorder %s3322_s27, 0 }
 0x149   : > { %s3323_s11 = sld [smem:[#allocation45_spill]] (!%p1705_p0)  ;;  %v2474_v1 = vmov (!%p1705_p0), 0.0   ;;  %v2037_v2 = vld [vmem:[#allocation16] sm:$0xff] (!%p1705_p0)   ;;  %vm2475_vm0 = vmmov (!%p1705_p0), 0   ;;  %v2039_v4 = vld [vmem:[#allocation16 + $0x8] sm:$0xff] (!%p1705_p0)   ;;  %vm680_vm1 = vcmask (!%p1705_p0), 261120  }
 0x14a   : > { %649 = sbr.rel (%p1705_p0) target bundleno = 562 (0x232), region = 104  ;;  %1773 = vmatprep.subr.bf16.mxu0 (!%p1705_p0), %v2474_v1  ;;  %1781 = vmatprep.subr.bf16.mxu1 (!%p1705_p0), %v2474_v1  ;;  %v2040_v5 = vld [vmem:[%s552_s19] sm:$0xff] (!%p1705_p0)   ;;  %v2041_v6 = vld [vmem:[%s561_s22] sm:$0xff] (!%p1705_p0)  }
 0x14b   : > { %1777 = vmatprep.mubr.msk.bf16.mxu0 (!%p1705_p0), %vm2475_vm0, %v2474_v1  ;;  %1782 = vmatpush3.bf16.msra.mxu1 (!%p1705_p0), %v2037_v2  ;;  %v1706_v7 = vld [vmem:[#allocation14] ss:$0 sm:$0xff] (!%p1705_p0)  ;;  %v1711_v9 = vld [vmem:[#allocation17] ss:$0 sm:$0xff] (!%p1705_p0) }
 0x14c   : > { %1783 = vmatprep.subr.bf16.mxu1 (!%p1705_p0), %v2474_v1  ;;  %1785 = vmatprep.mubr.msk.bf16.mxu1 (!%p1705_p0), %vm2475_vm0, %v2474_v1 }
 0x14f   : > { %v2036_v0 = vld [vmem:[%s3323_s11] sm:$0xff] (!%p1705_p0)   ;;  %v2038_v3 = vld [vmem:[%s3323_s11 + $0x8] sm:$0xff] (!%p1705_p0)   ;;  %1784 = vmatpush3.bf16.msra.mxu1 (!%p1705_p0), %v2039_v4 }
 0x150   : > { %1774 = vmatpush3.bf16.msra.mxu0 (!%p1705_p0), %v2036_v0 }
 0x151   : > { %1775 = vmatprep.subr.bf16.mxu0 %v2474_v1 }
 0x152   : > { %1786 = vmatmul.mubr.msk.bf16.vlgmr.msra.gmra.mrb[0].mxu1 %vm680_vm1, %v2041_v6 }
 0x154   : > { %1776 = vmatpush3.bf16.msra.mxu0 %v2038_v3 }
 0x157   : > { %1778 = vmatmul.mubr.msk.bf16.vlgmr.msra.gmra.mrb[0].mxu0 %vm680_vm1, %v2040_v5 }
 0x225   : > { %v792_v10 = vpop.f32.mrb[0].mxu1 }
 0x226   : > { %v1787_v12 = vpop.f32.mrb[1].mxu1  ;;  %v793_v18 = vadd.f32 %v1711_v9, %v792_v10 }
 0x227   : > { %v795_v16 = vpop.f32.mrb[2].mxu1 }
 0x228   : > { %v796_v19 = vadd.f32 %v1711_v9, %v795_v16  ;;  %v1788_v20 = vpop.f32.mrb[3].mxu1 }
 0x22a   : > { %v718_v8 = vpop.f32.mrb[0].mxu0  ;;  %v801_v22 = vpack.c.bf16 %v796_v19, %v793_v18 }
 0x22b   : > { %v1779_v11 = vpop.f32.mrb[1].mxu0  ;;  %v719_v14 = vadd.f32 %v1706_v7, %v718_v8 }
 0x22c   : > { %v721_v13 = vpop.f32.mrb[2].mxu0  ;;  %802 = vst.msk [vmem:[#allocation3] sm:$0xff] %vm680_vm1, %v801_v22 }
 0x22d   : > { %v722_v15 = vadd.f32 %v1706_v7, %v721_v13  ;;  %v1780_v17 = vpop.f32.mrb[3].mxu0 }
 0x22f   : > { %v799_v21 = vpack.c.bf16 %v722_v15, %v719_v14 }
 0x231   : > { %800 = vst.msk [vmem:[#allocation2] sm:$0xff] %vm680_vm1, %v799_v21 }
 0x232 PF: > { %v2042_v23 = vld [vmem:[#allocation11] sm:$0xff]   ;;  %v2476_v24 = vmov 0.0   ;;  %v2043_v25 = vld [vmem:[#allocation11 + $0x8] sm:$0xff]   ;;  %vm2477_vm2 = vmmov 0   ;;  %vm883_vm3 = vcmask 64512   ;;  %s2478_s5 = smov 120   ;;  %v878_v45 = vlaneseq }
 0x233   : > { %1789 = vmatprep.subr.bf16.mxu0 %v2476_v24  ;;  %1797 = vmatprep.subr.bf16.mxu1 %v2476_v24  ;;  %v803_v28 = vld [vmem:[%s2947_s26] sm:$0xf]  ;;  %vm827_vm4 = vcmask 261120   ;;  %s2479_s19 = smov 112   ;;  %v1716_v29 = vld [vmem:[#allocation13] ss:$0 sm:$0xff] }
 0x234   : > { %1790 = vmatpush3.bf16.msra.mxu0 %v2042_v23  ;;  %1793 = vmatprep.mubr.msk.bf16.mxu0 %vm2477_vm2, %v2476_v24  ;;  %s2480_s26 = smov 104   ;;  %v872_v46 = vld [vmem:[%s644_s21] sm:$0x1]  ;;  %v879_v47 = vshrl.u32 %v878_v45, 7  ;;  %vm930_vm6 = vcmask 130048   ;;  %v990_v57 = vld [vmem:[#allocation3] sm:$0xff] }
 0x235   : > { %1791 = vmatprep.subr.bf16.mxu0 %v2476_v24  ;;  %1799 = vmatprep.mubr.msk.bf16.mxu1 %vm2477_vm2, %v2476_v24  ;;  %vm873_vm5 = vcmp.eq.f32.partialorder %v872_v46, 0.0  ;;  %vm943_vm7 = vcmask 125952   ;;  %s2481_s25 = smov 8   ;;  %s3325_s21 = sld [smem:[#allocation49_spill]]  ;;  %vm1108_vm8 = vcmask 130112   ;;  %vm1228_vm9 = vcmask 195712  }
 0x236   : > { %v880_v48 = vsub.s32 0, %v879_v47  ;;  %v874_v49 = vsel %vm873_vm5, -inf, %v2476_v24  ;;  %s2482_s1 = smov 16   ;;  %s2483_s8 = smov 24   ;;  %vm1348_vm10 = vcmask 261312  }
 0x237   : > { %s3326_s14 = sld [smem:[#allocation33_spill]]  ;;  %s1454_s28 = sshll.u32 %s2987_s20, 4  ;;  %s3097_s28 = int_to_ptr.vmem [resolvable:$true] %s1454_s28 }
 0x238   : > { %v989_v26 = vld [vmem:[#allocation2] sm:$0xff]  ;;  %1792 = vmatpush3.bf16.msra.mxu0 %v2043_v25  ;;  %v881_v50 = vrot.slane %v874_v49, %v880_v48  ;;  %s3328_s15 = sld [smem:[#allocation52_spill]]  ;;  %s1425_s7 = scalar_lea.sflag [#allocation21], %s2943_s0 }
 0x239   : > { %995 = vrot.lane.b32.xlu0 %v989_v26, %s2478_s5  ;;  %v888_v27 = vsel %vm883_vm3, %v989_v26, 0  ;;  %1803 = vmatprep.subr.bf16.mxu0 %v2476_v24  ;;  %p3330_p9 = scmp.ne.s32.totalorder %s3298_s10, 0 }
 0x23a   : > { %1798 = vmatpush3.bf16.xpose.msra.mxu1 %v888_v27  ;;  %1115 = vrot.lane.b32.xlu1 %v989_v26, %s2479_s19 }
 0x23b   : > { %1809 = vmatprep.subr.bf16.mxu1 %v2476_v24  ;;  %1794 = vmatmul.mubr.msk.bf16.vlgmr.msra.gmra.mrb[0].mxu0 %vm827_vm4, %v803_v28 }
 0x23c   : > { %1805 = vmatprep.mubr.msk.bf16.mxu0 %vm2477_vm2, %v2476_v24  ;;  %1804 = vmatpush3.bf16.msra.mxu0 %v990_v57 }
 0x23d   : > { %1815 = vmatprep.subr.bf16.mxu0 %v2476_v24 }
 0x23e   : > { %s3329_s6 = smov %s3328_s15 }
 0x2ab   : > { %v996_v33 = vpop.permute.xlu0 %995 }
 0x2ac   : > { %v1001_v37 = vsel %vm883_vm3, %v996_v33, 0  ;;  %v1116_v38 = vpop.permute.xlu1 %1115 }
 0x2ad   : > { %v1121_v39 = vsel %vm883_vm3, %v1116_v38, 0 }
 0x30e   : > { %v865_v30 = vpop.f32.mrb[0].mxu0 }
 0x30f   : > { %v866_v31 = vadd.f32 %v1716_v29, %v865_v30  ;;  %v1795_v32 = vpop.f32.mrb[1].mxu0 }
 0x310   : > { %v868_v34 = vpop.f32.mrb[2].mxu0 }
 0x311   : > { %v871_v35 = vpack.c.bf16 %v866_v31, %v866_v31  ;;  %v1796_v36 = vpop.f32.mrb[3].mxu0 }
 0x313   : > { %1112 = vrot.lane.b32.xlu1 %v871_v35, %s2479_s19  ;;  %992 = vrot.lane.b32.xlu0 %v871_v35, %s2478_s5 }
 0x314   : > { %1800 = vmatmul.mubr.msk.bf16.vlgmr.msra.gmra.mrb[0].mxu1 %vm883_vm3, %v871_v35 }
 0x315   : > { %1810 = vmatpush3.bf16.xpose.msra.mxu1 %v1001_v37  ;;  %1811 = vmatprep.mubr.msk.bf16.mxu1 %vm2477_vm2, %v2476_v24 }
 0x316   : > { %1821 = vmatprep.subr.bf16.mxu1 %v2476_v24 }
 0x317   : > { %1232 = vrot.lane.b32.xlu1 %v871_v35, %s2480_s26  ;;  %1235 = vrot.lane.b32.xlu0 %v989_v26, %s2480_s26 }
 0x385   : > { %v993_v40 = vpop.permute.xlu0 %992  ;;  %v1113_v43 = vpop.permute.xlu1 %1112 }
 0x386   : > { %1812 = vmatmul.mubr.msk.bf16.vlgmr.msra.gmra.mrb[4].mxu1 %vm883_vm3, %v993_v40 }
 0x387   : > { %1822 = vmatpush3.bf16.xpose.msra.mxu1 %v1121_v39  ;;  %1823 = vmatprep.mubr.msk.bf16.mxu1 %vm2477_vm2, %v2476_v24 }
 0x388   : > { %1833 = vmatprep.subr.bf16.mxu1 %v2476_v24 }
 0x389   : > { %v1236_v41 = vpop.permute.xlu0 %1235  ;;  %v1233_v44 = vpop.permute.xlu1 %1232 }
 0x38a   : > { %v1241_v42 = vsel %vm883_vm3, %v1236_v41, 0 }
 0x38e   : > { %1824 = vmatmul.mubr.msk.bf16.vlgmr.msra.gmra.mrb[8].mxu1 %vm883_vm3, %v1113_v43 }
 0x38f   : > { %1834 = vmatpush3.bf16.xpose.msra.mxu1 %v1241_v42  ;;  %1835 = vmatprep.mubr.msk.bf16.mxu1 %vm2477_vm2, %v2476_v24 }
 0x390   : > { %1845 = vmatprep.subr.bf16.mxu1 %v2476_v24 }
 0x396   : > { %1836 = vmatmul.mubr.msk.bf16.vlgmr.msra.gmra.mrb[12].mxu1 %vm883_vm3, %v1233_v44 }
 0x397   : > { %1849 = vmatprep.mubr.msk.bf16.mxu1 %vm2477_vm2, %v2476_v24 }
 0x3e7   : > { %v924_v51 = vpop.f32.mrb[0].mxu1 }
 0x3e8   : > { %v925_v52 = vadd.f32 %v924_v51, %v881_v50  ;;  %v1801_v53 = vpop.f32.mrb[1].mxu1 }
 0x3e9   : > { %v927_v54 = vpop.f32.mrb[2].mxu1 }
 0x3ea   : > { %v1802_v55 = vpop.f32.mrb[3].mxu1  ;;  %v931_v56 = vsel %vm930_vm6, %v925_v52, -inf }
 0x3eb   : > { %932 = vmax.xlane.f32.xlu0 %v931_v56 }
 0x459   : > { %v1037_v58 = vpop.f32.mrb[4].mxu1 }
 0x45a   : > { %v1038_v59 = vadd.f32 %v1037_v58, %v881_v50  ;;  %v1813_v60 = vpop.f32.mrb[5].mxu1 }
 0x45b   : > { %v1040_v61 = vpop.f32.mrb[6].mxu1  ;;  %v2044_v60 = vld [vmem:[%s3325_s21] sm:$0xff]  }
 0x45c   : > { %v1814_v62 = vpop.f32.mrb[7].mxu1  ;;  %v1043_v63 = vsel %vm930_vm6, %v1038_v59, -inf  ;;  %1846 = vmatpush3.bf16.msra.mxu1 %v2044_v60  ;;  %v2045_v61 = vld [vmem:[%s3325_s21 + $0x8] sm:$0xff]  }
 0x45d   : > { %1044 = vmax.xlane.f32.xlu1 %v1043_v63  ;;  %1847 = vmatprep.subr.bf16.mxu1 %v2476_v24 }
 0x460   : > { %1848 = vmatpush3.bf16.msra.mxu1 %v2045_v61 }
 0x461   : > { %v1157_v0 = vpop.f32.mrb[8].mxu1 }
 0x462   : > { %v1158_v1 = vadd.f32 %v1157_v0, %v881_v50  ;;  %v1825_v2 = vpop.f32.mrb[9].mxu1 }
 0x463   : > { %v1160_v3 = vpop.f32.mrb[10].mxu1 }
 0x464   : > { %v1826_v4 = vpop.f32.mrb[11].mxu1  ;;  %v1163_v5 = vsel %vm930_vm6, %v1158_v1, -inf }
 0x465   : > { %1164 = vmax.xlane.f32.xlu0 %v1163_v5 }
 0x469   : > { %v1277_v6 = vpop.f32.mrb[12].mxu1 }
 0x46a   : > { %v1278_v7 = vadd.f32 %v1277_v6, %v881_v50  ;;  %v1837_v8 = vpop.f32.mrb[13].mxu1 }
 0x46b   : > { %v1280_v9 = vpop.f32.mrb[14].mxu1 }
 0x46c   : > { %v1838_v10 = vpop.f32.mrb[15].mxu1  ;;  %v1283_v11 = vsel %vm930_vm6, %v1278_v7, -inf }
 0x46d   : > { %1284 = vmax.xlane.f32.xlu0 %v1283_v11 }
 0x478   : > { %v933_v12 = vpop.xlane.xlu0 %932 }
 0x479   : > { %v934_v13 = vsub.f32 %v925_v52, %v933_v12 }
 0x47b   : > { %v935_v14 = vmul.f32 1.442695, %v934_v13 }
 0x47d   : > { %2046 = vpow2.f32 %v935_v14 }
 0x487   : > { %v2047_v15 = vpop.eup %2046 }
 0x488   : > { %v937_v16 = vsel %vm930_vm6, %v2047_v15, 0.0 }
 0x489   : > { %938 = vadd.xlane.f32.xlu1 %v937_v16 }
 0x49a   : > { %1058 = vrot.lane.b32.xlu1 %v990_v57, %s2478_s5  ;;  %s3327_s5 = sld [smem:[#allocation32_spill]] }
 0x4ea   : > { %v1045_v17 = vpop.xlane.xlu1 %1044 }
 0x4eb   : > { %v1046_v18 = vsub.f32 %v1038_v59, %v1045_v17 }
 0x4ed   : > { %v1047_v19 = vmul.f32 1.442695, %v1046_v18 }
 0x4ef   : > { %2048 = vpow2.f32 %v1047_v19 }
 0x4f2   : > { %v1165_v20 = vpop.xlane.xlu0 %1164 }
 0x4f3   : > { %v1166_v21 = vsub.f32 %v1158_v1, %v1165_v20 }
 0x4f5   : > { %v1167_v22 = vmul.f32 1.442695, %v1166_v21 }
 0x4f7   : > { %2050 = vpow2.f32 %v1167_v22 }
 0x4f9   : > { %v2049_v23 = vpop.eup %2048 }
 0x4fa   : > { %v1285_v25 = vpop.xlane.xlu0 %1284  ;;  %v1049_v26 = vsel %vm930_vm6, %v2049_v23, 0.0 }
 0x4fb   : > { %v1286_v27 = vsub.f32 %v1278_v7, %v1285_v25  ;;  %1050 = vadd.xlane.f32.xlu0 %v1049_v26 }
 0x4fd   : > { %v1287_v28 = vmul.f32 1.442695, %v1286_v27 }
 0x4ff   : > { %2052 = vpow2.f32 %v1287_v28 }
 0x501   : > { %v2051_v29 = vpop.eup %2050 }
 0x502   : > { %v1169_v30 = vsel %vm930_vm6, %v2051_v29, 0.0 }
 0x503   : > { %1170 = vadd.xlane.f32.xlu1 %v1169_v30 }
 0x509   : > { %v2053_v31 = vpop.eup %2052 }
 0x50a   : > { %v1289_v32 = vsel %vm930_vm6, %v2053_v31, 0.0 }
 0x50b   : > { %1290 = vadd.xlane.f32.xlu0 %v1289_v32 }
 0x514   : > { %1298 = vrot.lane.b32.xlu1 %v990_v57, %s2480_s26 }
 0x516   : > { %v939_v33 = vpop.xlane.xlu1 %938 }
 0x517   : > { %2054 = vrcp.f32 %v939_v33 }
 0x51a   : > { %v1059_v37 = vpop.permute.xlu1 %1058 }
 0x521   : > { %v2055_v34 = vpop.eup %2054  ;;  %1178 = vrot.lane.b32.xlu0 %v990_v57, %s2479_s19  ;;  %s1739_s19 = sshll.u32 %s3326_s14, 3 }
 0x522   : > { %v941_v35 = vmul.f32 %v2055_v34, %v2047_v15  ;;  %s1451_s26 = sadd.s32 %s3327_s5, %s1739_s19 }
 0x523   : > { %s1740_s22 = sshll.u32 %s1451_s26, 6 }
 0x524   : > { %v942_v36 = vpack.c.bf16 %v941_v35, %v941_v35  ;;  %s3095_s27 = scalar_lea.hbm %s3328_s15, %s1740_s22 }
 0x526   : > { %944 = vst.msk [vmem:[%s2987_s20] sm:$0xf] %vm943_vm7, %v942_v36  ;;  %1806 = vmatmul.mubr.msk.bf16.vlgmr.msra.gmra.mrb[4].mxu0 %vm930_vm6, %v942_v36 }
 0x527   : > { %1816 = vmatpush3.bf16.msra.mxu0 %v1059_v37  ;;  %1817 = vmatprep.mubr.msk.bf16.mxu0 %vm2477_vm2, %v2476_v24 }
 0x528   : > { %1827 = vmatprep.subr.bf16.mxu0 %v2476_v24 }
 0x588   : > { %v1051_v38 = vpop.xlane.xlu0 %1050 }
 0x589   : > { %2056 = vrcp.f32 %v1051_v38 }
 0x590   : > { %v1171_v39 = vpop.xlane.xlu1 %1170 }
 0x591   : > { %2058 = vrcp.f32 %v1171_v39 }
 0x593   : > { %v2057_v40 = vpop.eup %2056 }
 0x594   : > { %v1053_v41 = vmul.f32 %v2057_v40, %v2049_v23  ;;  %v1299_v48 = vpop.permute.xlu1 %1298 }
 0x596   : > { %v1054_v42 = vpack.c.bf16 %v1053_v41, %v1053_v41 }
 0x598   : > { %1723 = vst.msk [vmem:[%s2987_s20 + $0x4] sm:$0xf] %vm943_vm7, %v1054_v42  ;;  %1818 = vmatmul.mubr.msk.bf16.vlgmr.msra.gmra.mrb[8].mxu0 %vm930_vm6, %v1054_v42  ;;  %v1291_v43 = vpop.xlane.xlu0 %1290 }
 0x599   : > { %2060 = vrcp.f32 %v1291_v43  ;;  %1829 = vmatprep.mubr.msk.bf16.mxu0 %vm2477_vm2, %v2476_v24 }
 0x59b   : > { %v2059_v44 = vpop.eup %2058 }
 0x59c   : > { %v1173_v45 = vmul.f32 %v2059_v44, %v2051_v29  ;;  %v1179_v46 = vpop.permute.xlu0 %1178 }
 0x59d   : > { %1828 = vmatpush3.bf16.msra.mxu0 %v1179_v46 }
 0x59e   : > { %v1174_v47 = vpack.c.bf16 %v1173_v45, %v1173_v45  ;;  %1839 = vmatprep.subr.bf16.mxu0 %v2476_v24 }
 0x5a0   : > { %1726 = vst.msk [vmem:[%s2987_s20 + $0x8] sm:$0xf] %vm943_vm7, %v1174_v47  ;;  %1830 = vmatmul.mubr.msk.bf16.vlgmr.msra.gmra.mrb[12].mxu0 %vm930_vm6, %v1174_v47 }
 0x5a1   : > { %1840 = vmatpush3.bf16.msra.mxu0 %v1299_v48  ;;  %1841 = vmatprep.mubr.msk.bf16.mxu0 %vm2477_vm2, %v2476_v24 }
 0x5a3   : > { %v2061_v49 = vpop.eup %2060 }
 0x5a4   : > { %v1293_v50 = vmul.f32 %v2061_v49, %v2053_v31 }
 0x5a6   : > { %v1294_v51 = vpack.c.bf16 %v1293_v50, %v1293_v50 }
 0x5a8   : > { %1729 = vst.msk [vmem:[%s2987_s20 + $0xc] sm:$0xf] %vm943_vm7, %v1294_v51  ;;  %1842 = vmatmul.mubr.msk.bf16.vlgmr.msra.gmra.mrb[16].mxu0 %vm930_vm6, %v1294_v51 }
 0x5f9   : > { %v982_v52 = vpop.f32.mrb[4].mxu0 }
 0x5fa   : > { %988 = vst.msk [vmem:[#allocation4] sm:$0xff] %vm883_vm3, %v982_v52  ;;  %v1807_v53 = vpop.f32.mrb[5].mxu0 }
 0x5fb   : > { %v985_v54 = vpop.f32.mrb[6].mxu0 }
 0x5fc   : > { %v1808_v55 = vpop.f32.mrb[7].mxu0 }
 0x66b   : > { %v1098_v56 = vpop.f32.mrb[8].mxu0 }
 0x66c   : > { %1105 = vrot.lane.b32.xlu1 %v1098_v56, %s2481_s25  ;;  %v1819_v57 = vpop.f32.mrb[9].mxu0 }
 0x66d   : > { %v1101_v58 = vpop.f32.mrb[10].mxu0 }
 0x66e   : > { %v1820_v59 = vpop.f32.mrb[11].mxu0 }
 0x673   : > { %v1218_v62 = vpop.f32.mrb[12].mxu0 }
 0x674   : > { %1225 = vrot.lane.b32.xlu0 %v1218_v62, %s2482_s1  ;;  %v1831_v63 = vpop.f32.mrb[13].mxu0  ;;  %s2292_s1 = scalar_lea.vmem %s3097_s28, 256 }
 0x675   : > { %v1221_v0 = vpop.f32.mrb[14].mxu0  ;;  %p2293_p3 = scmp.ne.s32.totalorder %s3097_s28, %s2292_s1 }
 0x676   : > { %v1832_v1 = vpop.f32.mrb[15].mxu0 }
 0x677   : > { %p2294_p7 = pnand %p2293_p3, %p3330_p9 }
 0x679   : > { %p2295_p10 = pneg %p2294_p7 }
 0x67b   : > { %v1338_v2 = vpop.f32.mrb[16].mxu0 }
 0x67c   : > { %1345 = vrot.lane.b32.xlu1 %v1338_v2, %s2483_s8  ;;  %v1843_v3 = vpop.f32.mrb[17].mxu0  ;;  %s2484_s8 = smov [#allocation20]  }
 0x67d   : > { %v1341_v4 = vpop.f32.mrb[18].mxu0  ;;  %s2296_s19 = sshll.u32 %s2484_s8, 4  ;;  %s2297_s19 = int_to_ptr.vmem [resolvable:$false] %s2296_s19 }
 0x67e   : > { %v1844_v5 = vpop.f32.mrb[19].mxu0  ;;  %s2298_s20 = scalar_lea.vmem %s2297_s19, 512  ;;  %p2299_p4 = scmp.lt.s32.totalorder %s3097_s28, %s2297_s19 }
 0x67f   : > { %p2300_p5 = scmp.lt.s32.totalorder %s2298_s20, %s2292_s1 }
 0x681   : > { %p2301_p1 = por %p2300_p5, %p2299_p4 }
 0x683   : > { %p2302_p12 = pnand %p2301_p1, %p2295_p10 }
 0x6de   : > { %v1106_v6 = vpop.permute.xlu1 %1105 }
 0x6df   : > { %1109 = vst.msk [vmem:[#allocation4] sm:$0xff] %vm1108_vm8, %v1106_v6 }
 0x6e6   : > { %v1226_v24 = vpop.permute.xlu0 %1225 }
 0x6e7   : > { %1229 = vst.msk [vmem:[#allocation4] sm:$0xff] %vm1228_vm9, %v1226_v24 }
 0x6ee   : > { %v1346_v7 = vpop.permute.xlu1 %1345 }
 0x6ef   : > { %1349 = vst.msk [vmem:[#allocation4] sm:$0xff] %vm1348_vm10, %v1346_v7 }
 0x6f6   : > { %v1350_v8 = vld [vmem:[#allocation4] sm:$0xff] }
 0x6f7   : > { %v1351_v9 = vpack.c.bf16 %v1350_v8, %v1350_v8 }
 0x6f9   : > { %1850 = vmatmul.mubr.msk.bf16.vlgmr.msra.gmra.mrb[16].mxu1 %vm827_vm4, %v1351_v9 }
 0x6fa   : > { %2305 = shalt.err (!%p2302_p12)
}
 0x6fb   : > { %s2306_s26 = scalar_lea.hbm %s3095_s27, 256  ;;  %s2310_s25 = scalar_lea.hbm %s3329_s6, 1024 }
 0x6fc   : > { %p2307_p8 = scmp.ne.s32.totalorder %s3095_s27, %s2306_s26  ;;  %p2311_p2 = scmp.lt.u32.totalorder %s3095_s27, %s3329_s6 }
 0x6fd   : > { %p2312_p6 = scmp.lt.u32.totalorder %s2310_s25, %s2306_s26  ;;  %p2314_p3 = scmp.lt.u32.totalorder %s2306_s26, %s3095_s27 }
 0x6fe   : > { %p2308_p11 = pnand %p2307_p8, %p3330_p9 }
 0x6ff   : > { %p2313_p0 = por %p2312_p6, %p2311_p2 }
 0x700   : > { %p2309_p13 = pneg %p2308_p11 }
 0x701   : > { %p2315_p7 = por %p2314_p3, %p2313_p0 }
 0x703   : > { %p2316_p10 = pnand %p2315_p7, %p2309_p13 }
 0x705   : > { %2319 = shalt.err (!%p2316_p10)
}
 0x706   : > { %s2485_s1 = smov 64   ;;  %s2486_s19 = smov 128  }
 0x707   : > { %s2487_s20 = smov 4   ;;  %s1737_s22 = sshll.u32 %s3326_s14, 1 }
 0x708   : > { %1880 = dma.vmem_to_hbm [thread:$0]  (%p3330_p9), %s3097_s28, 256, %s3095_s27, %s1425_s7, %s2485_s1, %s2486_s19, %s2487_s20  }
 0x709   : > { %s1436_s26 = sadd.s32 %s3327_s5, %s1737_s22  ;;  %s3331_s15 = sld [smem:[#allocation50_spill]] }
 0x70a   : > { %s1738_s8 = sshll.u32 %s1436_s26, 7  ;;  %s1440_s2 = sshll.u32 %s2985_s24, 4  ;;  %s3134_s2 = int_to_ptr.vmem [resolvable:$true] %s1440_s2 }
 0x70b   : > { %s3332_s11 = sld [smem:[#allocation51_spill]]  ;;  %s1420_s14 = scalar_lea.sflag [#allocation7], %s2943_s0 }
 0x70c   : > { %s2320_s5 = scalar_lea.vmem %s3134_s2, 128  ;;  %s2488_s28 = smov [#allocation19]  }
 0x70d   : > { %p2321_p4 = scmp.ne.s32.totalorder %s3134_s2, %s2320_s5  ;;  %s2324_s27 = sshll.u32 %s2488_s28, 4  ;;  %s2325_s27 = int_to_ptr.vmem [resolvable:$false] %s2324_s27 }
 0x70e   : > { %s2326_s9 = scalar_lea.vmem %s2325_s27, 256  ;;  %p2327_p12 = scmp.lt.s32.totalorder %s3134_s2, %s2325_s27 }
 0x70f   : > { %v1731_v10 = vld [vmem:[%s3331_s15] ss:$0 sm:$0xff]  ;;  %p2322_p5 = pnand %p2321_p4, %p3330_p9  ;;  %p2328_p8 = scmp.lt.s32.totalorder %s2326_s9, %s2320_s5 }
 0x711   : > { %s3132_s21 = scalar_lea.hbm %s3332_s11, %s1738_s8  ;;  %p2323_p1 = pneg %p2322_p5 }
 0x712   : > { %p2329_p11 = por %p2328_p8, %p2327_p12 }
 0x714   : > { %p2330_p13 = pnand %p2329_p11, %p2323_p1 }
 0x7cc   : > { %v1412_v11 = vpop.f32.mrb[16].mxu1 }
 0x7cd   : > { %v1413_v12 = vadd.f32 %v1731_v10, %v1412_v11  ;;  %v1851_v13 = vpop.f32.mrb[17].mxu1 }
 0x7ce   : > { %v1415_v14 = vpop.f32.mrb[18].mxu1 }
 0x7cf   : > { %1418 = vst.msk [vmem:[%s2985_s24] sm:$0xff] %vm827_vm4, %v1413_v12  ;;  %v1852_v15 = vpop.f32.mrb[19].mxu1 }
 0x7d0   : > { %2333 = shalt.err (!%p2330_p13)
}
 0x7d1   : > { %s2334_s0 = scalar_lea.hbm %s3132_s21, 128  ;;  %s2338_s7 = scalar_lea.hbm %s3332_s11, 512 }
 0x7d2   : > { %p2335_p2 = scmp.ne.s32.totalorder %s3132_s21, %s2334_s0  ;;  %p2339_p3 = scmp.lt.u32.totalorder %s3132_s21, %s3332_s11 }
 0x7d3   : > { %p2340_p7 = scmp.lt.u32.totalorder %s2338_s7, %s2334_s0  ;;  %p2342_p4 = scmp.lt.u32.totalorder %s2334_s0, %s3132_s21 }
 0x7d4   : > { %p2336_p6 = pnand %p2335_p2, %p3330_p9 }
 0x7d5   : > { %p2341_p10 = por %p2340_p7, %p2339_p3 }
 0x7d6   : > { %p2337_p0 = pneg %p2336_p6 }
 0x7d7   : > { %p2343_p5 = por %p2342_p4, %p2341_p10 }
 0x7d9   : > { %p2344_p1 = pnand %p2343_p5, %p2337_p0 }
 0x7db   : > { %2347 = shalt.err (!%p2344_p1)
}
 0x7dc   : > { %1879 = dma.vmem_to_hbm [thread:$0]  (%p3330_p9), %s3134_s2, 128, %s3132_s21, %s1420_s14  }
 0x7dd PF: > { %s3333_s20 = sld [smem:[#allocation31_spill]]  ;;  %p1927_p12 = scmp.ge.s32.totalorder %s2462_s18, 2 }
 0x7de   : > { %p3334_p8 = scmp.ne.s32.totalorder %s3299_s3, 0 }
 0x7e0   : > { %p1910_p11 = pnand %p1927_p12, %p3334_p8 }
 0x7e3   : > { %s1469_s22 = sand.u32 1, %s3333_s20  }
 0x7e4   : > { %s1470_s26 = scalar_lea.sflag [#allocation7], %s1469_s22 }
 0x7e5   : > { %2413 = dma.done.wait (!%p1910_p11), %s1470_s26, 128  }
 0x7e6   : > { %2415 = vsyncadd (!%p1910_p11), %s1470_s26, 4294967168  ;;  %s1479_s13 = scalar_lea.sflag [#allocation21], %s1469_s22 }
 0x7e7   : > { %2417 = dma.done.wait (!%p1910_p11), %s1479_s13, 256  }
 0x7e8   : > { %2419 = vsyncadd (!%p1910_p11), %s1479_s13, 4294967040  ;;  %s39_s18 = sadd.s32 1, %s2462_s18   ;;  %s3335_s25 = sld [smem:[#allocation29_spill]] }
 0x7e9   : > { %p36_p13 = scmp.ge.s32.totalorder %s39_s18, 6   ;;  %s3336_s26 = sld [smem:[#allocation30_spill]] }
 0x7ea   : > { %s3337_s2 = sld [smem:[#allocation38_spill]]  ;;  %s3338_s27 = smov %s3353_s4 }
 0x7eb   : > { %s3339_s28 = smov %s2438_s29  ;;  %s3340_s29 = smov %s2442_s30 }
 0x7ec   : > { %s3341_s30 = smov %s2861_s12  ;;  %s3342_s14 = smov %s2454_s16 }
 0x7ed   : > { %s3343_s15 = smov %s2458_s17  ;;  %s3344_s16 = smov %s3347_s23 }
 0x7ee   :  { %38 = sbr.rel (!%p36_p13) target bundleno = 31 (0x1f), region = 184 }
 0x7f0   : > { %s3345_s17 = smov %s3337_s2 }
 0x7f5   :  { %1484 = vsyncpa [#allocation6], 1 }
 0x7f6   :  { %1486 = vsyncpa [#allocation6 + $0x1], 1 }
 0x7f7   :  { %1487 = vsyncpa [#allocation9], 1 }
 0x7f8   :  { %1489 = vsyncpa [#allocation9 + $0x1], 1 }
 0x7f9   :  { %1490 = vsyncpa [#allocation12], 1 }
 0x7fa   :  { %1491 = vsyncpa [#allocation15], 1 }
 0x7fb   :  { %1492 = vsyncpa [#allocation18], 1 }
 0x7fc   :  { %1493 = vsyncpa [#allocation7], 1 }
 0x7fd   :  { %1495 = vsyncpa [#allocation7 + $0x1], 1 }
 0x7fe   :  { %1496 = vsyncpa [#allocation21], 1 }
 0x7ff   :  { %1498 = vsyncpa [#allocation21 + $0x1], 1 }

// kernel: tpu_custom_call.1
= control target key start
LH: loop header
LB: loop body
LE: loop exit
PB: predicated region body
PF: predicated region fallthrough
CT: control target
= control target key end

     0   :  { %s3197_s0 = inlined_call_operand.hbm [shape: bf16[2,16,32], index: 0, kind: input, shape index: {}]   ;;  %s3198_s1 = inlined_call_operand.hbm [shape: bf16[2,16,32], index: 1, kind: input, shape index: {}]   ;;  %s3199_s2 = inlined_call_operand.hbm [shape: bf16[2,16,32], index: 2, kind: input, shape index: {}]   ;;  %s3200_s3 = inlined_call_operand.vmem [shape: f32[2,1,16], index: 3, kind: input, shape index: {}]   ;;  %s3201_s4 = inlined_call_operand.hbm [shape: bf16[32,32], index: 4, kind: input, shape index: {}]   ;;  %s3202_s5 = inlined_call_operand.hbm [shape: f32[1,32], index: 5, kind: input, shape index: {}]   ;;  %s3203_s6 = inlined_call_operand.vmem [shape: bf16[32,32], index: 6, kind: input, shape index: {}]   ;;  %s3204_s7 = inlined_call_operand.hbm [shape: f32[1,32], index: 7, kind: input, shape index: {}]   ;;  %s3205_s8 = inlined_call_operand.hbm [shape: bf16[32,32], index: 8, kind: input, shape index: {}]   ;;  %s3206_s9 = inlined_call_operand.hbm [shape: f32[1,32], index: 9, kind: input, shape index: {}]   ;;  %s3207_s10 = inlined_call_operand.vmem [shape: bf16[32,32], index: 10, kind: input, shape index: {}]   ;;  %s3208_s11 = inlined_call_operand.vmem [shape: f32[1,32], index: 11, kind: input, shape index: {}]   ;;  %s3209_s12 = inlined_call_operand.hbm [shape: f32[2,16,32], index: 12, kind: output, shape index: {0}]   ;;  %s3210_s13 = inlined_call_operand.hbm [shape: bf16[2,4,16,16], index: 13, kind: output, shape index: {1}]  }
   0x1   :  { %3252 = sst [smem:[#allocation39_spill]] %s3197_s0 }
   0x2   :  { %3253 = sst [smem:[#allocation40_spill]] %s3198_s1 }
   0x3   :  { %3254 = sst [smem:[#allocation41_spill]] %s3199_s2 }
   0x4   :  { %3255 = sst [smem:[#allocation42_spill]] %s3200_s3 }
   0x5   :  { %3256 = sst [smem:[#allocation43_spill]] %s3201_s4 }
   0x6   :  { %3257 = sst [smem:[#allocation44_spill]] %s3202_s5 }
   0x7   :  { %3258 = sst [smem:[#allocation45_spill]] %s3203_s6 }
   0x8   :  { %3259 = sst [smem:[#allocation46_spill]] %s3204_s7 }
   0x9   :  { %3260 = sst [smem:[#allocation47_spill]] %s3205_s8 }
   0xa   :  { %3261 = sst [smem:[#allocation48_spill]] %s3206_s9 }
   0xb   :  { %3262 = sst [smem:[#allocation49_spill]] %s3207_s10 }
   0xc   :  { %3263 = sst [smem:[#allocation50_spill]] %s3208_s11 }
   0xd   :  { %3264 = sst [smem:[#allocation51_spill]] %s3209_s12 }
   0xe   :  { %3265 = sst [smem:[#allocation52_spill]] %s3210_s13 }
   0xf   :  { %19 = vsyncpa [#allocation6], 0 }
  0x10   :  { %21 = vsyncpa [#allocation6 + $0x1], 0 }
  0x11   :  { %22 = vsyncpa [#allocation9], 0 }
  0x12   :  { %24 = vsyncpa [#allocation9 + $0x1], 0 }
  0x13   :  { %25 = vsyncpa [#allocation12], 0 }
  0x14   :  { %26 = vsyncpa [#allocation15], 0 }
  0x15   :  { %27 = vsyncpa [#allocation18], 0 }
  0x16   :  { %28 = vsyncpa [#allocation7], 0 }
  0x17   :  { %30 = vsyncpa [#allocation7 + $0x1], 0 }
  0x18   :  { %31 = vsyncpa [#allocation21], 0 }
  0x19   :  { %33 = vsyncpa [#allocation21 + $0x1], 0  ;;  %s2559_s25 = smov 0   ;;  %s2561_s26 = smov 0  }
  0x1a   :  { %s2563_s27 = smov 0   ;;  %s2565_s28 = smov 0  }
  0x1b   :  { %s2567_s29 = smov 0   ;;  %s2569_s30 = smov 0  }
  0x1c   :  { %s2571_s14 = smov 0   ;;  %s2573_s15 = smov 0  }
  0x1d   :  { %s2575_s16 = smov 0   ;;  %s2577_s17 = smov 0  }
  0x1e   :  { %s2579_s18 = smov 0  }
  0x1f LB: > { %3266 = sst [smem:[#allocation29_spill]] %s2426_s26  ;;  %s2615_s19 = sadd.s32 4294967295, %s2462_s18   ;;  %s2462_s18 = sphi %s2579_s18, %s39_s18   ;;  %s2458_s17 = sphi %s2577_s17, %s3345_s17   ;;  %s2454_s16 = sphi %s2575_s16, %s3344_s16   ;;  %s2450_s15 = sphi %s2573_s15, %s3343_s15   ;;  %s2446_s14 = sphi %s2571_s14, %s3342_s14   ;;  %s2442_s30 = sphi %s2569_s30, %s3341_s30   ;;  %s2438_s29 = sphi %s2567_s29, %s3340_s29   ;;  %s2434_s28 = sphi %s2565_s28, %s3339_s28   ;;  %s2430_s27 = sphi %s2563_s27, %s3338_s27   ;;  %s2426_s26 = sphi %s2561_s26, %s3336_s26   ;;  %s2422_s25 = sphi %s2559_s25, %s3335_s25  }
  0x20   : > { %3267 = sst [smem:[#allocation30_spill]] %s2430_s27  ;;  %p1678_p0 = scmp.ge.s32.totalorder %s2462_s18, 1 }
  0x21   : > { %3268 = sst [smem:[#allocation31_spill]] %s2434_s28  ;;  %p3216_p1 = scmp.eq.s32.totalorder %s2615_s19, 0 }
  0x22   : > { %3269 = sst [smem:[#allocation32_spill]] %s2446_s14  ;;  %p386_p2 = scmp.lt.s32.totalorder %s2462_s18, 5 }
  0x23   : > { %3270 = sst [smem:[#allocation33_spill]] %s2450_s15  ;;  %s2464_s21 = smov [#allocation11]  }
  0x24   : > { %3271 = sst [smem:[#allocation34_spill]] %s2615_s19  ;;  %p2620_p3 = pnand %p1678_p0, %p386_p2 }
  0x25   : > { %s398_s22 = sshll.u32 %s2464_s21, 4  ;;  %s2465_s24 = smov [#allocation14]   ;;  %s399_s22 = int_to_ptr.vmem [resolvable:$true] %s398_s22 }
  0x26   : > { %s3272_s20 = scalar_select %p2620_p3, 1, 0 }
  0x27   : > { %p1883_p4 = pneg %p2620_p3  ;;  %s426_s12 = sshll.u32 %s2465_s24, 4  ;;  %s2632_s12 = int_to_ptr.vmem [resolvable:$true] %s426_s12 }
  0x28   : > { %3273 = sst [smem:[#allocation35_spill]] %s3272_s20  ;;  %s3275_s4 = sld [smem:[#allocation43_spill]] }
  0x29   : > { %p2628_p5 = pnand %p1883_p4, %p3216_p1 }
  0x2b   : > { %s3274_s23 = scalar_select %p2628_p5, 1, 0 }
  0x2c   : > { %p2642_p7 = pneg %p2628_p5 }
  0x2e   : > { %s2062_s10 = scalar_lea.hbm %s3275_s4, 256 }
  0x2f   : > { %p2063_p6 = scmp.ne.s32.totalorder %s3275_s4, %s2062_s10  ;;  %p2069_p10 = scmp.lt.u32.totalorder %s2062_s10, %s3275_s4 }
  0x31   : > { %p2065_p8 = pnand %p2642_p7, %p2063_p6 }
  0x33   : > { %p2066_p9 = pneg %p2065_p8 }
  0x35   : > { %p2071_p11 = pnand %p2069_p10, %p2066_p9 }
  0x37   : > { %2074 = shalt.err (!%p2071_p11)
}
  0x38   : > { %s2075_s11 = scalar_lea.vmem %s399_s22, 256  ;;  %p2083_p2 = scmp.lt.s32.totalorder %s399_s22, %s399_s22 }
  0x39   : > { %p2076_p12 = scmp.ne.s32.totalorder %s399_s22, %s2075_s11  ;;  %p2084_p4 = scmp.lt.s32.totalorder %s2075_s11, %s2075_s11 }
  0x3b   : > { %p2078_p13 = pnand %p2076_p12, %p2642_p7  ;;  %p2085_p1 = por %p2084_p4, %p2083_p2 }
  0x3d   : > { %p2079_p0 = pneg %p2078_p13 }
  0x3f   : > { %p2086_p3 = pnand %p2085_p1, %p2079_p0 }
  0x41   : > { %2089 = shalt.err (!%p2086_p3)
}
  0x42   : > { %s3223_s6 = smov 64   ;;  %s3225_s13 = smov 4  }
  0x43   : > { %1886 = dma.hbm_to_vmem [thread:$0]  (!%p2628_p5), %s3275_s4, 256, %s399_s22, [#allocation12], %s3223_s6, %s3223_s6, %s3225_s13  }
  0x44   : > { %s3277_s7 = sld [smem:[#allocation46_spill]] }
  0x4a   : > { %s2090_s15 = scalar_lea.hbm %s3277_s7, 16 }
  0x4b   : > { %p2091_p1 = scmp.ne.s32.totalorder %s3277_s7, %s2090_s15  ;;  %p2097_p8 = scmp.lt.u32.totalorder %s2090_s15, %s3277_s7 }
  0x4d   : > { %p2093_p3 = pnand %p2091_p1, %p2642_p7 }
  0x4f   : > { %p2094_p6 = pneg %p2093_p3 }
  0x51   : > { %p2099_p9 = pnand %p2097_p8, %p2094_p6 }
  0x53   : > { %2102 = shalt.err (!%p2099_p9)
}
  0x54   : > { %s2103_s22 = scalar_lea.vmem %s2632_s12, 16  ;;  %s2110_s20 = scalar_lea.vmem %s2632_s12, 32 }
  0x55   : > { %p2104_p10 = scmp.ne.s32.totalorder %s2632_s12, %s2103_s22  ;;  %p2111_p13 = scmp.lt.s32.totalorder %s2632_s12, %s2632_s12 }
  0x56   : > { %p2112_p0 = scmp.lt.s32.totalorder %s2110_s20, %s2103_s22 }
  0x57   : > { %p2106_p11 = pnand %p2104_p10, %p2642_p7 }
  0x58   : > { %p2113_p2 = por %p2112_p0, %p2111_p13 }
  0x59   : > { %p2107_p12 = pneg %p2106_p11 }
  0x5b   : > { %p2114_p4 = pnand %p2113_p2, %p2107_p12 }
  0x5d   : > { %2117 = shalt.err (!%p2114_p4)
}
  0x5e   : > { %1892 = dma.hbm_to_vmem [thread:$0]  (!%p2628_p5), %s3277_s7, 16, %s2632_s12, [#allocation15]  }
  0x5f   : > { %p3228_p1 = scmp.eq.s32.totalorder %s2462_s18, 0  ;;  %p93_p3 = scmp.ne.s32.totalorder %s2430_s27, %s2426_s26 }
  0x60   : > { %p99_p6 = scmp.ne.s32.totalorder %s2426_s26, %s2422_s25  ;;  %p3227_p8 = scmp.lt.s32.totalorder %s2462_s18, 4 }
  0x61   : > { %p95_p9 = por %p93_p3, %p3228_p1  ;;  %s487_s15 = sand.u32 1, %s2462_s18  }
  0x62   : > { %p3278_p10 = scmp.eq.s32.totalorder %s2615_s19, 0  ;;  %s489_s10 = sand.u32 1, %s2430_s27  }
  0x63   : > { %s3222_s14 = sshll.u32 %s2458_s17, 7  ;;  %s2702_s24 = sshll.u32 %s489_s10, 3 }
  0x64   : > { %p2696_p11 = por %p99_p6, %p3278_p10  ;;  %s3281_s1 = sld [smem:[#allocation40_spill]] }
  0x65   : > { %p2713_p12 = pnand %p3227_p8, %p95_p9  ;;  %s491_s20 = scalar_lea.vmem [#allocation8], %s2702_s24 }
  0x66   : > { %s3279_s3 = scalar_select %p2696_p11, 1, 0 }
  0x67   : > { %s3282_s25 = scalar_select %p2713_p12, 1, 0 }
  0x68   : > { %3280 = sst [smem:[#allocation36_spill]] %s3279_s3  ;;  %s498_s0 = sshll.u32 %s491_s20, 4  ;;  %s2718_s0 = int_to_ptr.vmem [resolvable:$true] %s498_s0 }
  0x69   : > { %3283 = sst [smem:[#allocation37_spill]] %s3282_s25  ;;  %s2720_s28 = scalar_lea.sflag [#allocation9], %s487_s15 }
  0x6a   : > { %s2709_s12 = scalar_lea.hbm %s3281_s1, %s3222_s14  ;;  %p3242_p0 = pneg %p2713_p12 }
  0x6b   : > { %s2118_s10 = scalar_lea.hbm %s2709_s12, 128  ;;  %s2123_s14 = scalar_lea.hbm %s3281_s1, 256 }
  0x6c   : > { %p2119_p13 = scmp.ne.s32.totalorder %s2709_s12, %s2118_s10  ;;  %p2124_p3 = scmp.lt.u32.totalorder %s2709_s12, %s3281_s1 }
  0x6d   : > { %p2125_p6 = scmp.lt.u32.totalorder %s2123_s14, %s2118_s10  ;;  %p2127_p10 = scmp.lt.u32.totalorder %s2118_s10, %s2709_s12 }
  0x6e   : > { %p2121_p2 = pnand %p3242_p0, %p2119_p13 }
  0x6f   : > { %p2126_p9 = por %p2125_p6, %p2124_p3 }
  0x70   : > { %p2122_p4 = pneg %p2121_p2 }
  0x71   : > { %p2128_p8 = por %p2127_p10, %p2126_p9 }
  0x73   : > { %p2129_p1 = pnand %p2128_p8, %p2122_p4 }
  0x75   : > { %2132 = shalt.err (!%p2129_p1)
}
  0x76   : > { %s2133_s15 = scalar_lea.vmem %s2718_s0, 128  ;;  %s2468_s20 = smov [#allocation8]  }
  0x77   : > { %p2134_p13 = scmp.ne.s32.totalorder %s2718_s0, %s2133_s15  ;;  %s2138_s11 = sshll.u32 %s2468_s20, 4  ;;  %s2139_s11 = int_to_ptr.vmem [resolvable:$false] %s2138_s11 }
  0x78   : > { %s2140_s6 = scalar_lea.vmem %s2139_s11, 256  ;;  %p2141_p5 = scmp.lt.s32.totalorder %s2718_s0, %s2139_s11 }
  0x79   : > { %p2136_p2 = pnand %p2134_p13, %p3242_p0  ;;  %p2142_p3 = scmp.lt.s32.totalorder %s2140_s6, %s2133_s15 }
  0x7b   : > { %p2137_p11 = pneg %p2136_p2  ;;  %p2143_p6 = por %p2142_p3, %p2141_p5 }
  0x7d   : > { %p2144_p9 = pnand %p2143_p6, %p2137_p11 }
  0x7f   : > { %2147 = shalt.err (!%p2144_p9)
}
  0x80   : > { %s3284_s13 = smov 4   ;;  %s3285_s14 = smov 64  }
  0x81   : > { %1905 = dma.hbm_to_vmem [thread:$0]  (!%p2713_p12), %s2709_s12, 128, %s2718_s0, %s2720_s28, %s3285_s14, %s3285_s14, %s3284_s13  }
  0x82   : > { %s3286_s10 = sshll.u32 %s2458_s17, 7  ;;  %s3287_s2 = sld [smem:[#allocation41_spill]] }
  0x83   : > { %s512_s11 = scalar_lea.vmem [#allocation10], %s2702_s24  ;;  %s2469_s1 = smov [#allocation13]  }
  0x84   : > { %s2759_s6 = sshll.u32 %s512_s11, 4  ;;  %s412_s4 = sshll.u32 %s2469_s1, 4  ;;  %s413_s4 = int_to_ptr.vmem [resolvable:$true] %s412_s4  ;;  %s2819_s6 = int_to_ptr.vmem [resolvable:$true] %s2759_s6 }
  0x85   : > { %s2470_s7 = smov [#allocation16]   ;;  %s3288_s5 = sld [smem:[#allocation44_spill]] }
  0x86   : > { %s436_s3 = sshll.u32 %s2470_s7, 4  ;;  %s437_s3 = int_to_ptr.vmem [resolvable:$true] %s436_s3 }
  0x88   : > { %s2756_s15 = scalar_lea.hbm %s3287_s2, %s3286_s10 }
  0x8b   : > { %s2148_s19 = scalar_lea.hbm %s3288_s5, 16 }
  0x8c   : > { %p2149_p5 = scmp.ne.s32.totalorder %s3288_s5, %s2148_s19  ;;  %p2155_p11 = scmp.lt.u32.totalorder %s2148_s19, %s3288_s5 }
  0x8e   : > { %p2151_p1 = pnand %p2149_p5, %p2642_p7 }
  0x90   : > { %p2152_p8 = pneg %p2151_p1 }
  0x92   : > { %p2157_p4 = pnand %p2155_p11, %p2152_p8 }
  0x94   : > { %2160 = shalt.err (!%p2157_p4)
}
  0x95   : > { %s2161_s1 = scalar_lea.vmem %s413_s4, 16  ;;  %s2168_s7 = scalar_lea.vmem %s413_s4, 32 }
  0x96   : > { %p2162_p10 = scmp.ne.s32.totalorder %s413_s4, %s2161_s1  ;;  %p2169_p3 = scmp.lt.s32.totalorder %s413_s4, %s413_s4 }
  0x97   : > { %p2170_p6 = scmp.lt.s32.totalorder %s2168_s7, %s2161_s1 }
  0x98   : > { %p2164_p13 = pnand %p2162_p10, %p2642_p7 }
  0x99   : > { %p2171_p9 = por %p2170_p6, %p2169_p3 }
  0x9a   : > { %p2165_p2 = pneg %p2164_p13 }
  0x9c   : > { %p2172_p0 = pnand %p2171_p9, %p2165_p2 }
  0x9e   : > { %2175 = shalt.err (!%p2172_p0)
}
  0x9f   : > { %p3289_p5 = scmp.ne.s32.totalorder %s3274_s23, 0  ;;  %s3290_s8 = sld [smem:[#allocation47_spill]] }
  0xa1   : > { %1889 = dma.hbm_to_vmem [thread:$0]  (!%p3289_p5), %s3288_s5, 16, %s413_s4, [#allocation12]  }
  0xa5   : > { %s2176_s10 = scalar_lea.hbm %s3290_s8, 256 }
  0xa6   : > { %p2177_p1 = scmp.ne.s32.totalorder %s3290_s8, %s2176_s10  ;;  %p2183_p0 = scmp.lt.u32.totalorder %s2176_s10, %s3290_s8 }
  0xa8   : > { %p2179_p8 = pnand %p2177_p1, %p2642_p7 }
  0xaa   : > { %p2180_p11 = pneg %p2179_p8 }
  0xac   : > { %p2185_p4 = pnand %p2183_p0, %p2180_p11 }
  0xae   : > { %2188 = shalt.err (!%p2185_p4)
}
  0xaf   : > { %s2189_s0 = scalar_lea.vmem %s437_s3, 256  ;;  %p2197_p3 = scmp.lt.s32.totalorder %s437_s3, %s437_s3 }
  0xb0   : > { %p2190_p10 = scmp.ne.s32.totalorder %s437_s3, %s2189_s0  ;;  %p2198_p6 = scmp.lt.s32.totalorder %s2189_s0, %s2189_s0 }
  0xb2   : > { %p2192_p13 = pnand %p2190_p10, %p2642_p7  ;;  %p2199_p9 = por %p2198_p6, %p2197_p3 }
  0xb4   : > { %p2193_p2 = pneg %p2192_p13 }
  0xb6   : > { %p2200_p12 = pnand %p2199_p9, %p2193_p2 }
  0xb8   : > { %2203 = shalt.err (!%p2200_p12)
}
  0xb9   : > { %1895 = dma.hbm_to_vmem [thread:$0]  (!%p3289_p5), %s3290_s8, 256, %s437_s3, [#allocation15], %s3285_s14, %s3285_s14, %s3284_s13  }
  0xba   : > { %s2471_s1 = smov [#allocation17]   ;;  %s3291_s9 = sld [smem:[#allocation48_spill]] }
  0xbb   : > { %s450_s7 = sshll.u32 %s2471_s1, 4  ;;  %s451_s7 = int_to_ptr.vmem [resolvable:$true] %s450_s7 }
  0xc0   : > { %s2204_s19 = scalar_lea.hbm %s3291_s9, 16 }
  0xc1   : > { %p2205_p12 = scmp.ne.s32.totalorder %s3291_s9, %s2204_s19  ;;  %p2211_p11 = scmp.lt.u32.totalorder %s2204_s19, %s3291_s9 }
  0xc3   : > { %p2207_p1 = pnand %p2205_p12, %p2642_p7 }
  0xc5   : > { %p2208_p8 = pneg %p2207_p1 }
  0xc7   : > { %p2213_p0 = pnand %p2211_p11, %p2208_p8 }
  0xc9   : > { %2216 = shalt.err (!%p2213_p0)
}
  0xca   : > { %s2217_s3 = scalar_lea.vmem %s451_s7, 16  ;;  %s2224_s11 = scalar_lea.vmem %s451_s7, 32 }
  0xcb   : > { %p2218_p4 = scmp.ne.s32.totalorder %s451_s7, %s2217_s3  ;;  %p2225_p2 = scmp.lt.s32.totalorder %s451_s7, %s451_s7 }
  0xcc   : > { %p2226_p3 = scmp.lt.s32.totalorder %s2224_s11, %s2217_s3 }
  0xcd   : > { %p2220_p10 = pnand %p2218_p4, %p2642_p7 }
  0xce   : > { %p2227_p6 = por %p2226_p3, %p2225_p2 }
  0xcf   : > { %p2221_p13 = pneg %p2220_p10 }
  0xd1   : > { %p2228_p9 = pnand %p2227_p6, %p2221_p13 }
  0xd3   : > { %2231 = shalt.err (!%p2228_p9)
}
  0xd4   : > { %s3292_s21 = sld [smem:[#allocation31_spill]]  ;;  %s3293_s4 = sld [smem:[#allocation30_spill]] }
  0xd5   : > { %s3294_s24 = sld [smem:[#allocation34_spill]]  ;;  %s48_s23 = sadd.s32 1, %s2454_s16 }
  0xd6   : > { %1898 = dma.hbm_to_vmem [thread:$0]  (!%p3289_p5), %s3291_s9, 16, %s451_s7, [#allocation18]  }
  0xd7   : > { %p49_p7 = scmp.ge.s32.totalorder %s48_s23, 2  ;;  %s51_s1 = sadd.s32 1, %s2458_s17 }
  0xd8   : > { %s1677_s26 = sadd.s32 4294967294, %s2462_s18   ;;  %s60_s27 = sadd.s32 1, %s2442_s30 }
  0xd9   : > { %s3347_s23 = smov (%p49_p7, %s48_s23), 0  ;;  %s3349_s1 = smov (!%p49_p7, %s51_s1), %s2458_s17 }
  0xda   : > { %s56_s19 = ssub.s32 %s2454_s16, %s3347_s23  ;;  %p67_p12 = scmp.ne.s32.totalorder %s2442_s30, %s2438_s29 }
  0xdb   : > { %p53_p5 = scmp.ge.s32.totalorder %s3349_s1, 2  ;;  %p73_p1 = scmp.ne.s32.totalorder %s2438_s29, %s3292_s21 }
  0xdc   : > { %s86_s7 = sadd.s32 1, %s3293_s4  ;;  %p345_p8 = scmp.eq.s32.totalorder %s3294_s24, 3 }
  0xdd   : > { %s3351_s1 = smov (%p53_p5, %s3349_s1), 0  ;;  %p3296_p11 = scmp.eq.s32.totalorder %s3294_s24, 0 }
  0xde   : > { %3295 = sst [smem:[#allocation38_spill]] %s3351_s1  ;;  %p2847_p4 = por %p345_p8, %p67_p12 }
  0xdf   : > { %p2840_p0 = por %p3296_p11, %p73_p1  ;;  %s55_s22 = ssub.s32 %s2458_s17, %s3351_s1 }
  0xe0   : > { %s3298_s10 = scalar_select %p2847_p4, 1, 0 }
  0xe1   : > { %s3297_s25 = scalar_select %p2840_p0, 1, 0 }
  0xe2   : > { %p351_p10 = scmp.eq.s32.totalorder %s1677_s26, 3  ;;  %s57_s20 = sor.u32 %s56_s19, %s55_s22 }
  0xe3   : > { %p84_p13 = scmp.eq.s32.totalorder %s55_s22, 0  ;;  %p58_p2 = scmp.eq.s32.totalorder %s57_s20, 0 }
  0xe4   : > { %p2853_p3 = por %p351_p10, %p73_p1  ;;  %s3300_s11 = sld [smem:[#allocation37_spill]] }
  0xe5   : > { %s3353_s4 = smov (!%p84_p13, %s3293_s4), %s86_s7  ;;  %s467_s0 = sand.u32 1, %s2442_s30  }
  0xe6   : > { %s3299_s3 = scalar_select %p2853_p3, 1, 0 }
  0xe7   : > { %s2861_s12 = scalar_select %p58_p2, %s2442_s30, %s60_s27  }
  0xe8   : > { %s1686_s21 = sshll.u32 %s2458_s17, 1  ;;  %p3301_p6 = scmp.eq.s32.totalorder %s2462_s18, 0 }
  0xe9   : > { %s1685_s24 = sshll.u32 %s467_s0, 2  ;;  %s476_s26 = sadd.s32 %s2454_s16, %s1686_s21 }
  0xea   : > { %p69_p9 = por %p3301_p6, %p67_p12  ;;  %s1687_s19 = sshll.u32 %s476_s26, 6 }
  0xeb   : > { %s471_s22 = scalar_lea.vmem [#allocation5], %s1685_s24  ;;  %s3302_s9 = sld [smem:[#allocation39_spill]] }
  0xec   : > { %s480_s20 = sshll.u32 %s471_s22, 4  ;;  %p3303_p7 = scmp.lt.s32.totalorder %s2462_s18, 4  ;;  %s2878_s20 = int_to_ptr.vmem [resolvable:$true] %s480_s20 }
  0xed   : > { %s2232_s1 = scalar_lea.hbm %s2756_s15, 128  ;;  %p3305_p1 = scmp.ne.s32.totalorder %s3300_s11, 0 }
  0xee   : > { %p2882_p5 = pnand %p3303_p7, %p69_p9  ;;  %p2233_p12 = scmp.ne.s32.totalorder %s2756_s15, %s2232_s1 }
  0xef   : > { %p3306_p8 = pneg %p3305_p1  ;;  %s2237_s26 = scalar_lea.hbm %s3287_s2, 256 }
  0xf0   : > { %p2238_p13 = scmp.lt.u32.totalorder %s2756_s15, %s3287_s2  ;;  %p2239_p2 = scmp.lt.u32.totalorder %s2237_s26, %s2232_s1 }
  0xf1   : > { %s2876_s7 = scalar_lea.hbm %s3302_s9, %s1687_s19  ;;  %p2235_p11 = pnand %p2233_p12, %p3306_p8 }
  0xf2   : > { %p2240_p6 = por %p2239_p2, %p2238_p13  ;;  %p2241_p9 = scmp.lt.u32.totalorder %s2232_s1, %s2756_s15 }
  0xf3   : > { %p2236_p10 = pneg %p2235_p11 }
  0xf4   : > { %p2242_p7 = por %p2241_p9, %p2240_p6 }
  0xf6   : > { %p2243_p3 = pnand %p2242_p7, %p2236_p10 }
  0xf8   : > { %2246 = shalt.err (!%p2243_p3)
}
  0xf9   : > { %s2247_s19 = scalar_lea.vmem %s2819_s6, 128  ;;  %s2472_s22 = smov [#allocation10]  }
  0xfa   : > { %p2248_p12 = scmp.ne.s32.totalorder %s2819_s6, %s2247_s19  ;;  %s2252_s21 = sshll.u32 %s2472_s22, 4  ;;  %s2253_s21 = int_to_ptr.vmem [resolvable:$false] %s2252_s21 }
  0xfb   : > { %s2254_s24 = scalar_lea.vmem %s2253_s21, 256  ;;  %p2255_p0 = scmp.lt.s32.totalorder %s2819_s6, %s2253_s21 }
  0xfc   : > { %p2250_p11 = pnand %p2248_p12, %p3306_p8  ;;  %p2256_p13 = scmp.lt.s32.totalorder %s2254_s24, %s2247_s19 }
  0xfe   : > { %p2251_p4 = pneg %p2250_p11  ;;  %p2257_p2 = por %p2256_p13, %p2255_p0 }
 0x100   : > { %p2258_p6 = pnand %p2257_p2, %p2251_p4 }
 0x102   : > { %2261 = shalt.err (!%p2258_p6)
}
 0x103   : > { %1908 = dma.hbm_to_vmem [thread:$0]  (!%p3305_p1), %s2756_s15, 128, %s2819_s6, %s2720_s28, %s3285_s14, %s3285_s14, %s3284_s13  }
 0x104   : > { %s468_s1 = scalar_lea.sflag [#allocation6], %s467_s0  ;;  %s2262_s26 = scalar_lea.hbm %s2876_s7, 64 }
 0x105   : > { %p2263_p0 = scmp.ne.s32.totalorder %s2876_s7, %s2262_s26  ;;  %p2264_p4 = pneg %p2882_p5 }
 0x106   : > { %s2267_s8 = scalar_lea.hbm %s3302_s9, 256  ;;  %p2268_p9 = scmp.lt.u32.totalorder %s2876_s7, %s3302_s9 }
 0x107   : > { %p2265_p3 = pnand %p2264_p4, %p2263_p0  ;;  %p2269_p7 = scmp.lt.u32.totalorder %s2267_s8, %s2262_s26 }
 0x108   : > { %p2271_p12 = scmp.lt.u32.totalorder %s2262_s26, %s2876_s7 }
 0x109   : > { %p2266_p10 = pneg %p2265_p3  ;;  %p2270_p1 = por %p2269_p7, %p2268_p9 }
 0x10b   : > { %p2272_p8 = por %p2271_p12, %p2270_p1 }
 0x10d   : > { %p2273_p11 = pnand %p2272_p8, %p2266_p10 }
 0x10f   : > { %2276 = shalt.err (!%p2273_p11)
}
 0x110   : > { %s2277_s28 = scalar_lea.vmem %s2878_s20, 64  ;;  %s2473_s13 = smov [#allocation5]  }
 0x111   : > { %p2278_p13 = scmp.ne.s32.totalorder %s2878_s20, %s2277_s28  ;;  %s2282_s14 = sshll.u32 %s2473_s13, 4  ;;  %s2283_s14 = int_to_ptr.vmem [resolvable:$false] %s2282_s14 }
 0x112   : > { %s2284_s15 = scalar_lea.vmem %s2283_s14, 128  ;;  %p2285_p0 = scmp.lt.s32.totalorder %s2878_s20, %s2283_s14 }
 0x113   : > { %p2280_p2 = pnand %p2278_p13, %p2264_p4  ;;  %p2286_p3 = scmp.lt.s32.totalorder %s2284_s15, %s2277_s28 }
 0x115   : > { %p2281_p6 = pneg %p2280_p2  ;;  %p2287_p9 = por %p2286_p3, %p2285_p0 }
 0x117   : > { %p2288_p7 = pnand %p2287_p9, %p2281_p6 }
 0x119   : > { %2291 = shalt.err (!%p2288_p7)
}
 0x11a   : > { %1902 = dma.hbm_to_vmem [thread:$0]  (!%p2882_p5), %s2876_s7, 64, %s2878_s20, %s468_s1  }
 0x11b   : > { %s3307_s6 = sld [smem:[#allocation35_spill]] }
 0x121   : > { %p3308_p10 = scmp.ne.s32.totalorder %s3307_s6, 0 }
 0x122   : > { %s2943_s0 = sand.u32 (!%p3308_p10), 1, %s2438_s29   ;;  %p3309_p4 = scmp.ne.s32.totalorder (!%p3308_p10), %s3297_s25, 0 }
 0x123   : > { %537 = sbr.rel (%p3308_p10) target bundleno = 2013 (0x7dd), region = 68  ;;  %s1695_s21 = sshll.u32 (!%p3308_p10), %s2943_s0, 2 }
 0x124   : > { %s540_s24 = scalar_lea.sflag (!%p3308_p10), [#allocation6], %s2943_s0  ;;  %s2947_s26 = scalar_lea.vmem (!%p3308_p10), [#allocation5], %s1695_s21 }
 0x12a   : > { %2393 = dma.done.wait (%p3309_p4), %s540_s24, 64  }
 0x12b   : > { %2395 = vsyncadd (%p3309_p4), %s540_s24, 4294967232  ;;  %s3310_s27 = sld [smem:[#allocation34_spill]]  ;;  %s3311_s20 = sld [smem:[#allocation29_spill]] }
 0x12c   : > { %s3312_s7 = sld [smem:[#allocation36_spill]] }
 0x131   : > { %s548_s1 = sand.u32 1, %s3310_s27   ;;  %s550_s11 = sand.u32 1, %s3311_s20  }
 0x132   : > { %s2955_s5 = sshll.u32 %s550_s11, 3  ;;  %s549_s8 = scalar_lea.sflag [#allocation9], %s548_s1 }
 0x133   : > { %s552_s19 = scalar_lea.vmem [#allocation8], %s2955_s5  ;;  %p3313_p5 = scmp.ne.s32.totalorder %s3312_s7, 0 }
 0x135   : > { %2397 = dma.done.wait (%p3313_p5), %s549_s8, 256  }
 0x136   : > { %2399 = vsyncadd (%p3313_p5), %s549_s8, 4294967040  ;;  %s561_s22 = scalar_lea.vmem [#allocation10], %s2955_s5  ;;  %p3314_p1 = scmp.eq.s32.totalorder %s3310_s27, 0 }
 0x138   : > { %2401 = dma.done.wait (%p3314_p1), [#allocation12], 272   ;;  %p3315_p12 = pmov %p3314_p1 }
 0x139   : > { %p3316_p8 = pmov %p3314_p1 }
 0x13a   : > { %2403 = vsyncadd (%p3315_p12), [#allocation12], 4294967024 }
 0x13b   : > { %2405 = dma.done.wait (%p3316_p8), [#allocation15], 272   ;;  %p3317_p11 = pmov %p3314_p1 }
 0x13c   : > { %p3318_p13 = pmov %p3314_p1 }
 0x13d   : > { %2407 = vsyncadd (%p3317_p11), [#allocation15], 4294967024 }
 0x13e   : > { %2409 = dma.done.wait (%p3318_p13), [#allocation18], 16   ;;  %p3319_p2 = pmov %p3314_p1 }
 0x13f   : > { %s3320_s25 = sld [smem:[#allocation33_spill]]  ;;  %s1703_s28 = sshll.u32 %s2943_s0, 3 }
 0x140   : > { %2411 = vsyncadd (%p3319_p2), [#allocation18], 4294967280  ;;  %s1704_s13 = sshll.u32 %s2943_s0, 4  ;;  %s3321_s6 = sld [smem:[#allocation42_spill]] }
 0x141   : > { %s2985_s24 = scalar_lea.vmem [#allocation19], %s1703_s28  ;;  %s2987_s20 = scalar_lea.vmem [#allocation20], %s1704_s13 }
 0x142   : > { %s3322_s27 = sld [smem:[#allocation32_spill]] }
 0x145   : > { %p642_p6 = scmp.lt.s32.totalorder %s3320_s25, 1 }
 0x147   : > { %s3355_s25 = smov (!%p642_p6, %s3320_s25), 1 }
 0x148   : > { %s644_s21 = scalar_lea.vmem %s3321_s6, %s3355_s25  ;;  %p1705_p0 = scmp.ne.s32.totalorder %s3322_s27, 0 }
 0x149   : > { %s3323_s11 = sld [smem:[#allocation45_spill]] (!%p1705_p0)  ;;  %v2474_v1 = vmov (!%p1705_p0), 0.0   ;;  %v2037_v2 = vld [vmem:[#allocation16] sm:$0xff] (!%p1705_p0)   ;;  %vm2475_vm0 = vmmov (!%p1705_p0), 0   ;;  %v2039_v4 = vld [vmem:[#allocation16 + $0x8] sm:$0xff] (!%p1705_p0)   ;;  %vm680_vm1 = vcmask (!%p1705_p0), 261120  }
 0x14a   : > { %649 = sbr.rel (%p1705_p0) target bundleno = 562 (0x232), region = 104  ;;  %1773 = vmatprep.subr.bf16.mxu0 (!%p1705_p0), %v2474_v1  ;;  %1781 = vmatprep.subr.bf16.mxu1 (!%p1705_p0), %v2474_v1  ;;  %v2040_v5 = vld [vmem:[%s552_s19] sm:$0xff] (!%p1705_p0)   ;;  %v2041_v6 = vld [vmem:[%s561_s22] sm:$0xff] (!%p1705_p0)  }
 0x14b   : > { %1777 = vmatprep.mubr.msk.bf16.mxu0 (!%p1705_p0), %vm2475_vm0, %v2474_v1  ;;  %1782 = vmatpush3.bf16.msra.mxu1 (!%p1705_p0), %v2037_v2  ;;  %v1706_v7 = vld [vmem:[#allocation14] ss:$0 sm:$0xff] (!%p1705_p0)  ;;  %v1711_v9 = vld [vmem:[#allocation17] ss:$0 sm:$0xff] (!%p1705_p0) }
 0x14c   : > { %1783 = vmatprep.subr.bf16.mxu1 (!%p1705_p0), %v2474_v1  ;;  %1785 = vmatprep.mubr.msk.bf16.mxu1 (!%p1705_p0), %vm2475_vm0, %v2474_v1 }
 0x14f   : > { %v2036_v0 = vld [vmem:[%s3323_s11] sm:$0xff] (!%p1705_p0)   ;;  %v2038_v3 = vld [vmem:[%s3323_s11 + $0x8] sm:$0xff] (!%p1705_p0)   ;;  %1784 = vmatpush3.bf16.msra.mxu1 (!%p1705_p0), %v2039_v4 }
 0x150   : > { %1774 = vmatpush3.bf16.msra.mxu0 (!%p1705_p0), %v2036_v0 }
 0x151   : > { %1775 = vmatprep.subr.bf16.mxu0 %v2474_v1 }
 0x152   : > { %1786 = vmatmul.mubr.msk.bf16.vlgmr.msra.gmra.mrb[0].mxu1 %vm680_vm1, %v2041_v6 }
 0x154   : > { %1776 = vmatpush3.bf16.msra.mxu0 %v2038_v3 }
 0x157   : > { %1778 = vmatmul.mubr.msk.bf16.vlgmr.msra.gmra.mrb[0].mxu0 %vm680_vm1, %v2040_v5 }
 0x225   : > { %v792_v10 = vpop.f32.mrb[0].mxu1 }
 0x226   : > { %v1787_v12 = vpop.f32.mrb[1].mxu1  ;;  %v793_v18 = vadd.f32 %v1711_v9, %v792_v10 }
 0x227   : > { %v795_v16 = vpop.f32.mrb[2].mxu1 }
 0x228   : > { %v796_v19 = vadd.f32 %v1711_v9, %v795_v16  ;;  %v1788_v20 = vpop.f32.mrb[3].mxu1 }
 0x22a   : > { %v718_v8 = vpop.f32.mrb[0].mxu0  ;;  %v801_v22 = vpack.c.bf16 %v796_v19, %v793_v18 }
 0x22b   : > { %v1779_v11 = vpop.f32.mrb[1].mxu0  ;;  %v719_v14 = vadd.f32 %v1706_v7, %v718_v8 }
 0x22c   : > { %v721_v13 = vpop.f32.mrb[2].mxu0  ;;  %802 = vst.msk [vmem:[#allocation3] sm:$0xff] %vm680_vm1, %v801_v22 }
 0x22d   : > { %v722_v15 = vadd.f32 %v1706_v7, %v721_v13  ;;  %v1780_v17 = vpop.f32.mrb[3].mxu0 }
 0x22f   : > { %v799_v21 = vpack.c.bf16 %v722_v15, %v719_v14 }
 0x231   : > { %800 = vst.msk [vmem:[#allocation2] sm:$0xff] %vm680_vm1, %v799_v21 }
 0x232 PF: > { %v2042_v23 = vld [vmem:[#allocation11] sm:$0xff]   ;;  %v2476_v24 = vmov 0.0   ;;  %v2043_v25 = vld [vmem:[#allocation11 + $0x8] sm:$0xff]   ;;  %vm2477_vm2 = vmmov 0   ;;  %vm883_vm3 = vcmask 64512   ;;  %s2478_s5 = smov 120   ;;  %v878_v45 = vlaneseq }
 0x233   : > { %1789 = vmatprep.subr.bf16.mxu0 %v2476_v24  ;;  %1797 = vmatprep.subr.bf16.mxu1 %v2476_v24  ;;  %v803_v28 = vld [vmem:[%s2947_s26] sm:$0xf]  ;;  %vm827_vm4 = vcmask 261120   ;;  %s2479_s19 = smov 112   ;;  %v1716_v29 = vld [vmem:[#allocation13] ss:$0 sm:$0xff] }
 0x234   : > { %1790 = vmatpush3.bf16.msra.mxu0 %v2042_v23  ;;  %1793 = vmatprep.mubr.msk.bf16.mxu0 %vm2477_vm2, %v2476_v24  ;;  %s2480_s26 = smov 104   ;;  %v872_v46 = vld [vmem:[%s644_s21] sm:$0x1]  ;;  %v879_v47 = vshrl.u32 %v878_v45, 7  ;;  %vm930_vm6 = vcmask 130048   ;;  %v990_v57 = vld [vmem:[#allocation3] sm:$0xff] }
 0x235   : > { %1791 = vmatprep.subr.bf16.mxu0 %v2476_v24  ;;  %1799 = vmatprep.mubr.msk.bf16.mxu1 %vm2477_vm2, %v2476_v24  ;;  %vm873_vm5 = vcmp.eq.f32.partialorder %v872_v46, 0.0  ;;  %vm943_vm7 = vcmask 125952   ;;  %s2481_s25 = smov 8   ;;  %s3325_s21 = sld [smem:[#allocation49_spill]]  ;;  %vm1108_vm8 = vcmask 130112   ;;  %vm1228_vm9 = vcmask 195712  }
 0x236   : > { %v880_v48 = vsub.s32 0, %v879_v47  ;;  %v874_v49 = vsel %vm873_vm5, -inf, %v2476_v24  ;;  %s2482_s1 = smov 16   ;;  %s2483_s8 = smov 24   ;;  %vm1348_vm10 = vcmask 261312  }
 0x237   : > { %s3326_s14 = sld [smem:[#allocation33_spill]]  ;;  %s1454_s28 = sshll.u32 %s2987_s20, 4  ;;  %s3097_s28 = int_to_ptr.vmem [resolvable:$true] %s1454_s28 }
 0x238   : > { %v989_v26 = vld [vmem:[#allocation2] sm:$0xff]  ;;  %1792 = vmatpush3.bf16.msra.mxu0 %v2043_v25  ;;  %v881_v50 = vrot.slane %v874_v49, %v880_v48  ;;  %s3328_s15 = sld [smem:[#allocation52_spill]]  ;;  %s1425_s7 = scalar_lea.sflag [#allocation21], %s2943_s0 }
 0x239   : > { %995 = vrot.lane.b32.xlu0 %v989_v26, %s2478_s5  ;;  %v888_v27 = vsel %vm883_vm3, %v989_v26, 0  ;;  %1803 = vmatprep.subr.bf16.mxu0 %v2476_v24  ;;  %p3330_p9 = scmp.ne.s32.totalorder %s3298_s10, 0 }
 0x23a   : > { %1798 = vmatpush3.bf16.xpose.msra.mxu1 %v888_v27  ;;  %1115 = vrot.lane.b32.xlu1 %v989_v26, %s2479_s19 }
 0x23b   : > { %1809 = vmatprep.subr.bf16.mxu1 %v2476_v24  ;;  %1794 = vmatmul.mubr.msk.bf16.vlgmr.msra.gmra.mrb[0].mxu0 %vm827_vm4, %v803_v28 }
 0x23c   : > { %1805 = vmatprep.mubr.msk.bf16.mxu0 %vm2477_vm2, %v2476_v24  ;;  %1804 = vmatpush3.bf16.msra.mxu0 %v990_v57 }
 0x23d   : > { %1815 = vmatprep.subr.bf16.mxu0 %v2476_v24 }
 0x23e   : > { %s3329_s6 = smov %s3328_s15 }
 0x2ab   : > { %v996_v33 = vpop.permute.xlu0 %995 }
 0x2ac   : > { %v1001_v37 = vsel %vm883_vm3, %v996_v33, 0  ;;  %v1116_v38 = vpop.permute.xlu1 %1115 }
 0x2ad   : > { %v1121_v39 = vsel %vm883_vm3, %v1116_v38, 0 }
 0x30e   : > { %v865_v30 = vpop.f32.mrb[0].mxu0 }
 0x30f   : > { %v866_v31 = vadd.f32 %v1716_v29, %v865_v30  ;;  %v1795_v32 = vpop.f32.mrb[1].mxu0 }
 0x310   : > { %v868_v34 = vpop.f32.mrb[2].mxu0 }
 0x311   : > { %v871_v35 = vpack.c.bf16 %v866_v31, %v866_v31  ;;  %v1796_v36 = vpop.f32.mrb[3].mxu0 }
 0x313   : > { %1112 = vrot.lane.b32.xlu1 %v871_v35, %s2479_s19  ;;  %992 = vrot.lane.b32.xlu0 %v871_v35, %s2478_s5 }
 0x314   : > { %1800 = vmatmul.mubr.msk.bf16.vlgmr.msra.gmra.mrb[0].mxu1 %vm883_vm3, %v871_v35 }
 0x315   : > { %1810 = vmatpush3.bf16.xpose.msra.mxu1 %v1001_v37  ;;  %1811 = vmatprep.mubr.msk.bf16.mxu1 %vm2477_vm2, %v2476_v24 }
 0x316   : > { %1821 = vmatprep.subr.bf16.mxu1 %v2476_v24 }
 0x317   : > { %1232 = vrot.lane.b32.xlu1 %v871_v35, %s2480_s26  ;;  %1235 = vrot.lane.b32.xlu0 %v989_v26, %s2480_s26 }
 0x385   : > { %v993_v40 = vpop.permute.xlu0 %992  ;;  %v1113_v43 = vpop.permute.xlu1 %1112 }
 0x386   : > { %1812 = vmatmul.mubr.msk.bf16.vlgmr.msra.gmra.mrb[4].mxu1 %vm883_vm3, %v993_v40 }
 0x387   : > { %1822 = vmatpush3.bf16.xpose.msra.mxu1 %v1121_v39  ;;  %1823 = vmatprep.mubr.msk.bf16.mxu1 %vm2477_vm2, %v2476_v24 }
 0x388   : > { %1833 = vmatprep.subr.bf16.mxu1 %v2476_v24 }
 0x389   : > { %v1236_v41 = vpop.permute.xlu0 %1235  ;;  %v1233_v44 = vpop.permute.xlu1 %1232 }
 0x38a   : > { %v1241_v42 = vsel %vm883_vm3, %v1236_v41, 0 }
 0x38e   : > { %1824 = vmatmul.mubr.msk.bf16.vlgmr.msra.gmra.mrb[8].mxu1 %vm883_vm3, %v1113_v43 }
 0x38f   : > { %1834 = vmatpush3.bf16.xpose.msra.mxu1 %v1241_v42  ;;  %1835 = vmatprep.mubr.msk.bf16.mxu1 %vm2477_vm2, %v2476_v24 }
 0x390   : > { %1845 = vmatprep.subr.bf16.mxu1 %v2476_v24 }
 0x396   : > { %1836 = vmatmul.mubr.msk.bf16.vlgmr.msra.gmra.mrb[12].mxu1 %vm883_vm3, %v1233_v44 }
 0x397   : > { %1849 = vmatprep.mubr.msk.bf16.mxu1 %vm2477_vm2, %v2476_v24 }
 0x3e7   : > { %v924_v51 = vpop.f32.mrb[0].mxu1 }
 0x3e8   : > { %v925_v52 = vadd.f32 %v924_v51, %v881_v50  ;;  %v1801_v53 = vpop.f32.mrb[1].mxu1 }
 0x3e9   : > { %v927_v54 = vpop.f32.mrb[2].mxu1 }
 0x3ea   : > { %v1802_v55 = vpop.f32.mrb[3].mxu1  ;;  %v931_v56 = vsel %vm930_vm6, %v925_v52, -inf }
 0x3eb   : > { %932 = vmax.xlane.f32.xlu0 %v931_v56 }
 0x459   : > { %v1037_v58 = vpop.f32.mrb[4].mxu1 }
 0x45a   : > { %v1038_v59 = vadd.f32 %v1037_v58, %v881_v50  ;;  %v1813_v60 = vpop.f32.mrb[5].mxu1 }
 0x45b   : > { %v1040_v61 = vpop.f32.mrb[6].mxu1  ;;  %v2044_v60 = vld [vmem:[%s3325_s21] sm:$0xff]  }
 0x45c   : > { %v1814_v62 = vpop.f32.mrb[7].mxu1  ;;  %v1043_v63 = vsel %vm930_vm6, %v1038_v59, -inf  ;;  %1846 = vmatpush3.bf16.msra.mxu1 %v2044_v60  ;;  %v2045_v61 = vld [vmem:[%s3325_s21 + $0x8] sm:$0xff]  }
 0x45d   : > { %1044 = vmax.xlane.f32.xlu1 %v1043_v63  ;;  %1847 = vmatprep.subr.bf16.mxu1 %v2476_v24 }
 0x460   : > { %1848 = vmatpush3.bf16.msra.mxu1 %v2045_v61 }
 0x461   : > { %v1157_v0 = vpop.f32.mrb[8].mxu1 }
 0x462   : > { %v1158_v1 = vadd.f32 %v1157_v0, %v881_v50  ;;  %v1825_v2 = vpop.f32.mrb[9].mxu1 }
 0x463   : > { %v1160_v3 = vpop.f32.mrb[10].mxu1 }
 0x464   : > { %v1826_v4 = vpop.f32.mrb[11].mxu1  ;;  %v1163_v5 = vsel %vm930_vm6, %v1158_v1, -inf }
 0x465   : > { %1164 = vmax.xlane.f32.xlu0 %v1163_v5 }
 0x469   : > { %v1277_v6 = vpop.f32.mrb[12].mxu1 }
 0x46a   : > { %v1278_v7 = vadd.f32 %v1277_v6, %v881_v50  ;;  %v1837_v8 = vpop.f32.mrb[13].mxu1 }
 0x46b   : > { %v1280_v9 = vpop.f32.mrb[14].mxu1 }
 0x46c   : > { %v1838_v10 = vpop.f32.mrb[15].mxu1  ;;  %v1283_v11 = vsel %vm930_vm6, %v1278_v7, -inf }
 0x46d   : > { %1284 = vmax.xlane.f32.xlu0 %v1283_v11 }
 0x478   : > { %v933_v12 = vpop.xlane.xlu0 %932 }
 0x479   : > { %v934_v13 = vsub.f32 %v925_v52, %v933_v12 }
 0x47b   : > { %v935_v14 = vmul.f32 1.442695, %v934_v13 }
 0x47d   : > { %2046 = vpow2.f32 %v935_v14 }
 0x487   : > { %v2047_v15 = vpop.eup %2046 }
 0x488   : > { %v937_v16 = vsel %vm930_vm6, %v2047_v15, 0.0 }
 0x489   : > { %938 = vadd.xlane.f32.xlu1 %v937_v16 }
 0x49a   : > { %1058 = vrot.lane.b32.xlu1 %v990_v57, %s2478_s5  ;;  %s3327_s5 = sld [smem:[#allocation32_spill]] }
 0x4ea   : > { %v1045_v17 = vpop.xlane.xlu1 %1044 }
 0x4eb   : > { %v1046_v18 = vsub.f32 %v1038_v59, %v1045_v17 }
 0x4ed   : > { %v1047_v19 = vmul.f32 1.442695, %v1046_v18 }
 0x4ef   : > { %2048 = vpow2.f32 %v1047_v19 }
 0x4f2   : > { %v1165_v20 = vpop.xlane.xlu0 %1164 }
 0x4f3   : > { %v1166_v21 = vsub.f32 %v1158_v1, %v1165_v20 }
 0x4f5   : > { %v1167_v22 = vmul.f32 1.442695, %v1166_v21 }
 0x4f7   : > { %2050 = vpow2.f32 %v1167_v22 }
 0x4f9   : > { %v2049_v23 = vpop.eup %2048 }
 0x4fa   : > { %v1285_v25 = vpop.xlane.xlu0 %1284  ;;  %v1049_v26 = vsel %vm930_vm6, %v2049_v23, 0.0 }
 0x4fb   : > { %v1286_v27 = vsub.f32 %v1278_v7, %v1285_v25  ;;  %1050 = vadd.xlane.f32.xlu0 %v1049_v26 }
 0x4fd   : > { %v1287_v28 = vmul.f32 1.442695, %v1286_v27 }
 0x4ff   : > { %2052 = vpow2.f32 %v1287_v28 }
 0x501   : > { %v2051_v29 = vpop.eup %2050 }
 0x502   : > { %v1169_v30 = vsel %vm930_vm6, %v2051_v29, 0.0 }
 0x503   : > { %1170 = vadd.xlane.f32.xlu1 %v1169_v30 }
 0x509   : > { %v2053_v31 = vpop.eup %2052 }
 0x50a   : > { %v1289_v32 = vsel %vm930_vm6, %v2053_v31, 0.0 }
 0x50b   : > { %1290 = vadd.xlane.f32.xlu0 %v1289_v32 }
 0x514   : > { %1298 = vrot.lane.b32.xlu1 %v990_v57, %s2480_s26 }
 0x516   : > { %v939_v33 = vpop.xlane.xlu1 %938 }
 0x517   : > { %2054 = vrcp.f32 %v939_v33 }
 0x51a   : > { %v1059_v37 = vpop.permute.xlu1 %1058 }
 0x521   : > { %v2055_v34 = vpop.eup %2054  ;;  %1178 = vrot.lane.b32.xlu0 %v990_v57, %s2479_s19  ;;  %s1739_s19 = sshll.u32 %s3326_s14, 3 }
 0x522   : > { %v941_v35 = vmul.f32 %v2055_v34, %v2047_v15  ;;  %s1451_s26 = sadd.s32 %s3327_s5, %s1739_s19 }
 0x523   : > { %s1740_s22 = sshll.u32 %s1451_s26, 6 }
 0x524   : > { %v942_v36 = vpack.c.bf16 %v941_v35, %v941_v35  ;;  %s3095_s27 = scalar_lea.hbm %s3328_s15, %s1740_s22 }
 0x526   : > { %944 = vst.msk [vmem:[%s2987_s20] sm:$0xf] %vm943_vm7, %v942_v36  ;;  %1806 = vmatmul.mubr.msk.bf16.vlgmr.msra.gmra.mrb[4].mxu0 %vm930_vm6, %v942_v36 }
 0x527   : > { %1816 = vmatpush3.bf16.msra.mxu0 %v1059_v37  ;;  %1817 = vmatprep.mubr.msk.bf16.mxu0 %vm2477_vm2, %v2476_v24 }
 0x528   : > { %1827 = vmatprep.subr.bf16.mxu0 %v2476_v24 }
 0x588   : > { %v1051_v38 = vpop.xlane.xlu0 %1050 }
 0x589   : > { %2056 = vrcp.f32 %v1051_v38 }
 0x590   : > { %v1171_v39 = vpop.xlane.xlu1 %1170 }
 0x591   : > { %2058 = vrcp.f32 %v1171_v39 }
 0x593   : > { %v2057_v40 = vpop.eup %2056 }
 0x594   : > { %v1053_v41 = vmul.f32 %v2057_v40, %v2049_v23  ;;  %v1299_v48 = vpop.permute.xlu1 %1298 }
 0x596   : > { %v1054_v42 = vpack.c.bf16 %v1053_v41, %v1053_v41 }
 0x598   : > { %1723 = vst.msk [vmem:[%s2987_s20 + $0x4] sm:$0xf] %vm943_vm7, %v1054_v42  ;;  %1818 = vmatmul.mubr.msk.bf16.vlgmr.msra.gmra.mrb[8].mxu0 %vm930_vm6, %v1054_v42  ;;  %v1291_v43 = vpop.xlane.xlu0 %1290 }
 0x599   : > { %2060 = vrcp.f32 %v1291_v43  ;;  %1829 = vmatprep.mubr.msk.bf16.mxu0 %vm2477_vm2, %v2476_v24 }
 0x59b   : > { %v2059_v44 = vpop.eup %2058 }
 0x59c   : > { %v1173_v45 = vmul.f32 %v2059_v44, %v2051_v29  ;;  %v1179_v46 = vpop.permute.xlu0 %1178 }
 0x59d   : > { %1828 = vmatpush3.bf16.msra.mxu0 %v1179_v46 }
 0x59e   : > { %v1174_v47 = vpack.c.bf16 %v1173_v45, %v1173_v45  ;;  %1839 = vmatprep.subr.bf16.mxu0 %v2476_v24 }
 0x5a0   : > { %1726 = vst.msk [vmem:[%s2987_s20 + $0x8] sm:$0xf] %vm943_vm7, %v1174_v47  ;;  %1830 = vmatmul.mubr.msk.bf16.vlgmr.msra.gmra.mrb[12].mxu0 %vm930_vm6, %v1174_v47 }
 0x5a1   : > { %1840 = vmatpush3.bf16.msra.mxu0 %v1299_v48  ;;  %1841 = vmatprep.mubr.msk.bf16.mxu0 %vm2477_vm2, %v2476_v24 }
 0x5a3   : > { %v2061_v49 = vpop.eup %2060 }
 0x5a4   : > { %v1293_v50 = vmul.f32 %v2061_v49, %v2053_v31 }
 0x5a6   : > { %v1294_v51 = vpack.c.bf16 %v1293_v50, %v1293_v50 }
 0x5a8   : > { %1729 = vst.msk [vmem:[%s2987_s20 + $0xc] sm:$0xf] %vm943_vm7, %v1294_v51  ;;  %1842 = vmatmul.mubr.msk.bf16.vlgmr.msra.gmra.mrb[16].mxu0 %vm930_vm6, %v1294_v51 }
 0x5f9   : > { %v982_v52 = vpop.f32.mrb[4].mxu0 }
 0x5fa   : > { %988 = vst.msk [vmem:[#allocation4] sm:$0xff] %vm883_vm3, %v982_v52  ;;  %v1807_v53 = vpop.f32.mrb[5].mxu0 }
 0x5fb   : > { %v985_v54 = vpop.f32.mrb[6].mxu0 }
 0x5fc   : > { %v1808_v55 = vpop.f32.mrb[7].mxu0 }
 0x66b   : > { %v1098_v56 = vpop.f32.mrb[8].mxu0 }
 0x66c   : > { %1105 = vrot.lane.b32.xlu1 %v1098_v56, %s2481_s25  ;;  %v1819_v57 = vpop.f32.mrb[9].mxu0 }
 0x66d   : > { %v1101_v58 = vpop.f32.mrb[10].mxu0 }
 0x66e   : > { %v1820_v59 = vpop.f32.mrb[11].mxu0 }
 0x673   : > { %v1218_v62 = vpop.f32.mrb[12].mxu0 }
 0x674   : > { %1225 = vrot.lane.b32.xlu0 %v1218_v62, %s2482_s1  ;;  %v1831_v63 = vpop.f32.mrb[13].mxu0  ;;  %s2292_s1 = scalar_lea.vmem %s3097_s28, 256 }
 0x675   : > { %v1221_v0 = vpop.f32.mrb[14].mxu0  ;;  %p2293_p3 = scmp.ne.s32.totalorder %s3097_s28, %s2292_s1 }
 0x676   : > { %v1832_v1 = vpop.f32.mrb[15].mxu0 }
 0x677   : > { %p2294_p7 = pnand %p2293_p3, %p3330_p9 }
 0x679   : > { %p2295_p10 = pneg %p2294_p7 }
 0x67b   : > { %v1338_v2 = vpop.f32.mrb[16].mxu0 }
 0x67c   : > { %1345 = vrot.lane.b32.xlu1 %v1338_v2, %s2483_s8  ;;  %v1843_v3 = vpop.f32.mrb[17].mxu0  ;;  %s2484_s8 = smov [#allocation20]  }
 0x67d   : > { %v1341_v4 = vpop.f32.mrb[18].mxu0  ;;  %s2296_s19 = sshll.u32 %s2484_s8, 4  ;;  %s2297_s19 = int_to_ptr.vmem [resolvable:$false] %s2296_s19 }
 0x67e   : > { %v1844_v5 = vpop.f32.mrb[19].mxu0  ;;  %s2298_s20 = scalar_lea.vmem %s2297_s19, 512  ;;  %p2299_p4 = scmp.lt.s32.totalorder %s3097_s28, %s2297_s19 }
 0x67f   : > { %p2300_p5 = scmp.lt.s32.totalorder %s2298_s20, %s2292_s1 }
 0x681   : > { %p2301_p1 = por %p2300_p5, %p2299_p4 }
 0x683   : > { %p2302_p12 = pnand %p2301_p1, %p2295_p10 }
 0x6de   : > { %v1106_v6 = vpop.permute.xlu1 %1105 }
 0x6df   : > { %1109 = vst.msk [vmem:[#allocation4] sm:$0xff] %vm1108_vm8, %v1106_v6 }
 0x6e6   : > { %v1226_v24 = vpop.permute.xlu0 %1225 }
 0x6e7   : > { %1229 = vst.msk [vmem:[#allocation4] sm:$0xff] %vm1228_vm9, %v1226_v24 }
 0x6ee   : > { %v1346_v7 = vpop.permute.xlu1 %1345 }
 0x6ef   : > { %1349 = vst.msk [vmem:[#allocation4] sm:$0xff] %vm1348_vm10, %v1346_v7 }
 0x6f6   : > { %v1350_v8 = vld [vmem:[#allocation4] sm:$0xff] }
 0x6f7   : > { %v1351_v9 = vpack.c.bf16 %v1350_v8, %v1350_v8 }
 0x6f9   : > { %1850 = vmatmul.mubr.msk.bf16.vlgmr.msra.gmra.mrb[16].mxu1 %vm827_vm4, %v1351_v9 }
 0x6fa   : > { %2305 = shalt.err (!%p2302_p12)
}
 0x6fb   : > { %s2306_s26 = scalar_lea.hbm %s3095_s27, 256  ;;  %s2310_s25 = scalar_lea.hbm %s3329_s6, 1024 }
 0x6fc   : > { %p2307_p8 = scmp.ne.s32.totalorder %s3095_s27, %s2306_s26  ;;  %p2311_p2 = scmp.lt.u32.totalorder %s3095_s27, %s3329_s6 }
 0x6fd   : > { %p2312_p6 = scmp.lt.u32.totalorder %s2310_s25, %s2306_s26  ;;  %p2314_p3 = scmp.lt.u32.totalorder %s2306_s26, %s3095_s27 }
 0x6fe   : > { %p2308_p11 = pnand %p2307_p8, %p3330_p9 }
 0x6ff   : > { %p2313_p0 = por %p2312_p6, %p2311_p2 }
 0x700   : > { %p2309_p13 = pneg %p2308_p11 }
 0x701   : > { %p2315_p7 = por %p2314_p3, %p2313_p0 }
 0x703   : > { %p2316_p10 = pnand %p2315_p7, %p2309_p13 }
 0x705   : > { %2319 = shalt.err (!%p2316_p10)
}
 0x706   : > { %s2485_s1 = smov 64   ;;  %s2486_s19 = smov 128  }
 0x707   : > { %s2487_s20 = smov 4   ;;  %s1737_s22 = sshll.u32 %s3326_s14, 1 }
 0x708   : > { %1880 = dma.vmem_to_hbm [thread:$0]  (%p3330_p9), %s3097_s28, 256, %s3095_s27, %s1425_s7, %s2485_s1, %s2486_s19, %s2487_s20  }
 0x709   : > { %s1436_s26 = sadd.s32 %s3327_s5, %s1737_s22  ;;  %s3331_s15 = sld [smem:[#allocation50_spill]] }
 0x70a   : > { %s1738_s8 = sshll.u32 %s1436_s26, 7  ;;  %s1440_s2 = sshll.u32 %s2985_s24, 4  ;;  %s3134_s2 = int_to_ptr.vmem [resolvable:$true] %s1440_s2 }
 0x70b   : > { %s3332_s11 = sld [smem:[#allocation51_spill]]  ;;  %s1420_s14 = scalar_lea.sflag [#allocation7], %s2943_s0 }
 0x70c   : > { %s2320_s5 = scalar_lea.vmem %s3134_s2, 128  ;;  %s2488_s28 = smov [#allocation19]  }
 0x70d   : > { %p2321_p4 = scmp.ne.s32.totalorder %s3134_s2, %s2320_s5  ;;  %s2324_s27 = sshll.u32 %s2488_s28, 4  ;;  %s2325_s27 = int_to_ptr.vmem [resolvable:$false] %s2324_s27 }
 0x70e   : > { %s2326_s9 = scalar_lea.vmem %s2325_s27, 256  ;;  %p2327_p12 = scmp.lt.s32.totalorder %s3134_s2, %s2325_s27 }
 0x70f   : > { %v1731_v10 = vld [vmem:[%s3331_s15] ss:$0 sm:$0xff]  ;;  %p2322_p5 = pnand %p2321_p4, %p3330_p9  ;;  %p2328_p8 = scmp.lt.s32.totalorder %s2326_s9, %s2320_s5 }
 0x711   : > { %s3132_s21 = scalar_lea.hbm %s3332_s11, %s1738_s8  ;;  %p2323_p1 = pneg %p2322_p5 }
 0x712   : > { %p2329_p11 = por %p2328_p8, %p2327_p12 }
 0x714   : > { %p2330_p13 = pnand %p2329_p11, %p2323_p1 }
 0x7cc   : > { %v1412_v11 = vpop.f32.mrb[16].mxu1 }
 0x7cd   : > { %v1413_v12 = vadd.f32 %v1731_v10, %v1412_v11  ;;  %v1851_v13 = vpop.f32.mrb[17].mxu1 }
 0x7ce   : > { %v1415_v14 = vpop.f32.mrb[18].mxu1 }
 0x7cf   : > { %1418 = vst.msk [vmem:[%s2985_s24] sm:$0xff] %vm827_vm4, %v1413_v12  ;;  %v1852_v15 = vpop.f32.mrb[19].mxu1 }
 0x7d0   : > { %2333 = shalt.err (!%p2330_p13)
}
 0x7d1   : > { %s2334_s0 = scalar_lea.hbm %s3132_s21, 128  ;;  %s2338_s7 = scalar_lea.hbm %s3332_s11, 512 }
 0x7d2   : > { %p2335_p2 = scmp.ne.s32.totalorder %s3132_s21, %s2334_s0  ;;  %p2339_p3 = scmp.lt.u32.totalorder %s3132_s21, %s3332_s11 }
 0x7d3   : > { %p2340_p7 = scmp.lt.u32.totalorder %s2338_s7, %s2334_s0  ;;  %p2342_p4 = scmp.lt.u32.totalorder %s2334_s0, %s3132_s21 }
 0x7d4   : > { %p2336_p6 = pnand %p2335_p2, %p3330_p9 }
 0x7d5   : > { %p2341_p10 = por %p2340_p7, %p2339_p3 }
 0x7d6   : > { %p2337_p0 = pneg %p2336_p6 }
 0x7d7   : > { %p2343_p5 = por %p2342_p4, %p2341_p10 }
 0x7d9   : > { %p2344_p1 = pnand %p2343_p5, %p2337_p0 }
 0x7db   : > { %2347 = shalt.err (!%p2344_p1)
}
 0x7dc   : > { %1879 = dma.vmem_to_hbm [thread:$0]  (%p3330_p9), %s3134_s2, 128, %s3132_s21, %s1420_s14  }
 0x7dd PF: > { %s3333_s20 = sld [smem:[#allocation31_spill]]  ;;  %p1927_p12 = scmp.ge.s32.totalorder %s2462_s18, 2 }
 0x7de   : > { %p3334_p8 = scmp.ne.s32.totalorder %s3299_s3, 0 }
 0x7e0   : > { %p1910_p11 = pnand %p1927_p12, %p3334_p8 }
 0x7e3   : > { %s1469_s22 = sand.u32 1, %s3333_s20  }
 0x7e4   : > { %s1470_s26 = scalar_lea.sflag [#allocation7], %s1469_s22 }
 0x7e5   : > { %2413 = dma.done.wait (!%p1910_p11), %s1470_s26, 128  }
 0x7e6   : > { %2415 = vsyncadd (!%p1910_p11), %s1470_s26, 4294967168  ;;  %s1479_s13 = scalar_lea.sflag [#allocation21], %s1469_s22 }
 0x7e7   : > { %2417 = dma.done.wait (!%p1910_p11), %s1479_s13, 256  }
 0x7e8   : > { %2419 = vsyncadd (!%p1910_p11), %s1479_s13, 4294967040  ;;  %s39_s18 = sadd.s32 1, %s2462_s18   ;;  %s3335_s25 = sld [smem:[#allocation29_spill]] }
 0x7e9   : > { %p36_p13 = scmp.ge.s32.totalorder %s39_s18, 6   ;;  %s3336_s26 = sld [smem:[#allocation30_spill]] }
 0x7ea   : > { %s3337_s2 = sld [smem:[#allocation38_spill]]  ;;  %s3338_s27 = smov %s3353_s4 }
 0x7eb   : > { %s3339_s28 = smov %s2438_s29  ;;  %s3340_s29 = smov %s2442_s30 }
 0x7ec   : > { %s3341_s30 = smov %s2861_s12  ;;  %s3342_s14 = smov %s2454_s16 }
 0x7ed   : > { %s3343_s15 = smov %s2458_s17  ;;  %s3344_s16 = smov %s3347_s23 }
 0x7ee   :  { %38 = sbr.rel (!%p36_p13) target bundleno = 31 (0x1f), region = 184 }
 0x7f0   : > { %s3345_s17 = smov %s3337_s2 }
 0x7f5   :  { %1484 = vsyncpa [#allocation6], 1 }
 0x7f6   :  { %1486 = vsyncpa [#allocation6 + $0x1], 1 }
 0x7f7   :  { %1487 = vsyncpa [#allocation9], 1 }
 0x7f8   :  { %1489 = vsyncpa [#allocation9 + $0x1], 1 }
 0x7f9   :  { %1490 = vsyncpa [#allocation12], 1 }
 0x7fa   :  { %1491 = vsyncpa [#allocation15], 1 }
 0x7fb   :  { %1492 = vsyncpa [#allocation18], 1 }
 0x7fc   :  { %1493 = vsyncpa [#allocation7], 1 }
 0x7fd   :  { %1495 = vsyncpa [#allocation7 + $0x1], 1 }
 0x7fe   :  { %1496 = vsyncpa [#allocation21], 1 }
 0x7ff   :  { %1498 = vsyncpa [#allocation21 + $0x1], 1 }

</bundles_post_ra>
